<compile_context>
chip_gen: v7x
topology: tpu7x:2x2x1
jax: 0.10.0
libtpu: 0.0.40
codegen_flags: <defaults>
</compile_context>

<pallas_src>
import jax
import jax.numpy as jnp
from jax import lax
from jax.experimental import pallas as pl
from jax.experimental.pallas import tpu as pltpu

HIDDEN = (1000, 100)
BN_EPS = 1e-5
LANE = 128


def _pad_to(n, m):
    return ((n + m - 1) // m) * m


def tsae_kernel(x_ref, eps_ref,
                w0, b0, g0, be0,          # encoder layer 0 (padded)
                w1, b1, g1, be1,          # encoder layer 1 (padded)
                wmv, bmv,                 # fused fc_mu | fc_var (padded)
                wd0, bd0, gd0, bed0,      # decoder layer 0 (padded)
                wout, bout,               # decoder_input (padded)
                e_ref, mu_ref, logvar_ref, rx_ref):
    def linear(h, w_r, b_r):
        # bf16 operands on the MXU, f32 accumulation, f32 bias add.
        return jnp.dot(h.astype(jnp.bfloat16), w_r[...],
                       preferred_element_type=jnp.float32) + b_r[...]

    def bn_relu(h, g_r, be_r):
        # training-mode BatchNorm1d, biased batch stats, single pass over h.
        n = h.shape[0]
        s = jnp.sum(h, axis=0, keepdims=True)
        ss = jnp.sum(h * h, axis=0, keepdims=True)
        mean = s * (1.0 / n)
        var = jnp.maximum(ss * (1.0 / n) - mean * mean, 0.0)
        hn = (h - mean) * lax.rsqrt(var + BN_EPS)
        return jnp.maximum(hn * g_r[...] + be_r[...], 0.0)

    # Encoder layer 0: contract over ts_len (dim 0 of x) directly -> (N, 1024);
    # no wrapper-side transpose of x needed.
    x = x_ref[...].astype(jnp.bfloat16)                              # (Tp, N)
    h0 = lax.dot_general(x, w0[...], (((0,), (0,)), ((), ())),
                         preferred_element_type=jnp.float32) + b0[...]
    h = bn_relu(h0, g0, be0)                                         # (N, 1024)
    E = bn_relu(linear(h, w1, b1), g1, be1)                          # (N, 128)
    e_ref[...] = E

    # Fused fc_mu | fc_var: one (128, 256) matmul, then split halves.
    mv = linear(E, wmv, bmv)                                         # (N, 256)
    half = mv.shape[-1] // 2
    mu = mv[:, :half]
    logvar = mv[:, half:]
    mu_ref[...] = mu
    logvar_ref[...] = logvar

    # Reparameterize in f32 (padded eps / logvar columns are zero -> z padding is 0).
    z = eps_ref[...] * jnp.exp(0.5 * logvar) + mu                    # (N, 128)

    d = bn_relu(linear(z, wd0, bd0), gd0, bed0)                      # (N, 1024)
    rx_ref[...] = linear(d, wout, bout)                              # (N, Tp)


# ---------------------------------------------------------------------------
# Parameter construction (PyTorch-style init at real dims) and kernel packing.
# ---------------------------------------------------------------------------

def _linear_params(key, fan_in, fan_out):
    kw, kb = jax.random.split(key)
    bound = float(fan_in) ** -0.5
    w = jax.random.uniform(kw, (fan_in, fan_out), jnp.float32, -bound, bound)
    b = jax.random.uniform(kb, (fan_out,), jnp.float32, -bound, bound)
    return w, b


def _bn_params(dim):
    return jnp.ones((dim,), jnp.float32), jnp.zeros((dim,), jnp.float32)


def init_params(key, ts_len):
    k0, k1, kmu, kvar, kd0, kout = jax.random.split(key, 6)
    w0, b0 = _linear_params(k0, ts_len, HIDDEN[0])
    g0, be0 = _bn_params(HIDDEN[0])
    w1, b1 = _linear_params(k1, HIDDEN[0], HIDDEN[1])
    g1, be1 = _bn_params(HIDDEN[1])
    wmu, bmu = _linear_params(kmu, HIDDEN[1], HIDDEN[1])
    wvar, bvar = _linear_params(kvar, HIDDEN[1], HIDDEN[1])
    wd0, bd0 = _linear_params(kd0, HIDDEN[1], HIDDEN[0])
    gd0, bed0 = _bn_params(HIDDEN[0])
    wout, bout = _linear_params(kout, HIDDEN[0], ts_len)
    return (w0, b0, g0, be0,
            w1, b1, g1, be1,
            wmu, bmu, wvar, bvar,
            wd0, bd0, gd0, bed0,
            wout, bout)


def _pad2(a, rows, cols):
    return jnp.pad(a, ((0, rows - a.shape[0]), (0, cols - a.shape[1])))


def _pad_row(a, cols):
    a = a.reshape(1, -1)
    return jnp.pad(a, ((0, 0), (0, cols - a.shape[-1])))


def pack_params(params, ts_len):
    """Pad features to lane multiples, fuse fc_mu|fc_var, cast matmul weights to bf16."""
    (w0, b0, g0, be0, w1, b1, g1, be1,
     wmu, bmu, wvar, bvar, wd0, bd0, gd0, bed0, wout, bout) = params
    H0, H1 = HIDDEN
    Tp, H0p, H1p = _pad_to(ts_len, LANE), _pad_to(H0, LANE), _pad_to(H1, LANE)

    def w(a, r, c):
        return _pad2(a, r, c).astype(jnp.bfloat16)     # MXU operand

    def v(a, c):
        return _pad_row(a, c)                          # f32 row vector

    wmv = jnp.concatenate(
        [_pad2(wmu, H1p, H1p), _pad2(wvar, H1p, H1p)], axis=1).astype(jnp.bfloat16)
    bmv = jnp.concatenate([_pad_row(bmu, H1p), _pad_row(bvar, H1p)], axis=1)

    return (w(w0, Tp, H0p), v(b0, H0p), v(g0, H0p), v(be0, H0p),
            w(w1, H0p, H1p), v(b1, H1p), v(g1, H1p), v(be1, H1p),
            wmv, bmv,
            w(wd0, H1p, H0p), v(bd0, H0p), v(gd0, H0p), v(bed0, H0p),
            w(wout, H0p, Tp), v(bout, Tp))


def tsautoencoder_forward(x, params, eps):
    """x: (ts_len, N), eps: (N, 100).  Returns (E, mu, log_var, rx.T) like torch."""
    ts_len, n = x.shape
    F1 = HIDDEN[1]
    Tp, H1p = _pad_to(ts_len, LANE), _pad_to(F1, LANE)

    kparams = pack_params(params, ts_len)

    # Pad only feature/contraction dims with zeros; never the batch axis (BN stats).
    xp = jnp.pad(x.astype(jnp.float32), ((0, Tp - ts_len), (0, 0)))      # (Tp, N)
    epsp = jnp.pad(eps.astype(jnp.float32), ((0, 0), (0, H1p - F1)))     # (N, H1p)
    inputs = (xp, epsp) + tuple(kparams)

    out_shapes = (
        jax.ShapeDtypeStruct((n, H1p), jnp.float32),   # E      (lane-dense 128)
        jax.ShapeDtypeStruct((n, H1p), jnp.float32),   # mu
        jax.ShapeDtypeStruct((n, H1p), jnp.float32),   # log_var
        jax.ShapeDtypeStruct((n, Tp), jnp.float32),    # rx     (lane-dense 128)
    )
    in_specs = [pl.BlockSpec(a.shape, lambda i: (0, 0)) for a in inputs]
    out_specs = tuple(pl.BlockSpec(s.shape, lambda i: (0, 0)) for s in out_shapes)

    E, mu, logvar, rx = pl.pallas_call(
        tsae_kernel,
        out_shape=out_shapes,
        grid=(1,),
        in_specs=in_specs,
        out_specs=out_specs,
        compiler_params=pltpu.CompilerParams(
            dimension_semantics=("arbitrary",),
            vmem_limit_bytes=64 * 1024 * 1024),
    )(*inputs)

    return E[:, :F1], mu[:, :F1], logvar[:, :F1], rx[:, :ts_len].T


if __name__ == "__main__":
    ts_len, batch = 16, 8
    key = jax.random.PRNGKey(0)
    kx, keps, kp = jax.random.split(key, 3)

    x = jax.random.normal(kx, (ts_len, batch), jnp.float32)          # (ts_len, N)
    eps = jax.random.normal(keps, (batch, HIDDEN[1]), jnp.float32)   # reparam noise
    params = init_params(kp, ts_len)

    E, mu, log_var, rx_t = tsautoencoder_forward(x, params, eps)
    jax.block_until_ready((E, mu, log_var, rx_t))

    assert E.shape == (batch, HIDDEN[1])
    assert mu.shape == (batch, HIDDEN[1])
    assert log_var.shape == (batch, HIDDEN[1])
    assert rx_t.shape == (ts_len, batch)
    assert all(bool(jnp.all(jnp.isfinite(a))) for a in (E, mu, log_var, rx_t))
    print("KERNEL_OK")
</pallas_src>

<mosaic_0001>
module attributes {stable_mosaic.version = 11 : i64} {
  func.func @tsae_kernel(%arg0: i32, %arg1: memref<128x8xf32, #tpu.memory_space<vmem>>, %arg2: memref<8x128xf32, #tpu.memory_space<vmem>>, %arg3: memref<128x1024xbf16, #tpu.memory_space<vmem>>, %arg4: memref<1x1024xf32, #tpu.memory_space<vmem>>, %arg5: memref<1x1024xf32, #tpu.memory_space<vmem>>, %arg6: memref<1x1024xf32, #tpu.memory_space<vmem>>, %arg7: memref<1024x128xbf16, #tpu.memory_space<vmem>>, %arg8: memref<1x128xf32, #tpu.memory_space<vmem>>, %arg9: memref<1x128xf32, #tpu.memory_space<vmem>>, %arg10: memref<1x128xf32, #tpu.memory_space<vmem>>, %arg11: memref<128x256xbf16, #tpu.memory_space<vmem>>, %arg12: memref<1x256xf32, #tpu.memory_space<vmem>>, %arg13: memref<128x1024xbf16, #tpu.memory_space<vmem>>, %arg14: memref<1x1024xf32, #tpu.memory_space<vmem>>, %arg15: memref<1x1024xf32, #tpu.memory_space<vmem>>, %arg16: memref<1x1024xf32, #tpu.memory_space<vmem>>, %arg17: memref<1024x128xbf16, #tpu.memory_space<vmem>>, %arg18: memref<1x128xf32, #tpu.memory_space<vmem>>, %arg19: memref<8x128xf32, #tpu.memory_space<vmem>>, %arg20: memref<8x128xf32, #tpu.memory_space<vmem>>, %arg21: memref<8x128xf32, #tpu.memory_space<vmem>>, %arg22: memref<8x128xf32, #tpu.memory_space<vmem>>) attributes {dimension_semantics = [#tpu.dimension_semantics<arbitrary>], iteration_bounds = array<i64: 1>, scalar_prefetch = 0 : i64, scratch_operands = 0 : i64, tpu.core_type = #tpu.core_type<tc>, window_params = [{pipeline_mode = #tpu.pipeline_mode<synchronous>, transform_indices = @transform_0, window_bounds = array<i64: 128, 8>}, {pipeline_mode = #tpu.pipeline_mode<synchronous>, transform_indices = @transform_1, window_bounds = array<i64: 8, 128>}, {pipeline_mode = #tpu.pipeline_mode<synchronous>, transform_indices = @transform_2, window_bounds = array<i64: 128, 1024>}, {pipeline_mode = #tpu.pipeline_mode<synchronous>, transform_indices = @transform_3, window_bounds = array<i64: 1, 1024>}, {pipeline_mode = #tpu.pipeline_mode<synchronous>, transform_indices = @transform_4, window_bounds = array<i64: 1, 1024>}, {pipeline_mode = #tpu.pipeline_mode<synchronous>, transform_indices = @transform_5, window_bounds = array<i64: 1, 1024>}, {pipeline_mode = #tpu.pipeline_mode<synchronous>, transform_indices = @transform_6, window_bounds = array<i64: 1024, 128>}, {pipeline_mode = #tpu.pipeline_mode<synchronous>, transform_indices = @transform_7, window_bounds = array<i64: 1, 128>}, {pipeline_mode = #tpu.pipeline_mode<synchronous>, transform_indices = @transform_8, window_bounds = array<i64: 1, 128>}, {pipeline_mode = #tpu.pipeline_mode<synchronous>, transform_indices = @transform_9, window_bounds = array<i64: 1, 128>}, {pipeline_mode = #tpu.pipeline_mode<synchronous>, transform_indices = @transform_10, window_bounds = array<i64: 128, 256>}, {pipeline_mode = #tpu.pipeline_mode<synchronous>, transform_indices = @transform_11, window_bounds = array<i64: 1, 256>}, {pipeline_mode = #tpu.pipeline_mode<synchronous>, transform_indices = @transform_12, window_bounds = array<i64: 128, 1024>}, {pipeline_mode = #tpu.pipeline_mode<synchronous>, transform_indices = @transform_13, window_bounds = array<i64: 1, 1024>}, {pipeline_mode = #tpu.pipeline_mode<synchronous>, transform_indices = @transform_14, window_bounds = array<i64: 1, 1024>}, {pipeline_mode = #tpu.pipeline_mode<synchronous>, transform_indices = @transform_15, window_bounds = array<i64: 1, 1024>}, {pipeline_mode = #tpu.pipeline_mode<synchronous>, transform_indices = @transform_16, window_bounds = array<i64: 1024, 128>}, {pipeline_mode = #tpu.pipeline_mode<synchronous>, transform_indices = @transform_17, window_bounds = array<i64: 1, 128>}, {pipeline_mode = #tpu.pipeline_mode<synchronous>, transform_indices = @transform_18, window_bounds = array<i64: 8, 128>}, {pipeline_mode = #tpu.pipeline_mode<synchronous>, transform_indices = @transform_19, window_bounds = array<i64: 8, 128>}, {pipeline_mode = #tpu.pipeline_mode<synchronous>, transform_indices = @transform_20, window_bounds = array<i64: 8, 128>}, {pipeline_mode = #tpu.pipeline_mode<synchronous>, transform_indices = @transform_21, window_bounds = array<i64: 8, 128>}]} {
    %c0 = arith.constant 0 : index
    %c0_0 = arith.constant 0 : index
    %0 = vector.load %arg1[%c0, %c0_0] : memref<128x8xf32, #tpu.memory_space<vmem>>, vector<128x8xf32>
    %1 = arith.truncf %0 : vector<128x8xf32> to vector<128x8xbf16>
    %c0_1 = arith.constant 0 : index
    %c0_2 = arith.constant 0 : index
    %2 = vector.load %arg3[%c0_1, %c0_2] : memref<128x1024xbf16, #tpu.memory_space<vmem>>, vector<128x1024xbf16>
    %cst = arith.constant dense<0.000000e+00> : vector<8x1024xf32>
    %3 = tpu.matmul %1, %2, %cst {dimension_numbers = #tpu.dot_dimension_numbers<[0], [0], [1], [1], [0, 1, 1, 1], [], []>} : vector<128x8xbf16>, vector<128x1024xbf16>, vector<8x1024xf32> -> vector<8x1024xf32>
    %c0_3 = arith.constant 0 : index
    %c0_4 = arith.constant 0 : index
    %4 = vector.load %arg4[%c0_3, %c0_4] : memref<1x1024xf32, #tpu.memory_space<vmem>>, vector<1x1024xf32>
    %5 = vector.broadcast %4 : vector<1x1024xf32> to vector<8x1024xf32>
    %6 = arith.addf %3, %5 : vector<8x1024xf32>
    %cst_5 = arith.constant dense<0.000000e+00> : vector<1024xf32>
    %7 = vector.multi_reduction <add>, %6, %cst_5 [0] : vector<8x1024xf32> to vector<1024xf32>
    %8 = vector.shape_cast %7 : vector<1024xf32> to vector<1x1024xf32>
    %9 = arith.mulf %6, %6 : vector<8x1024xf32>
    %cst_6 = arith.constant dense<0.000000e+00> : vector<1024xf32>
    %10 = vector.multi_reduction <add>, %9, %cst_6 [0] : vector<8x1024xf32> to vector<1024xf32>
    %11 = vector.shape_cast %10 : vector<1024xf32> to vector<1x1024xf32>
    %cst_7 = arith.constant 1.250000e-01 : f32
    %12 = vector.broadcast %cst_7 : f32 to vector<1x1024xf32>
    %13 = arith.mulf %8, %12 : vector<1x1024xf32>
    %cst_8 = arith.constant 1.250000e-01 : f32
    %14 = vector.broadcast %cst_8 : f32 to vector<1x1024xf32>
    %15 = arith.mulf %11, %14 : vector<1x1024xf32>
    %16 = arith.mulf %13, %13 : vector<1x1024xf32>
    %17 = arith.subf %15, %16 : vector<1x1024xf32>
    %cst_9 = arith.constant 0.000000e+00 : f32
    %18 = vector.broadcast %cst_9 : f32 to vector<1x1024xf32>
    %19 = arith.maximumf %17, %18 : vector<1x1024xf32>
    %20 = vector.broadcast %13 : vector<1x1024xf32> to vector<8x1024xf32>
    %21 = arith.subf %6, %20 : vector<8x1024xf32>
    %cst_10 = arith.constant 9.99999974E-6 : f32
    %22 = vector.broadcast %cst_10 : f32 to vector<1x1024xf32>
    %23 = arith.addf %19, %22 : vector<1x1024xf32>
    %24 = math.rsqrt %23 : vector<1x1024xf32>
    %25 = vector.broadcast %24 : vector<1x1024xf32> to vector<8x1024xf32>
    %26 = arith.mulf %21, %25 : vector<8x1024xf32>
    %c0_11 = arith.constant 0 : index
    %c0_12 = arith.constant 0 : index
    %27 = vector.load %arg5[%c0_11, %c0_12] : memref<1x1024xf32, #tpu.memory_space<vmem>>, vector<1x1024xf32>
    %28 = vector.broadcast %27 : vector<1x1024xf32> to vector<8x1024xf32>
    %29 = arith.mulf %26, %28 : vector<8x1024xf32>
    %c0_13 = arith.constant 0 : index
    %c0_14 = arith.constant 0 : index
    %30 = vector.load %arg6[%c0_13, %c0_14] : memref<1x1024xf32, #tpu.memory_space<vmem>>, vector<1x1024xf32>
    %31 = vector.broadcast %30 : vector<1x1024xf32> to vector<8x1024xf32>
    %32 = arith.addf %29, %31 : vector<8x1024xf32>
    %cst_15 = arith.constant 0.000000e+00 : f32
    %33 = vector.broadcast %cst_15 : f32 to vector<8x1024xf32>
    %34 = arith.maximumf %32, %33 : vector<8x1024xf32>
    %35 = arith.truncf %34 : vector<8x1024xf32> to vector<8x1024xbf16>
    %c0_16 = arith.constant 0 : index
    %c0_17 = arith.constant 0 : index
    %36 = vector.load %arg7[%c0_16, %c0_17] : memref<1024x128xbf16, #tpu.memory_space<vmem>>, vector<1024x128xbf16>
    %cst_18 = arith.constant dense<0.000000e+00> : vector<8x128xf32>
    %37 = tpu.matmul %35, %36, %cst_18 {dimension_numbers = #tpu.dot_dimension_numbers<[1], [0], [0], [1], [0, 0, 1, 1], [], []>} : vector<8x1024xbf16>, vector<1024x128xbf16>, vector<8x128xf32> -> vector<8x128xf32>
    %c0_19 = arith.constant 0 : index
    %c0_20 = arith.constant 0 : index
    %38 = vector.load %arg8[%c0_19, %c0_20] : memref<1x128xf32, #tpu.memory_space<vmem>>, vector<1x128xf32>
    %39 = vector.broadcast %38 : vector<1x128xf32> to vector<8x128xf32>
    %40 = arith.addf %37, %39 : vector<8x128xf32>
    %cst_21 = arith.constant dense<0.000000e+00> : vector<128xf32>
    %41 = vector.multi_reduction <add>, %40, %cst_21 [0] : vector<8x128xf32> to vector<128xf32>
    %42 = vector.shape_cast %41 : vector<128xf32> to vector<1x128xf32>
    %43 = arith.mulf %40, %40 : vector<8x128xf32>
    %cst_22 = arith.constant dense<0.000000e+00> : vector<128xf32>
    %44 = vector.multi_reduction <add>, %43, %cst_22 [0] : vector<8x128xf32> to vector<128xf32>
    %45 = vector.shape_cast %44 : vector<128xf32> to vector<1x128xf32>
    %cst_23 = arith.constant 1.250000e-01 : f32
    %46 = vector.broadcast %cst_23 : f32 to vector<1x128xf32>
    %47 = arith.mulf %42, %46 : vector<1x128xf32>
    %cst_24 = arith.constant 1.250000e-01 : f32
    %48 = vector.broadcast %cst_24 : f32 to vector<1x128xf32>
    %49 = arith.mulf %45, %48 : vector<1x128xf32>
    %50 = arith.mulf %47, %47 : vector<1x128xf32>
    %51 = arith.subf %49, %50 : vector<1x128xf32>
    %cst_25 = arith.constant 0.000000e+00 : f32
    %52 = vector.broadcast %cst_25 : f32 to vector<1x128xf32>
    %53 = arith.maximumf %51, %52 : vector<1x128xf32>
    %54 = vector.broadcast %47 : vector<1x128xf32> to vector<8x128xf32>
    %55 = arith.subf %40, %54 : vector<8x128xf32>
    %cst_26 = arith.constant 9.99999974E-6 : f32
    %56 = vector.broadcast %cst_26 : f32 to vector<1x128xf32>
    %57 = arith.addf %53, %56 : vector<1x128xf32>
    %58 = math.rsqrt %57 : vector<1x128xf32>
    %59 = vector.broadcast %58 : vector<1x128xf32> to vector<8x128xf32>
    %60 = arith.mulf %55, %59 : vector<8x128xf32>
    %c0_27 = arith.constant 0 : index
    %c0_28 = arith.constant 0 : index
    %61 = vector.load %arg9[%c0_27, %c0_28] : memref<1x128xf32, #tpu.memory_space<vmem>>, vector<1x128xf32>
    %62 = vector.broadcast %61 : vector<1x128xf32> to vector<8x128xf32>
    %63 = arith.mulf %60, %62 : vector<8x128xf32>
    %c0_29 = arith.constant 0 : index
    %c0_30 = arith.constant 0 : index
    %64 = vector.load %arg10[%c0_29, %c0_30] : memref<1x128xf32, #tpu.memory_space<vmem>>, vector<1x128xf32>
    %65 = vector.broadcast %64 : vector<1x128xf32> to vector<8x128xf32>
    %66 = arith.addf %63, %65 : vector<8x128xf32>
    %cst_31 = arith.constant 0.000000e+00 : f32
    %67 = vector.broadcast %cst_31 : f32 to vector<8x128xf32>
    %68 = arith.maximumf %66, %67 : vector<8x128xf32>
    %c0_32 = arith.constant 0 : index
    %c0_33 = arith.constant 0 : index
    %69 = vector.load %arg19[%c0_32, %c0_33] : memref<8x128xf32, #tpu.memory_space<vmem>>, vector<8x128xf32>
    tpu.vector_store %arg19[%c0_32, %c0_33], %68 {strides = array<i32>} : memref<8x128xf32, #tpu.memory_space<vmem>>, vector<8x128xf32>,
    %70 = arith.truncf %68 : vector<8x128xf32> to vector<8x128xbf16>
    %c0_34 = arith.constant 0 : index
    %c0_35 = arith.constant 0 : index
    %71 = vector.load %arg11[%c0_34, %c0_35] : memref<128x256xbf16, #tpu.memory_space<vmem>>, vector<128x256xbf16>
    %cst_36 = arith.constant dense<0.000000e+00> : vector<8x256xf32>
    %72 = tpu.matmul %70, %71, %cst_36 {dimension_numbers = #tpu.dot_dimension_numbers<[1], [0], [0], [1], [0, 0, 1, 1], [], []>} : vector<8x128xbf16>, vector<128x256xbf16>, vector<8x256xf32> -> vector<8x256xf32>
    %c0_37 = arith.constant 0 : index
    %c0_38 = arith.constant 0 : index
    %73 = vector.load %arg12[%c0_37, %c0_38] : memref<1x256xf32, #tpu.memory_space<vmem>>, vector<1x256xf32>
    %74 = vector.broadcast %73 : vector<1x256xf32> to vector<8x256xf32>
    %75 = arith.addf %72, %74 : vector<8x256xf32>
    %76 = vector.extract_strided_slice %75 {offsets = [0, 0], sizes = [8, 128], strides = [1, 1]} : vector<8x256xf32> to vector<8x128xf32>
    %77 = vector.extract_strided_slice %75 {offsets = [0, 128], sizes = [8, 128], strides = [1, 1]} : vector<8x256xf32> to vector<8x128xf32>
    %c0_39 = arith.constant 0 : index
    %c0_40 = arith.constant 0 : index
    %78 = vector.load %arg20[%c0_39, %c0_40] : memref<8x128xf32, #tpu.memory_space<vmem>>, vector<8x128xf32>
    tpu.vector_store %arg20[%c0_39, %c0_40], %76 {strides = array<i32>} : memref<8x128xf32, #tpu.memory_space<vmem>>, vector<8x128xf32>,
    %c0_41 = arith.constant 0 : index
    %c0_42 = arith.constant 0 : index
    %79 = vector.load %arg21[%c0_41, %c0_42] : memref<8x128xf32, #tpu.memory_space<vmem>>, vector<8x128xf32>
    tpu.vector_store %arg21[%c0_41, %c0_42], %77 {strides = array<i32>} : memref<8x128xf32, #tpu.memory_space<vmem>>, vector<8x128xf32>,
    %c0_43 = arith.constant 0 : index
    %c0_44 = arith.constant 0 : index
    %80 = vector.load %arg2[%c0_43, %c0_44] : memref<8x128xf32, #tpu.memory_space<vmem>>, vector<8x128xf32>
    %cst_45 = arith.constant 5.000000e-01 : f32
    %81 = vector.broadcast %cst_45 : f32 to vector<8x128xf32>
    %82 = arith.mulf %81, %77 : vector<8x128xf32>
    %83 = math.exp %82 : vector<8x128xf32>
    %84 = arith.mulf %80, %83 : vector<8x128xf32>
    %85 = arith.addf %84, %76 : vector<8x128xf32>
    %86 = arith.truncf %85 : vector<8x128xf32> to vector<8x128xbf16>
    %c0_46 = arith.constant 0 : index
    %c0_47 = arith.constant 0 : index
    %87 = vector.load %arg13[%c0_46, %c0_47] : memref<128x1024xbf16, #tpu.memory_space<vmem>>, vector<128x1024xbf16>
    %cst_48 = arith.constant dense<0.000000e+00> : vector<8x1024xf32>
    %88 = tpu.matmul %86, %87, %cst_48 {dimension_numbers = #tpu.dot_dimension_numbers<[1], [0], [0], [1], [0, 0, 1, 1], [], []>} : vector<8x128xbf16>, vector<128x1024xbf16>, vector<8x1024xf32> -> vector<8x1024xf32>
    %c0_49 = arith.constant 0 : index
    %c0_50 = arith.constant 0 : index
    %89 = vector.load %arg14[%c0_49, %c0_50] : memref<1x1024xf32, #tpu.memory_space<vmem>>, vector<1x1024xf32>
    %90 = vector.broadcast %89 : vector<1x1024xf32> to vector<8x1024xf32>
    %91 = arith.addf %88, %90 : vector<8x1024xf32>
    %cst_51 = arith.constant dense<0.000000e+00> : vector<1024xf32>
    %92 = vector.multi_reduction <add>, %91, %cst_51 [0] : vector<8x1024xf32> to vector<1024xf32>
    %93 = vector.shape_cast %92 : vector<1024xf32> to vector<1x1024xf32>
    %94 = arith.mulf %91, %91 : vector<8x1024xf32>
    %cst_52 = arith.constant dense<0.000000e+00> : vector<1024xf32>
    %95 = vector.multi_reduction <add>, %94, %cst_52 [0] : vector<8x1024xf32> to vector<1024xf32>
    %96 = vector.shape_cast %95 : vector<1024xf32> to vector<1x1024xf32>
    %cst_53 = arith.constant 1.250000e-01 : f32
    %97 = vector.broadcast %cst_53 : f32 to vector<1x1024xf32>
    %98 = arith.mulf %93, %97 : vector<1x1024xf32>
    %cst_54 = arith.constant 1.250000e-01 : f32
    %99 = vector.broadcast %cst_54 : f32 to vector<1x1024xf32>
    %100 = arith.mulf %96, %99 : vector<1x1024xf32>
    %101 = arith.mulf %98, %98 : vector<1x1024xf32>
    %102 = arith.subf %100, %101 : vector<1x1024xf32>
    %cst_55 = arith.constant 0.000000e+00 : f32
    %103 = vector.broadcast %cst_55 : f32 to vector<1x1024xf32>
    %104 = arith.maximumf %102, %103 : vector<1x1024xf32>
    %105 = vector.broadcast %98 : vector<1x1024xf32> to vector<8x1024xf32>
    %106 = arith.subf %91, %105 : vector<8x1024xf32>
    %cst_56 = arith.constant 9.99999974E-6 : f32
    %107 = vector.broadcast %cst_56 : f32 to vector<1x1024xf32>
    %108 = arith.addf %104, %107 : vector<1x1024xf32>
    %109 = math.rsqrt %108 : vector<1x1024xf32>
    %110 = vector.broadcast %109 : vector<1x1024xf32> to vector<8x1024xf32>
    %111 = arith.mulf %106, %110 : vector<8x1024xf32>
    %c0_57 = arith.constant 0 : index
    %c0_58 = arith.constant 0 : index
    %112 = vector.load %arg15[%c0_57, %c0_58] : memref<1x1024xf32, #tpu.memory_space<vmem>>, vector<1x1024xf32>
    %113 = vector.broadcast %112 : vector<1x1024xf32> to vector<8x1024xf32>
    %114 = arith.mulf %111, %113 : vector<8x1024xf32>
    %c0_59 = arith.constant 0 : index
    %c0_60 = arith.constant 0 : index
    %115 = vector.load %arg16[%c0_59, %c0_60] : memref<1x1024xf32, #tpu.memory_space<vmem>>, vector<1x1024xf32>
    %116 = vector.broadcast %115 : vector<1x1024xf32> to vector<8x1024xf32>
    %117 = arith.addf %114, %116 : vector<8x1024xf32>
    %cst_61 = arith.constant 0.000000e+00 : f32
    %118 = vector.broadcast %cst_61 : f32 to vector<8x1024xf32>
    %119 = arith.maximumf %117, %118 : vector<8x1024xf32>
    %120 = arith.truncf %119 : vector<8x1024xf32> to vector<8x1024xbf16>
    %c0_62 = arith.constant 0 : index
    %c0_63 = arith.constant 0 : index
    %121 = vector.load %arg17[%c0_62, %c0_63] : memref<1024x128xbf16, #tpu.memory_space<vmem>>, vector<1024x128xbf16>
    %cst_64 = arith.constant dense<0.000000e+00> : vector<8x128xf32>
    %122 = tpu.matmul %120, %121, %cst_64 {dimension_numbers = #tpu.dot_dimension_numbers<[1], [0], [0], [1], [0, 0, 1, 1], [], []>} : vector<8x1024xbf16>, vector<1024x128xbf16>, vector<8x128xf32> -> vector<8x128xf32>
    %c0_65 = arith.constant 0 : index
    %c0_66 = arith.constant 0 : index
    %123 = vector.load %arg18[%c0_65, %c0_66] : memref<1x128xf32, #tpu.memory_space<vmem>>, vector<1x128xf32>
    %124 = vector.broadcast %123 : vector<1x128xf32> to vector<8x128xf32>
    %125 = arith.addf %122, %124 : vector<8x128xf32>
    %c0_67 = arith.constant 0 : index
    %c0_68 = arith.constant 0 : index
    %126 = vector.load %arg22[%c0_67, %c0_68] : memref<8x128xf32, #tpu.memory_space<vmem>>, vector<8x128xf32>
    tpu.vector_store %arg22[%c0_67, %c0_68], %125 {strides = array<i32>} : memref<8x128xf32, #tpu.memory_space<vmem>>, vector<8x128xf32>,
    return
  }
  func.func @transform_0(%arg0: i32) -> (i32, i32) {
    %c0_i32 = arith.constant 0 : i32
    %c0_i32_0 = arith.constant 0 : i32
    %c0_i32_1 = arith.constant 0 : i32
    return %c0_i32, %c0_i32_0 : i32, i32
  }
  func.func @transform_1(%arg0: i32) -> (i32, i32) {
    %c0_i32 = arith.constant 0 : i32
    %c0_i32_0 = arith.constant 0 : i32
    %c0_i32_1 = arith.constant 0 : i32
    return %c0_i32, %c0_i32_0 : i32, i32
  }
  func.func @transform_2(%arg0: i32) -> (i32, i32) {
    %c0_i32 = arith.constant 0 : i32
    %c0_i32_0 = arith.constant 0 : i32
    %c0_i32_1 = arith.constant 0 : i32
    return %c0_i32, %c0_i32_0 : i32, i32
  }
  func.func @transform_3(%arg0: i32) -> (i32, i32) {
    %c0_i32 = arith.constant 0 : i32
    %c0_i32_0 = arith.constant 0 : i32
    %c0_i32_1 = arith.constant 0 : i32
    return %c0_i32, %c0_i32_0 : i32, i32
  }
  func.func @transform_4(%arg0: i32) -> (i32, i32) {
    %c0_i32 = arith.constant 0 : i32
    %c0_i32_0 = arith.constant 0 : i32
    %c0_i32_1 = arith.constant 0 : i32
    return %c0_i32, %c0_i32_0 : i32, i32
  }
  func.func @transform_5(%arg0: i32) -> (i32, i32) {
    %c0_i32 = arith.constant 0 : i32
    %c0_i32_0 = arith.constant 0 : i32
    %c0_i32_1 = arith.constant 0 : i32
    return %c0_i32, %c0_i32_0 : i32, i32
  }
  func.func @transform_6(%arg0: i32) -> (i32, i32) {
    %c0_i32 = arith.constant 0 : i32
    %c0_i32_0 = arith.constant 0 : i32
    %c0_i32_1 = arith.constant 0 : i32
    return %c0_i32, %c0_i32_0 : i32, i32
  }
  func.func @transform_7(%arg0: i32) -> (i32, i32) {
    %c0_i32 = arith.constant 0 : i32
    %c0_i32_0 = arith.constant 0 : i32
    %c0_i32_1 = arith.constant 0 : i32
    return %c0_i32, %c0_i32_0 : i32, i32
  }
  func.func @transform_8(%arg0: i32) -> (i32, i32) {
    %c0_i32 = arith.constant 0 : i32
    %c0_i32_0 = arith.constant 0 : i32
    %c0_i32_1 = arith.constant 0 : i32
    return %c0_i32, %c0_i32_0 : i32, i32
  }
  func.func @transform_9(%arg0: i32) -> (i32, i32) {
    %c0_i32 = arith.constant 0 : i32
    %c0_i32_0 = arith.constant 0 : i32
    %c0_i32_1 = arith.constant 0 : i32
    return %c0_i32, %c0_i32_0 : i32, i32
  }
  func.func @transform_10(%arg0: i32) -> (i32, i32) {
    %c0_i32 = arith.constant 0 : i32
    %c0_i32_0 = arith.constant 0 : i32
    %c0_i32_1 = arith.constant 0 : i32
    return %c0_i32, %c0_i32_0 : i32, i32
  }
  func.func @transform_11(%arg0: i32) -> (i32, i32) {
    %c0_i32 = arith.constant 0 : i32
    %c0_i32_0 = arith.constant 0 : i32
    %c0_i32_1 = arith.constant 0 : i32
    return %c0_i32, %c0_i32_0 : i32, i32
  }
  func.func @transform_12(%arg0: i32) -> (i32, i32) {
    %c0_i32 = arith.constant 0 : i32
    %c0_i32_0 = arith.constant 0 : i32
    %c0_i32_1 = arith.constant 0 : i32
    return %c0_i32, %c0_i32_0 : i32, i32
  }
  func.func @transform_13(%arg0: i32) -> (i32, i32) {
    %c0_i32 = arith.constant 0 : i32
    %c0_i32_0 = arith.constant 0 : i32
    %c0_i32_1 = arith.constant 0 : i32
    return %c0_i32, %c0_i32_0 : i32, i32
  }
  func.func @transform_14(%arg0: i32) -> (i32, i32) {
    %c0_i32 = arith.constant 0 : i32
    %c0_i32_0 = arith.constant 0 : i32
    %c0_i32_1 = arith.constant 0 : i32
    return %c0_i32, %c0_i32_0 : i32, i32
  }
  func.func @transform_15(%arg0: i32) -> (i32, i32) {
    %c0_i32 = arith.constant 0 : i32
    %c0_i32_0 = arith.constant 0 : i32
    %c0_i32_1 = arith.constant 0 : i32
    return %c0_i32, %c0_i32_0 : i32, i32
  }
  func.func @transform_16(%arg0: i32) -> (i32, i32) {
    %c0_i32 = arith.constant 0 : i32
    %c0_i32_0 = arith.constant 0 : i32
    %c0_i32_1 = arith.constant 0 : i32
    return %c0_i32, %c0_i32_0 : i32, i32
  }
  func.func @transform_17(%arg0: i32) -> (i32, i32) {
    %c0_i32 = arith.constant 0 : i32
    %c0_i32_0 = arith.constant 0 : i32
    %c0_i32_1 = arith.constant 0 : i32
    return %c0_i32, %c0_i32_0 : i32, i32
  }
  func.func @transform_18(%arg0: i32) -> (i32, i32) {
    %c0_i32 = arith.constant 0 : i32
    %c0_i32_0 = arith.constant 0 : i32
    %c0_i32_1 = arith.constant 0 : i32
    return %c0_i32, %c0_i32_0 : i32, i32
  }
  func.func @transform_19(%arg0: i32) -> (i32, i32) {
    %c0_i32 = arith.constant 0 : i32
    %c0_i32_0 = arith.constant 0 : i32
    %c0_i32_1 = arith.constant 0 : i32
    return %c0_i32, %c0_i32_0 : i32, i32
  }
  func.func @transform_20(%arg0: i32) -> (i32, i32) {
    %c0_i32 = arith.constant 0 : i32
    %c0_i32_0 = arith.constant 0 : i32
    %c0_i32_1 = arith.constant 0 : i32
    return %c0_i32, %c0_i32_0 : i32, i32
  }
  func.func @transform_21(%arg0: i32) -> (i32, i32) {
    %c0_i32 = arith.constant 0 : i32
    %c0_i32_0 = arith.constant 0 : i32
    %c0_i32_1 = arith.constant 0 : i32
    return %c0_i32, %c0_i32_0 : i32, i32
  }
}

</mosaic_0001>

<bundles_post_ra>
// kernel: tpu_custom_call.1
= control target key start
LH: loop header
LB: loop body
LE: loop exit
PB: predicated region body
PF: predicated region fallthrough
CT: control target
= control target key end

     0   :  { %s5764_s0 = inlined_call_operand.hbm [shape: f32[128,8], index: 0, kind: input, shape index: {}]   ;;  %s5765_s1 = inlined_call_operand.hbm [shape: f32[8,128], index: 1, kind: input, shape index: {}]   ;;  %s5766_s2 = inlined_call_operand.hbm [shape: bf16[128,1024], index: 2, kind: input, shape index: {}]   ;;  %s5767_s3 = inlined_call_operand.hbm [shape: f32[1,1024], index: 3, kind: input, shape index: {}]   ;;  %s5768_s4 = inlined_call_operand.hbm [shape: f32[1,1024], index: 4, kind: input, shape index: {}]   ;;  %s5769_s5 = inlined_call_operand.hbm [shape: f32[1,1024], index: 5, kind: input, shape index: {}]   ;;  %s5770_s6 = inlined_call_operand.hbm [shape: bf16[1024,128], index: 6, kind: input, shape index: {}]   ;;  %s5771_s7 = inlined_call_operand.hbm [shape: f32[1,128], index: 7, kind: input, shape index: {}]   ;;  %s5772_s8 = inlined_call_operand.hbm [shape: f32[1,128], index: 8, kind: input, shape index: {}]   ;;  %s5773_s9 = inlined_call_operand.hbm [shape: f32[1,128], index: 9, kind: input, shape index: {}]   ;;  %s5774_s10 = inlined_call_operand.hbm [shape: bf16[128,256], index: 10, kind: input, shape index: {}]   ;;  %s5775_s11 = inlined_call_operand.hbm [shape: f32[1,256], index: 11, kind: input, shape index: {}]   ;;  %s5776_s12 = inlined_call_operand.hbm [shape: bf16[128,1024], index: 12, kind: input, shape index: {}]   ;;  %s5777_s13 = inlined_call_operand.hbm [shape: f32[1,1024], index: 13, kind: input, shape index: {}]   ;;  %s5778_s14 = inlined_call_operand.hbm [shape: f32[1,1024], index: 14, kind: input, shape index: {}]   ;;  %s5779_s15 = inlined_call_operand.hbm [shape: f32[1,1024], index: 15, kind: input, shape index: {}]   ;;  %s5780_s16 = inlined_call_operand.hbm [shape: bf16[1024,128], index: 16, kind: input, shape index: {}]   ;;  %s5781_s17 = inlined_call_operand.hbm [shape: f32[1,128], index: 17, kind: input, shape index: {}]   ;;  %s5782_s18 = inlined_call_operand.hbm [shape: f32[8,128], index: 18, kind: output, shape index: {0}]   ;;  %s5783_s19 = inlined_call_operand.hbm [shape: f32[8,128], index: 19, kind: output, shape index: {1}]   ;;  %s5784_s20 = inlined_call_operand.hbm [shape: f32[8,128], index: 20, kind: output, shape index: {2}]   ;;  %s5785_s21 = inlined_call_operand.hbm [shape: f32[8,128], index: 21, kind: output, shape index: {3}]  }
   0x1   :  { %5795 = sst [smem:[#allocation50_spill]] %s5764_s0 }
   0x2   :  { %5796 = sst [smem:[#allocation51_spill]] %s5765_s1 }
   0x3   :  { %5797 = sst [smem:[#allocation52_spill]] %s5766_s2 }
   0x4   :  { %5798 = sst [smem:[#allocation53_spill]] %s5767_s3 }
   0x5   :  { %5799 = sst [smem:[#allocation54_spill]] %s5768_s4 }
   0x6   :  { %5800 = sst [smem:[#allocation55_spill]] %s5769_s5 }
   0x7   :  { %5801 = sst [smem:[#allocation56_spill]] %s5785_s21 }
   0x8   :  { %27 = vsyncpa [#allocation3], 0 }
   0x9   :  { %28 = vsyncpa [#allocation6], 0 }
   0xa   :  { %29 = vsyncpa [#allocation9], 0 }
   0xb   :  { %30 = vsyncpa [#allocation12], 0 }
   0xc   :  { %31 = vsyncpa [#allocation15], 0 }
   0xd   :  { %32 = vsyncpa [#allocation18], 0 }
   0xe   :  { %33 = vsyncpa [#allocation21], 0 }
   0xf   :  { %34 = vsyncpa [#allocation24], 0 }
  0x10   :  { %35 = vsyncpa [#allocation27], 0 }
  0x11   :  { %36 = vsyncpa [#allocation30], 0 }
  0x12   :  { %37 = vsyncpa [#allocation4], 0 }
  0x13   :  { %38 = vsyncpa [#allocation33], 0 }
  0x14   :  { %39 = vsyncpa [#allocation36], 0  ;;  %s4893_s2 = smov [#allocation5]   ;;  %s4894_s26 = smov [#allocation8]  }
  0x15   :  { %s58_s25 = sshll.u32 %s4893_s2, 4  ;;  %s80_s27 = sshll.u32 %s4894_s26, 4  ;;  %s59_s25 = int_to_ptr.vmem [resolvable:$true] %s58_s25  ;;  %s81_s27 = int_to_ptr.vmem [resolvable:$true] %s80_s27 }
  0x16   :  { %s5802_s29 = sld [smem:[#allocation51_spill]] }
  0x1c   :  { %s4383_s0 = scalar_lea.hbm %s5802_s29, 128 }
  0x1d   :  { %p4384_p0 = scmp.ne.s32.totalorder %s5802_s29, %s4383_s0  ;;  %p4387_p1 = scmp.lt.u32.totalorder %s4383_s0, %s5802_s29 }
  0x1f   :  { %p4389_p2 = pnand %p4387_p1, %p4384_p0 }
  0x21   :  { %4392 = shalt.err (!%p4389_p2)
}
  0x22   :  { %s4393_s23 = scalar_lea.vmem %s59_s25, 128  ;;  %p4398_p4 = scmp.lt.s32.totalorder %s59_s25, %s59_s25 }
  0x23   :  { %p4394_p3 = scmp.ne.s32.totalorder %s59_s25, %s4393_s23  ;;  %p4399_p5 = scmp.lt.s32.totalorder %s4393_s23, %s4393_s23 }
  0x25   :  { %p4400_p6 = por %p4399_p5, %p4398_p4 }
  0x27   :  { %p4401_p7 = pnand %p4400_p6, %p4394_p3 }
  0x29   :  { %4404 = shalt.err (!%p4401_p7)
}
  0x2a   :  { %61 = dma.hbm_to_vmem [thread:$0]  %s5802_s29, 128, %s59_s25, [#allocation6]  }
  0x2b   :  { %s5803_s3 = sld [smem:[#allocation53_spill]] }
  0x31   :  { %s4405_s28 = scalar_lea.hbm %s5803_s3, 128 }
  0x32   :  { %p4406_p8 = scmp.ne.s32.totalorder %s5803_s3, %s4405_s28  ;;  %p4409_p9 = scmp.lt.u32.totalorder %s4405_s28, %s5803_s3 }
  0x34   :  { %p4411_p10 = pnand %p4409_p9, %p4406_p8 }
  0x36   :  { %4414 = shalt.err (!%p4411_p10)
}
  0x37   :  { %s4415_s22 = scalar_lea.vmem %s81_s27, 128  ;;  %p4420_p12 = scmp.lt.s32.totalorder %s81_s27, %s81_s27 }
  0x38   :  { %p4416_p11 = scmp.ne.s32.totalorder %s81_s27, %s4415_s22  ;;  %p4421_p13 = scmp.lt.s32.totalorder %s4415_s22, %s4415_s22 }
  0x3a   :  { %p4422_p0 = por %p4421_p13, %p4420_p12 }
  0x3c   :  { %p4423_p1 = pnand %p4422_p0, %p4416_p11 }
  0x3e   :  { %4426 = shalt.err (!%p4423_p1)
}
  0x3f   :  { %83 = dma.hbm_to_vmem [thread:$0]  %s5803_s3, 128, %s81_s27, [#allocation9]  }
  0x40   :  { %s4895_s23 = smov [#allocation11]   ;;  %s4896_s24 = smov [#allocation14]  }
  0x41   :  { %s100_s1 = sshll.u32 %s4895_s23, 4  ;;  %s122_s2 = sshll.u32 %s4896_s24, 4  ;;  %s101_s1 = int_to_ptr.vmem [resolvable:$true] %s100_s1  ;;  %s123_s2 = int_to_ptr.vmem [resolvable:$true] %s122_s2 }
  0x42   :  { %s5804_s4 = sld [smem:[#allocation55_spill]] }
  0x48   :  { %s4427_s30 = scalar_lea.hbm %s5804_s4, 128 }
  0x49   :  { %p4428_p2 = scmp.ne.s32.totalorder %s5804_s4, %s4427_s30  ;;  %p4431_p3 = scmp.lt.u32.totalorder %s4427_s30, %s5804_s4 }
  0x4b   :  { %p4433_p4 = pnand %p4431_p3, %p4428_p2 }
  0x4d   :  { %4436 = shalt.err (!%p4433_p4)
}
  0x4e   :  { %s4437_s27 = scalar_lea.vmem %s101_s1, 128  ;;  %p4442_p6 = scmp.lt.s32.totalorder %s101_s1, %s101_s1 }
  0x4f   :  { %p4438_p5 = scmp.ne.s32.totalorder %s101_s1, %s4437_s27  ;;  %p4443_p7 = scmp.lt.s32.totalorder %s4437_s27, %s4437_s27 }
  0x51   :  { %p4444_p8 = por %p4443_p7, %p4442_p6 }
  0x53   :  { %p4445_p9 = pnand %p4444_p8, %p4438_p5 }
  0x55   :  { %4448 = shalt.err (!%p4445_p9)
}
  0x56   :  { %103 = dma.hbm_to_vmem [thread:$0]  %s5804_s4, 128, %s101_s1, [#allocation12]  }
  0x57   :  { %s4449_s24 = scalar_lea.hbm %s5771_s7, 16 }
  0x58   :  { %p4450_p10 = scmp.ne.s32.totalorder %s5771_s7, %s4449_s24  ;;  %p4453_p11 = scmp.lt.u32.totalorder %s4449_s24, %s5771_s7 }
  0x5a   :  { %p4455_p12 = pnand %p4453_p11, %p4450_p10 }
  0x5c   :  { %4458 = shalt.err (!%p4455_p12)
}
  0x5d   :  { %s4459_s0 = scalar_lea.vmem %s123_s2, 16  ;;  %s4463_s5 = scalar_lea.vmem %s123_s2, 32 }
  0x5e   :  { %p4460_p13 = scmp.ne.s32.totalorder %s123_s2, %s4459_s0  ;;  %p4464_p0 = scmp.lt.s32.totalorder %s123_s2, %s123_s2 }
  0x5f   :  { %p4465_p1 = scmp.lt.s32.totalorder %s4463_s5, %s4459_s0 }
  0x61   :  { %p4466_p2 = por %p4465_p1, %p4464_p0 }
  0x63   :  { %p4467_p3 = pnand %p4466_p2, %p4460_p13 }
  0x65   :  { %4470 = shalt.err (!%p4467_p3)
}
  0x66   :  { %125 = dma.hbm_to_vmem [thread:$0]  %s5771_s7, 16, %s123_s2, [#allocation15]  }
  0x67   :  { %s4897_s22 = smov [#allocation17]   ;;  %s4898_s3 = smov [#allocation20]  }
  0x68   :  { %s142_s27 = sshll.u32 %s4897_s22, 4  ;;  %s164_s25 = sshll.u32 %s4898_s3, 4  ;;  %s143_s27 = int_to_ptr.vmem [resolvable:$true] %s142_s27  ;;  %s165_s25 = int_to_ptr.vmem [resolvable:$true] %s164_s25 }
  0x69   :  { %s4471_s24 = scalar_lea.hbm %s5773_s9, 16 }
  0x6a   :  { %p4472_p4 = scmp.ne.s32.totalorder %s5773_s9, %s4471_s24  ;;  %p4475_p5 = scmp.lt.u32.totalorder %s4471_s24, %s5773_s9 }
  0x6c   :  { %p4477_p6 = pnand %p4475_p5, %p4472_p4 }
  0x6e   :  { %4480 = shalt.err (!%p4477_p6)
}
  0x6f   :  { %s4481_s7 = scalar_lea.vmem %s143_s27, 16  ;;  %s4485_s2 = scalar_lea.vmem %s143_s27, 32 }
  0x70   :  { %p4482_p7 = scmp.ne.s32.totalorder %s143_s27, %s4481_s7  ;;  %p4486_p8 = scmp.lt.s32.totalorder %s143_s27, %s143_s27 }
  0x71   :  { %p4487_p9 = scmp.lt.s32.totalorder %s4485_s2, %s4481_s7 }
  0x73   :  { %p4488_p10 = por %p4487_p9, %p4486_p8 }
  0x75   :  { %p4489_p11 = pnand %p4488_p10, %p4482_p7 }
  0x77   :  { %4492 = shalt.err (!%p4489_p11)
}
  0x78   :  { %145 = dma.hbm_to_vmem [thread:$0]  %s5773_s9, 16, %s143_s27, [#allocation18]  }
  0x79   :  { %s4493_s22 = scalar_lea.hbm %s5775_s11, 32 }
  0x7a   :  { %p4494_p12 = scmp.ne.s32.totalorder %s5775_s11, %s4493_s22  ;;  %p4497_p13 = scmp.lt.u32.totalorder %s4493_s22, %s5775_s11 }
  0x7c   :  { %p4499_p0 = pnand %p4497_p13, %p4494_p12 }
  0x7e   :  { %4502 = shalt.err (!%p4499_p0)
}
  0x7f   :  { %s4503_s26 = scalar_lea.vmem %s165_s25, 32  ;;  %p4508_p2 = scmp.lt.s32.totalorder %s165_s25, %s165_s25 }
  0x80   :  { %p4504_p1 = scmp.ne.s32.totalorder %s165_s25, %s4503_s26  ;;  %p4509_p3 = scmp.lt.s32.totalorder %s4503_s26, %s4503_s26 }
  0x82   :  { %p4510_p4 = por %p4509_p3, %p4508_p2 }
  0x84   :  { %p4511_p5 = pnand %p4510_p4, %p4504_p1 }
  0x86   :  { %4514 = shalt.err (!%p4511_p5)
}
  0x87   :  { %167 = dma.hbm_to_vmem [thread:$0]  %s5775_s11, 32, %s165_s25, [#allocation21]  }
  0x88   :  { %s4899_s21 = smov [#allocation23]   ;;  %s4900_s30 = smov [#allocation26]  }
  0x89   :  { %s186_s28 = sshll.u32 %s4899_s21, 4  ;;  %s206_s7 = sshll.u32 %s4900_s30, 4  ;;  %s187_s28 = int_to_ptr.vmem [resolvable:$true] %s186_s28  ;;  %s207_s7 = int_to_ptr.vmem [resolvable:$true] %s206_s7 }
  0x8a   :  { %s4515_s5 = scalar_lea.hbm %s5777_s13, 128 }
  0x8b   :  { %p4516_p6 = scmp.ne.s32.totalorder %s5777_s13, %s4515_s5  ;;  %p4519_p7 = scmp.lt.u32.totalorder %s4515_s5, %s5777_s13 }
  0x8d   :  { %p4521_p8 = pnand %p4519_p7, %p4516_p6 }
  0x8f   :  { %4524 = shalt.err (!%p4521_p8)
}
  0x90   :  { %s4525_s11 = scalar_lea.vmem %s187_s28, 128  ;;  %p4530_p10 = scmp.lt.s32.totalorder %s187_s28, %s187_s28 }
  0x91   :  { %p4526_p9 = scmp.ne.s32.totalorder %s187_s28, %s4525_s11  ;;  %p4531_p11 = scmp.lt.s32.totalorder %s4525_s11, %s4525_s11 }
  0x93   :  { %p4532_p12 = por %p4531_p11, %p4530_p10 }
  0x95   :  { %p4533_p13 = pnand %p4532_p12, %p4526_p9 }
  0x97   :  { %4536 = shalt.err (!%p4533_p13)
}
  0x98   :  { %189 = dma.hbm_to_vmem [thread:$0]  %s5777_s13, 128, %s187_s28, [#allocation24]  }
  0x99   :  { %s4537_s26 = scalar_lea.hbm %s5779_s15, 128 }
  0x9a   :  { %p4538_p0 = scmp.ne.s32.totalorder %s5779_s15, %s4537_s26  ;;  %p4541_p1 = scmp.lt.u32.totalorder %s4537_s26, %s5779_s15 }
  0x9c   :  { %p4543_p2 = pnand %p4541_p1, %p4538_p0 }
  0x9e   :  { %4546 = shalt.err (!%p4543_p2)
}
  0x9f   :  { %s4547_s2 = scalar_lea.vmem %s207_s7, 128  ;;  %p4552_p4 = scmp.lt.s32.totalorder %s207_s7, %s207_s7 }
  0xa0   :  { %p4548_p3 = scmp.ne.s32.totalorder %s207_s7, %s4547_s2  ;;  %p4553_p5 = scmp.lt.s32.totalorder %s4547_s2, %s4547_s2 }
  0xa2   :  { %p4554_p6 = por %p4553_p5, %p4552_p4 }
  0xa4   :  { %p4555_p7 = pnand %p4554_p6, %p4548_p3 }
  0xa6   :  { %4558 = shalt.err (!%p4555_p7)
}
  0xa7   :  { %209 = dma.hbm_to_vmem [thread:$0]  %s5779_s15, 128, %s207_s7, [#allocation27]  }
  0xa8   :  { %s4901_s0 = smov [#allocation2]   ;;  %s5805_s22 = sld [smem:[#allocation50_spill]] }
  0xa9   :  { %s45_s5 = sshll.u32 %s4901_s0, 4  ;;  %s46_s5 = int_to_ptr.vmem [resolvable:$true] %s45_s5 }
  0xae   :  { %s4559_s3 = scalar_lea.hbm %s5805_s22, 2048 }
  0xaf   :  { %p4560_p8 = scmp.ne.s32.totalorder %s5805_s22, %s4559_s3  ;;  %p4563_p9 = scmp.lt.u32.totalorder %s4559_s3, %s5805_s22 }
  0xb1   :  { %p4565_p10 = pnand %p4563_p9, %p4560_p8 }
  0xb3   :  { %4568 = shalt.err (!%p4565_p10)
}
  0xb4   :  { %s4569_s24 = scalar_lea.vmem %s46_s5, 2048  ;;  %p4574_p12 = scmp.lt.s32.totalorder %s46_s5, %s46_s5 }
  0xb5   :  { %p4570_p11 = scmp.ne.s32.totalorder %s46_s5, %s4569_s24  ;;  %p4575_p13 = scmp.lt.s32.totalorder %s4569_s24, %s4569_s24 }
  0xb7   :  { %p4576_p0 = por %p4575_p13, %p4574_p12 }
  0xb9   :  { %p4577_p1 = pnand %p4576_p0, %p4570_p11 }
  0xbb   :  { %4580 = shalt.err (!%p4577_p1)
}
  0xbc   :  { %s4902_s15 = smov 128   ;;  %s4903_s7 = smov 8  }
  0xbd   :  { %51 = dma.hbm_to_vmem [thread:$0]  %s5805_s22, 2048, %s46_s5, [#allocation3], %s4902_s15, %s4902_s15, %s4903_s7  }
  0xbe   :  { %s4904_s27 = smov [#allocation7]   ;;  %s5806_s13 = sld [smem:[#allocation52_spill]] }
  0xbf   :  { %s67_s21 = sshll.u32 %s4904_s27, 4  ;;  %s68_s21 = int_to_ptr.vmem [resolvable:$true] %s67_s21 }
  0xc4   :  { %s4581_s28 = scalar_lea.hbm %s5806_s13, 8192 }
  0xc5   :  { %p4582_p2 = scmp.ne.s32.totalorder %s5806_s13, %s4581_s28  ;;  %p4585_p3 = scmp.lt.u32.totalorder %s4581_s28, %s5806_s13 }
  0xc7   :  { %p4587_p4 = pnand %p4585_p3, %p4582_p2 }
  0xc9   :  { %4590 = shalt.err (!%p4587_p4)
}
  0xca   :  { %s4591_s11 = scalar_lea.vmem %s68_s21, 8192  ;;  %p4596_p6 = scmp.lt.s32.totalorder %s68_s21, %s68_s21 }
  0xcb   :  { %p4592_p5 = scmp.ne.s32.totalorder %s68_s21, %s4591_s11  ;;  %p4597_p7 = scmp.lt.s32.totalorder %s4591_s11, %s4591_s11 }
  0xcd   :  { %p4598_p8 = por %p4597_p7, %p4596_p6 }
  0xcf   :  { %p4599_p9 = pnand %p4598_p8, %p4592_p5 }
  0xd1   :  { %4602 = shalt.err (!%p4599_p9)
}
  0xd2   :  { %s4905_s5 = smov 512   ;;  %s4906_s22 = smov 32  }
  0xd3   :  { %73 = dma.hbm_to_vmem [thread:$0]  %s5806_s13, 8192, %s68_s21, [#allocation6], %s4905_s5, %s4905_s5, %s4906_s22  }
  0xd4   :  { %s4907_s23 = smov [#allocation10]   ;;  %s4908_s26 = smov [#allocation13]  }
  0xd5   :  { %s90_s24 = sshll.u32 %s4907_s23, 4  ;;  %s109_s9 = sshll.u32 %s4908_s26, 4  ;;  %s91_s24 = int_to_ptr.vmem [resolvable:$true] %s90_s24  ;;  %s5158_s9 = int_to_ptr.vmem [resolvable:$true] %s109_s9 }
  0xd6   :  { %s5807_s2 = sld [smem:[#allocation54_spill]] }
  0xdc   :  { %s4603_s28 = scalar_lea.hbm %s5807_s2, 128 }
  0xdd   :  { %p4604_p10 = scmp.ne.s32.totalorder %s5807_s2, %s4603_s28  ;;  %p4607_p11 = scmp.lt.u32.totalorder %s4603_s28, %s5807_s2 }
  0xdf   :  { %p4609_p12 = pnand %p4607_p11, %p4604_p10 }
  0xe1   :  { %4612 = shalt.err (!%p4609_p12)
}
  0xe2   :  { %s4613_s21 = scalar_lea.vmem %s91_s24, 128  ;;  %p4618_p0 = scmp.lt.s32.totalorder %s91_s24, %s91_s24 }
  0xe3   :  { %p4614_p13 = scmp.ne.s32.totalorder %s91_s24, %s4613_s21  ;;  %p4619_p1 = scmp.lt.s32.totalorder %s4613_s21, %s4613_s21 }
  0xe5   :  { %p4620_p2 = por %p4619_p1, %p4618_p0 }
  0xe7   :  { %p4621_p3 = pnand %p4620_p2, %p4614_p13 }
  0xe9   :  { %4624 = shalt.err (!%p4621_p3)
}
  0xea   :  { %93 = dma.hbm_to_vmem [thread:$0]  %s5807_s2, 128, %s91_s24, [#allocation9]  }
  0xeb   :  { %s4625_s23 = scalar_lea.hbm %s5770_s6, 8192 }
  0xec   :  { %p4626_p4 = scmp.ne.s32.totalorder %s5770_s6, %s4625_s23  ;;  %p4629_p5 = scmp.lt.u32.totalorder %s4625_s23, %s5770_s6 }
  0xee   :  { %p4631_p6 = pnand %p4629_p5, %p4626_p4 }
  0xf0   :  { %4634 = shalt.err (!%p4631_p6)
}
  0xf1   :  { %s4635_s0 = scalar_lea.vmem %s5158_s9, 8192  ;;  %p4640_p8 = scmp.lt.s32.totalorder %s5158_s9, %s5158_s9 }
  0xf2   :  { %p4636_p7 = scmp.ne.s32.totalorder %s5158_s9, %s4635_s0  ;;  %p4641_p9 = scmp.lt.s32.totalorder %s4635_s0, %s4635_s0 }
  0xf4   :  { %p4642_p10 = por %p4641_p9, %p4640_p8 }
  0xf6   :  { %p4643_p11 = pnand %p4642_p10, %p4636_p7 }
  0xf8   :  { %4646 = shalt.err (!%p4643_p11)
}
  0xf9   :  { %s4909_s24 = smov 64   ;;  %s4910_s2 = smov 4  }
  0xfa   :  { %115 = dma.hbm_to_vmem [thread:$0]  %s5770_s6, 8192, %s5158_s9, [#allocation12], %s4909_s24, %s4909_s24, %s4910_s2  }
  0xfb   :  { %s4911_s3 = smov [#allocation16]   ;;  %s4912_s13 = smov [#allocation19]  }
  0xfc   :  { %s132_s21 = sshll.u32 %s4911_s3, 4  ;;  %s151_s11 = sshll.u32 %s4912_s13, 4  ;;  %s133_s21 = int_to_ptr.vmem [resolvable:$true] %s132_s21  ;;  %s5192_s11 = int_to_ptr.vmem [resolvable:$true] %s151_s11 }
  0xfd   :  { %s4647_s23 = scalar_lea.hbm %s5772_s8, 16 }
  0xfe   :  { %p4648_p12 = scmp.ne.s32.totalorder %s5772_s8, %s4647_s23  ;;  %p4651_p13 = scmp.lt.u32.totalorder %s4647_s23, %s5772_s8 }
 0x100   :  { %p4653_p0 = pnand %p4651_p13, %p4648_p12 }
 0x102   :  { %4656 = shalt.err (!%p4653_p0)
}
 0x103   :  { %s4657_s6 = scalar_lea.vmem %s133_s21, 16  ;;  %s4661_s9 = scalar_lea.vmem %s133_s21, 32 }
 0x104   :  { %p4658_p1 = scmp.ne.s32.totalorder %s133_s21, %s4657_s6  ;;  %p4662_p2 = scmp.lt.s32.totalorder %s133_s21, %s133_s21 }
 0x105   :  { %p4663_p3 = scmp.lt.s32.totalorder %s4661_s9, %s4657_s6 }
 0x107   :  { %p4664_p4 = por %p4663_p3, %p4662_p2 }
 0x109   :  { %p4665_p5 = pnand %p4664_p4, %p4658_p1 }
 0x10b   :  { %4668 = shalt.err (!%p4665_p5)
}
 0x10c   :  { %135 = dma.hbm_to_vmem [thread:$0]  %s5772_s8, 16, %s133_s21, [#allocation15]  }
 0x10d   :  { %s4669_s13 = scalar_lea.hbm %s5774_s10, 2048 }
 0x10e   :  { %p4670_p6 = scmp.ne.s32.totalorder %s5774_s10, %s4669_s13  ;;  %p4673_p7 = scmp.lt.u32.totalorder %s4669_s13, %s5774_s10 }
 0x110   :  { %p4675_p8 = pnand %p4673_p7, %p4670_p6 }
 0x112   :  { %4678 = shalt.err (!%p4675_p8)
}
 0x113   :  { %s4679_s27 = scalar_lea.vmem %s5192_s11, 2048  ;;  %p4684_p10 = scmp.lt.s32.totalorder %s5192_s11, %s5192_s11 }
 0x114   :  { %p4680_p9 = scmp.ne.s32.totalorder %s5192_s11, %s4679_s27  ;;  %p4685_p11 = scmp.lt.s32.totalorder %s4679_s27, %s4679_s27 }
 0x116   :  { %p4686_p12 = por %p4685_p11, %p4684_p10 }
 0x118   :  { %p4687_p13 = pnand %p4686_p12, %p4680_p9 }
 0x11a   :  { %4690 = shalt.err (!%p4687_p13)
}
 0x11b   :  { %157 = dma.hbm_to_vmem [thread:$0]  %s5774_s10, 2048, %s5192_s11, [#allocation18], %s4902_s15, %s4902_s15, %s4903_s7  }
 0x11c   :  { %s4913_s30 = smov [#allocation22]   ;;  %s4914_s6 = smov [#allocation25]  }
 0x11d   :  { %s173_s28 = sshll.u32 %s4913_s30, 4  ;;  %s196_s9 = sshll.u32 %s4914_s6, 4  ;;  %s174_s28 = int_to_ptr.vmem [resolvable:$true] %s173_s28  ;;  %s197_s9 = int_to_ptr.vmem [resolvable:$true] %s196_s9 }
 0x11e   :  { %s4691_s4 = scalar_lea.hbm %s5776_s12, 8192 }
 0x11f   :  { %p4692_p0 = scmp.ne.s32.totalorder %s5776_s12, %s4691_s4  ;;  %p4695_p1 = scmp.lt.u32.totalorder %s4691_s4, %s5776_s12 }
 0x121   :  { %p4697_p2 = pnand %p4695_p1, %p4692_p0 }
 0x123   :  { %4700 = shalt.err (!%p4697_p2)
}
 0x124   :  { %s4701_s10 = scalar_lea.vmem %s174_s28, 8192  ;;  %p4706_p4 = scmp.lt.s32.totalorder %s174_s28, %s174_s28 }
 0x125   :  { %p4702_p3 = scmp.ne.s32.totalorder %s174_s28, %s4701_s10  ;;  %p4707_p5 = scmp.lt.s32.totalorder %s4701_s10, %s4701_s10 }
 0x127   :  { %p4708_p6 = por %p4707_p5, %p4706_p4 }
 0x129   :  { %p4709_p7 = pnand %p4708_p6, %p4702_p3 }
 0x12b   :  { %4712 = shalt.err (!%p4709_p7)
}
 0x12c   :  { %179 = dma.hbm_to_vmem [thread:$0]  %s5776_s12, 8192, %s174_s28, [#allocation21], %s4905_s5, %s4905_s5, %s4906_s22  }
 0x12d   :  { %s4713_s26 = scalar_lea.hbm %s5778_s14, 128 }
 0x12e   :  { %p4714_p8 = scmp.ne.s32.totalorder %s5778_s14, %s4713_s26  ;;  %p4717_p9 = scmp.lt.u32.totalorder %s4713_s26, %s5778_s14 }
 0x130   :  { %p4719_p10 = pnand %p4717_p9, %p4714_p8 }
 0x132   :  { %4722 = shalt.err (!%p4719_p10)
}
 0x133   :  { %s4723_s6 = scalar_lea.vmem %s197_s9, 128  ;;  %p4728_p12 = scmp.lt.s32.totalorder %s197_s9, %s197_s9 }
 0x134   :  { %p4724_p11 = scmp.ne.s32.totalorder %s197_s9, %s4723_s6  ;;  %p4729_p13 = scmp.lt.s32.totalorder %s4723_s6, %s4723_s6 }
 0x136   :  { %p4730_p0 = por %p4729_p13, %p4728_p12 }
 0x138   :  { %p4731_p1 = pnand %p4730_p0, %p4724_p11 }
 0x13a   :  { %4734 = shalt.err (!%p4731_p1)
}
 0x13b   :  { %199 = dma.hbm_to_vmem [thread:$0]  %s5778_s14, 128, %s197_s9, [#allocation24]  }
 0x13c   :  { %s4915_s22 = smov [#allocation28]   ;;  %s4916_s0 = smov [#allocation29]  }
 0x13d   :  { %s215_s28 = sshll.u32 %s4915_s22, 4  ;;  %s228_s1 = sshll.u32 %s4916_s0, 4  ;;  %s216_s28 = int_to_ptr.vmem [resolvable:$true] %s215_s28  ;;  %s229_s1 = int_to_ptr.vmem [resolvable:$true] %s228_s1 }
 0x13e   :  { %s4735_s13 = scalar_lea.hbm %s5780_s16, 8192 }
 0x13f   :  { %p4736_p2 = scmp.ne.s32.totalorder %s5780_s16, %s4735_s13  ;;  %p4739_p3 = scmp.lt.u32.totalorder %s4735_s13, %s5780_s16 }
 0x141   :  { %p4741_p4 = pnand %p4739_p3, %p4736_p2 }
 0x143   :  { %4744 = shalt.err (!%p4741_p4)
}
 0x144   :  { %s4745_s14 = scalar_lea.vmem %s216_s28, 8192  ;;  %p4750_p6 = scmp.lt.s32.totalorder %s216_s28, %s216_s28 }
 0x145   :  { %p4746_p5 = scmp.ne.s32.totalorder %s216_s28, %s4745_s14  ;;  %p4751_p7 = scmp.lt.s32.totalorder %s4745_s14, %s4745_s14 }
 0x147   :  { %p4752_p8 = por %p4751_p7, %p4750_p6 }
 0x149   :  { %p4753_p9 = pnand %p4752_p8, %p4746_p5 }
 0x14b   :  { %4756 = shalt.err (!%p4753_p9)
}
 0x14c   :  { %221 = dma.hbm_to_vmem [thread:$0]  %s5780_s16, 8192, %s216_s28, [#allocation27], %s4909_s24, %s4909_s24, %s4910_s2  }
 0x14d   :  { %s4757_s26 = scalar_lea.hbm %s5781_s17, 16 }
 0x14e   :  { %p4758_p10 = scmp.ne.s32.totalorder %s5781_s17, %s4757_s26  ;;  %p4761_p11 = scmp.lt.u32.totalorder %s4757_s26, %s5781_s17 }
 0x150   :  { %p4763_p12 = pnand %p4761_p11, %p4758_p10 }
 0x152   :  { %4766 = shalt.err (!%p4763_p12)
}
 0x153   :  { %s4767_s6 = scalar_lea.vmem %s229_s1, 16  ;;  %s4771_s12 = scalar_lea.vmem %s229_s1, 32 }
 0x154   :  { %p4768_p13 = scmp.ne.s32.totalorder %s229_s1, %s4767_s6  ;;  %p4772_p0 = scmp.lt.s32.totalorder %s229_s1, %s229_s1 }
 0x155   :  { %p4773_p1 = scmp.lt.s32.totalorder %s4771_s12, %s4767_s6 }
 0x157   :  { %p4774_p2 = por %p4773_p1, %p4772_p0 }
 0x159   :  { %p4775_p3 = pnand %p4774_p2, %p4768_p13 }
 0x15b   :  { %4778 = shalt.err (!%p4775_p3)
}
 0x15c   :  { %231 = dma.hbm_to_vmem [thread:$0]  %s5781_s17, 16, %s229_s1, [#allocation30]  }
 0x15d   :  { %4867 = dma.done.wait [#allocation3], 2048  }
 0x15e   :  { %4868 = vsyncadd [#allocation3], 4294965248 }
 0x15f   :  { %4869 = dma.done.wait [#allocation6], 8320  }
 0x160   :  { %4870 = vsyncadd [#allocation6], 4294958976 }
 0x161   :  { %4871 = dma.done.wait [#allocation9], 256  }
 0x162   :  { %4872 = vsyncadd [#allocation9], 4294967040 }
 0x163   :  { %4873 = dma.done.wait [#allocation12], 8320  }
 0x164   :  { %4874 = vsyncadd [#allocation12], 4294958976 }
 0x165   :  { %4875 = dma.done.wait [#allocation15], 32  }
 0x166   :  { %4876 = vsyncadd [#allocation15], 4294967264 }
 0x167   :  { %4877 = dma.done.wait [#allocation18], 2064  }
 0x168   :  { %4878 = vsyncadd [#allocation18], 4294965232 }
 0x169   :  { %4879 = dma.done.wait [#allocation21], 8224  }
 0x16a   :  { %4880 = vsyncadd [#allocation21], 4294959072 }
 0x16b   :  { %4881 = dma.done.wait [#allocation24], 256  }
 0x16c   :  { %4882 = vsyncadd [#allocation24], 4294967040 }
 0x16d   :  { %4883 = dma.done.wait [#allocation27], 8320  }
 0x16e   :  { %4884 = vsyncadd [#allocation27], 4294958976 }
 0x16f   :  { %4885 = dma.done.wait [#allocation30], 16  }
 0x170   :  { %4886 = vsyncadd [#allocation30], 4294967280  ;;  %v5793_v0 = vmov 0   ;;  %v287_v1 = vld [vmem:[#allocation2] sm:$0xff]  ;;  %v288_v2 = vld [vmem:[#allocation2 + $0x8] sm:$0xff]  ;;  %s4918_s17 = smov [#allocation32]  }
 0x171   :  { %785 = vmatprep.mubr.bf16.mxu0 %v5793_v0  ;;  %826 = vmatprep.mubr.bf16.mxu1 %v5793_v0  ;;  %v289_v3 = vld [vmem:[#allocation2 + $0x10] sm:$0xff]  ;;  %v303_v4 = vpack.c.bf16 %v288_v2, %v287_v1  ;;  %v290_v5 = vld [vmem:[#allocation2 + $0x18] sm:$0xff]  ;;  %v291_v7 = vld [vmem:[#allocation2 + $0x20] sm:$0xff]  ;;  %s3665_s2 = sshll.u32 %s4918_s17, 4  ;;  %s4919_s5 = smov [#allocation31]   ;;  %s3666_s2 = int_to_ptr.vmem [resolvable:$true] %s3665_s2 }
 0x172   :  { %v304_v6 = vpack.c.bf16 %v290_v5, %v289_v3  ;;  %v292_v8 = vld [vmem:[#allocation2 + $0x28] sm:$0xff]  ;;  %v293_v11 = vld [vmem:[#allocation2 + $0x30] sm:$0xff]  ;;  %v294_v12 = vld [vmem:[#allocation2 + $0x38] sm:$0xff]  ;;  %s3655_s22 = sshll.u32 %s4919_s5, 4  ;;  %s4779_s28 = scalar_lea.vmem %s3666_s2, 128  ;;  %s3656_s22 = int_to_ptr.vmem [resolvable:$true] %s3655_s22 }
 0x173   :  { %417 = vxpose.xlu0.c.b16.start [1/8] (narrow) %v303_v4, 16  ;;  %v311_v9 = vld [vmem:[#allocation7] sm:$0xff]  ;;  %v312_v14 = vld [vmem:[#allocation7 + $0x8] sm:$0xff]  ;;  %v305_v18 = vpack.c.bf16 %v292_v8, %v291_v7  ;;  %v306_v33 = vpack.c.bf16 %v294_v12, %v293_v11  ;;  %v295_v34 = vld [vmem:[#allocation2 + $0x40] sm:$0xff]  ;;  %p4780_p4 = scmp.ne.s32.totalorder %s3666_s2, %s4779_s28  ;;  %p4784_p5 = scmp.lt.s32.totalorder %s3666_s2, %s3666_s2 }
 0x174   :  { %v315_v10 = vld [vmem:[#allocation7 + $0x20] sm:$0xff]  ;;  %v316_v15 = vld [vmem:[#allocation7 + $0x28] sm:$0xff]  ;;  %v298_v43 = vld [vmem:[#allocation2 + $0x58] sm:$0xff]  ;;  %p4785_p6 = scmp.lt.s32.totalorder %s4779_s28, %s4779_s28 }
 0x175   :  { %v3715_v13 = vcombine.high %v311_v9, %v315_v10  ;;  %v3714_v16 = vcombine.low %v311_v9, %v315_v10  ;;  %v319_v17 = vld [vmem:[#allocation7 + $0x40] sm:$0xff]  ;;  %v3717_v19 = vcombine.high %v312_v14, %v316_v15  ;;  %v3716_v20 = vcombine.low %v312_v14, %v316_v15  ;;  %v320_v22 = vld [vmem:[#allocation7 + $0x48] sm:$0xff]  ;;  %v5282_v52 = vld [vmem:[#allocation7 + $0x10] sm:$0xff] }
 0x176   :  { %v323_v21 = vld [vmem:[#allocation7 + $0x60] sm:$0xff]  ;;  %v324_v23 = vld [vmem:[#allocation7 + $0x68] sm:$0xff]  ;;  %v5284_v53 = vld [vmem:[#allocation7 + $0x30] sm:$0xff]  ;;  %p4786_p7 = por %p4785_p6, %p4784_p5 }
 0x177   :  { %418 = vxpose.xlu0.c.b16.cont [2/8] (narrow) %v304_v6, 16  ;;  %753 = vmatprep.subr.bf16.mxu0 %v3715_v13  ;;  %v3723_v24 = vcombine.high %v319_v17, %v323_v21  ;;  %v3725_v25 = vcombine.high %v320_v22, %v324_v23  ;;  %v327_v26 = vld [vmem:[#allocation7 + $0x80] sm:$0xff]  ;;  %v328_v28 = vld [vmem:[#allocation7 + $0x88] sm:$0xff]  ;;  %v3722_v29 = vcombine.low %v319_v17, %v323_v21  ;;  %v5286_v54 = vld [vmem:[#allocation7 + $0x18] sm:$0xff] }
 0x178   :  { %v331_v27 = vld [vmem:[#allocation7 + $0xa0] sm:$0xff]  ;;  %794 = vmatprep.subr.bf16.mxu1 %v3717_v19  ;;  %754 = vmatpush1.bf16.msra.mxu0 %v3714_v16  ;;  %v332_v30 = vld [vmem:[#allocation7 + $0xa8] sm:$0xff]  ;;  %v3724_v31 = vcombine.low %v320_v22, %v324_v23  ;;  %v3718_v56 = vcombine.low %v5282_v52, %v5284_v53  ;;  %v5290_v57 = vld [vmem:[#allocation7 + $0x38] sm:$0xff]  ;;  %p4787_p8 = pnand %p4786_p7, %p4780_p4 }
 0x179   :  { %795 = vmatpush1.bf16.msra.mxu1 %v3716_v20  ;;  %755 = vmatprep.subr.bf16.mxu0 %v3723_v24  ;;  %v3731_v32 = vcombine.high %v327_v26, %v331_v27  ;;  %v3733_v35 = vcombine.high %v328_v28, %v332_v30  ;;  %v335_v36 = vld [vmem:[#allocation7 + $0xc0] sm:$0xff]  ;;  %v336_v39 = vld [vmem:[#allocation7 + $0xc8] sm:$0xff]  ;;  %v3730_v41 = vcombine.low %v327_v26, %v331_v27  ;;  %v299_v62 = vld [vmem:[#allocation2 + $0x60] sm:$0xff] }
 0x17a   :  { %796 = vmatprep.subr.bf16.mxu1 %v3725_v25  ;;  %v339_v37 = vld [vmem:[#allocation7 + $0xe0] sm:$0xff]  ;;  %v340_v40 = vld [vmem:[#allocation7 + $0xe8] sm:$0xff]  ;;  %v3732_v44 = vcombine.low %v328_v28, %v332_v30  ;;  %v3720_v60 = vcombine.low %v5286_v54, %v5290_v57  ;;  %v302_v14 = vld [vmem:[#allocation2 + $0x78] sm:$0xff] }
 0x17b   :  { %419 = vxpose.xlu0.c.b16.cont [3/8] (narrow) %v305_v18, 16  ;;  %v296_v38 = vld [vmem:[#allocation2 + $0x48] sm:$0xff]  ;;  %v297_v42 = vld [vmem:[#allocation2 + $0x50] sm:$0xff]  ;;  %v3739_v45 = vcombine.high %v335_v36, %v339_v37  ;;  %v3741_v48 = vcombine.high %v336_v39, %v340_v40  ;;  %v3738_v55 = vcombine.low %v335_v36, %v339_v37  ;;  %v3740_v58 = vcombine.low %v336_v39, %v340_v40  ;;  %v322_v36 = vld [vmem:[#allocation7 + $0x58] sm:$0xff] }
 0x17c   :  { %756 = vmatpush1.bf16.msra.mxu0 %v3722_v29  ;;  %v343_v46 = vld [vmem:[#allocation7 + $0x100] sm:$0xff]  ;;  %v307_v47 = vpack.c.bf16 %v296_v38, %v295_v34  ;;  %v344_v50 = vld [vmem:[#allocation7 + $0x108] sm:$0xff]  ;;  %v308_v61 = vpack.c.bf16 %v298_v43, %v297_v42  ;;  %v321_v34 = vld [vmem:[#allocation7 + $0x50] sm:$0xff] }
 0x17d   :  { %797 = vmatpush1.bf16.msra.mxu1 %v3724_v31  ;;  %757 = vmatprep.subr.bf16.mxu0 %v3731_v32  ;;  %v347_v49 = vld [vmem:[#allocation7 + $0x120] sm:$0xff]  ;;  %v348_v51 = vld [vmem:[#allocation7 + $0x128] sm:$0xff]  ;;  %v3719_v32 = vcombine.high %v5282_v52, %v5284_v53  ;;  %v326_v37 = vld [vmem:[#allocation7 + $0x78] sm:$0xff] }
 0x17e   :  { %798 = vmatprep.subr.bf16.mxu1 %v3733_v35  ;;  %v3747_v59 = vcombine.high %v343_v46, %v347_v49  ;;  %v3749_v63 = vcombine.high %v344_v50, %v348_v51  ;;  %v351_v1 = vld [vmem:[#allocation7 + $0x140] sm:$0xff]  ;;  %v352_v4 = vld [vmem:[#allocation7 + $0x148] sm:$0xff]  ;;  %v3746_v6 = vcombine.low %v343_v46, %v347_v49  ;;  %v3748_v7 = vcombine.low %v344_v50, %v348_v51  ;;  %v325_v35 = vld [vmem:[#allocation7 + $0x70] sm:$0xff] }
 0x17f   :  { %420 = vxpose.xlu0.c.b16.cont [4/8] (narrow) %v306_v33, 16  ;;  %v355_v2 = vld [vmem:[#allocation7 + $0x160] sm:$0xff]  ;;  %v356_v5 = vld [vmem:[#allocation7 + $0x168] sm:$0xff]  ;;  %v3721_v33 = vcombine.high %v5286_v54, %v5290_v57  ;;  %v329_v38 = vld [vmem:[#allocation7 + $0x90] sm:$0xff]  ;;  %v3727_v42 = vcombine.high %v321_v34, %v325_v35  ;;  %v3729_v43 = vcombine.high %v322_v36, %v326_v37  ;;  %v3728_v46 = vcombine.low %v322_v36, %v326_v37 }
 0x180   :  { %758 = vmatpush1.bf16.msra.mxu0 %v3730_v41  ;;  %v300_v3 = vld [vmem:[#allocation2 + $0x68] sm:$0xff]  ;;  %v3755_v8 = vcombine.high %v351_v1, %v355_v2  ;;  %v301_v10 = vld [vmem:[#allocation2 + $0x70] sm:$0xff]  ;;  %v3757_v11 = vcombine.high %v352_v4, %v356_v5  ;;  %v3754_v17 = vcombine.low %v351_v1, %v355_v2  ;;  %v3756_v19 = vcombine.low %v352_v4, %v356_v5  ;;  %v333_v39 = vld [vmem:[#allocation7 + $0xb0] sm:$0xff] }
 0x181   :  { %799 = vmatpush1.bf16.msra.mxu1 %v3732_v44  ;;  %759 = vmatprep.subr.bf16.mxu0 %v3739_v45  ;;  %v309_v9 = vpack.c.bf16 %v300_v3, %v299_v62  ;;  %v359_v12 = vld [vmem:[#allocation7 + $0x180] sm:$0xff]  ;;  %v360_v15 = vld [vmem:[#allocation7 + $0x188] sm:$0xff]  ;;  %v310_v24 = vpack.c.bf16 %v302_v14, %v301_v10  ;;  %v330_v40 = vld [vmem:[#allocation7 + $0x98] sm:$0xff]  ;;  %v3726_v45 = vcombine.low %v321_v34, %v325_v35 }
 0x182   :  { %800 = vmatprep.subr.bf16.mxu1 %v3741_v48  ;;  %v363_v13 = vld [vmem:[#allocation7 + $0x1a0] sm:$0xff]  ;;  %v364_v16 = vld [vmem:[#allocation7 + $0x1a8] sm:$0xff]  ;;  %v334_v41 = vld [vmem:[#allocation7 + $0xb8] sm:$0xff]  ;;  %v3735_v51 = vcombine.high %v329_v38, %v333_v39  ;;  %v3734_v52 = vcombine.low %v329_v38, %v333_v39 }
 0x183   :  { %421 = vxpose.xlu0.c.b16.cont [5/8] (narrow) %v307_v47, 16  ;;  %v367_v18 = vld [vmem:[#allocation7 + $0x1c0] sm:$0xff]  ;;  %v3763_v20 = vcombine.high %v359_v12, %v363_v13  ;;  %v368_v22 = vld [vmem:[#allocation7 + $0x1c8] sm:$0xff]  ;;  %v3765_v25 = vcombine.high %v360_v15, %v364_v16  ;;  %v3762_v26 = vcombine.low %v359_v12, %v363_v13  ;;  %v3764_v27 = vcombine.low %v360_v15, %v364_v16  ;;  %v337_v47 = vld [vmem:[#allocation7 + $0xd0] sm:$0xff] }
 0x184   :  { %760 = vmatpush1.bf16.msra.mxu0 %v3738_v55  ;;  %v371_v21 = vld [vmem:[#allocation7 + $0x1e0] sm:$0xff]  ;;  %v372_v23 = vld [vmem:[#allocation7 + $0x1e8] sm:$0xff]  ;;  %v341_v48 = vld [vmem:[#allocation7 + $0xf0] sm:$0xff]  ;;  %v3737_v55 = vcombine.high %v330_v40, %v334_v41  ;;  %v3736_v53 = vcombine.low %v330_v40, %v334_v41 }
 0x185   :  { %801 = vmatpush1.bf16.msra.mxu1 %v3740_v58  ;;  %761 = vmatprep.subr.bf16.mxu0 %v3747_v59  ;;  %v3771_v28 = vcombine.high %v367_v18, %v371_v21  ;;  %v3773_v29 = vcombine.high %v368_v22, %v372_v23  ;;  %v3770_v30 = vcombine.low %v367_v18, %v371_v21  ;;  %v338_v49 = vld [vmem:[#allocation7 + $0xd8] sm:$0xff]  ;;  %v345_v54 = vld [vmem:[#allocation7 + $0x110] sm:$0xff]  ;;  %v4201_v34 = vld [vmem:[#allocation13 + $0x8] sm:$0xff]  }
 0x186   :  { %802 = vmatprep.subr.bf16.mxu1 %v3749_v63  ;;  %v3772_v31 = vcombine.low %v368_v22, %v372_v23  ;;  %v342_v50 = vld [vmem:[#allocation7 + $0xf8] sm:$0xff]  ;;  %v3743_v59 = vcombine.high %v337_v47, %v341_v48  ;;  %v353_v63 = vld [vmem:[#allocation7 + $0x150] sm:$0xff]  ;;  %v4202_v35 = vld [vmem:[#allocation13 + $0x88] sm:$0xff]  }
 0x187   :  { %422 = vxpose.xlu0.c.b16.cont [6/8] (narrow) %v308_v61, 16  ;;  %v346_v57 = vld [vmem:[#allocation7 + $0x118] sm:$0xff]  ;;  %v3742_v61 = vcombine.low %v337_v47, %v341_v48  ;;  %v3744_v62 = vcombine.low %v338_v49, %v342_v50  ;;  %v357_v1 = vld [vmem:[#allocation7 + $0x170] sm:$0xff]  ;;  %v4203_v36 = vld [vmem:[#allocation13 + $0x50] sm:$0xff]  }
 0x188   :  { %762 = vmatpush1.bf16.msra.mxu0 %v3746_v6  ;;  %v350_v58 = vld [vmem:[#allocation7 + $0x138] sm:$0xff]  ;;  %v361_v10 = vld [vmem:[#allocation7 + $0x190] sm:$0xff]  ;;  %v3758_v14 = vcombine.low %v353_v63, %v357_v1  ;;  %v4204_v37 = vld [vmem:[#allocation13 + $0xd0] sm:$0xff]  }
 0x189   :  { %803 = vmatpush1.bf16.msra.mxu1 %v3748_v7  ;;  %763 = vmatprep.subr.bf16.mxu0 %v3755_v8  ;;  %v354_v2 = vld [vmem:[#allocation7 + $0x158] sm:$0xff]  ;;  %v3753_v4 = vcombine.high %v346_v57, %v350_v58  ;;  %v3752_v7 = vcombine.low %v346_v57, %v350_v58  ;;  %v3759_v8 = vcombine.high %v353_v63, %v357_v1  ;;  %v369_v18 = vld [vmem:[#allocation7 + $0x1d0] sm:$0xff]  ;;  %v4205_v38 = vld [vmem:[#allocation13 + $0x10] sm:$0xff]  }
 0x18a   :  { %804 = vmatprep.subr.bf16.mxu1 %v3757_v11  ;;  %v358_v5 = vld [vmem:[#allocation7 + $0x178] sm:$0xff]  ;;  %v365_v11 = vld [vmem:[#allocation7 + $0x1b0] sm:$0xff]  ;;  %v4206_v39 = vld [vmem:[#allocation13 + $0x90] sm:$0xff]  }
 0x18b   :  { %423 = vxpose.xlu0.c.b16.cont [7/8] (narrow) %v309_v9, 16  ;;  %v3761_v9 = vcombine.high %v354_v2, %v358_v5  ;;  %v362_v12 = vld [vmem:[#allocation7 + $0x198] sm:$0xff]  ;;  %v3760_v15 = vcombine.low %v354_v2, %v358_v5  ;;  %v3767_v16 = vcombine.high %v361_v10, %v365_v11  ;;  %v3766_v22 = vcombine.low %v361_v10, %v365_v11  ;;  %v4207_v40 = vld [vmem:[#allocation13 + $0x58] sm:$0xff]   ;;  %v4215_v48 = vld [vmem:[#allocation13 + $0x68] sm:$0xff]  }
 0x18c   :  { %764 = vmatpush1.bf16.msra.mxu0 %v3754_v17  ;;  %v366_v13 = vld [vmem:[#allocation7 + $0x1b8] sm:$0xff]  ;;  %v4208_v41 = vld [vmem:[#allocation13 + $0xd8] sm:$0xff]  }
 0x18d   :  { %805 = vmatpush1.bf16.msra.mxu1 %v3756_v19  ;;  %765 = vmatprep.subr.bf16.mxu0 %v3763_v20  ;;  %v3769_v17 = vcombine.high %v362_v12, %v366_v13  ;;  %v373_v19 = vld [vmem:[#allocation7 + $0x1f0] sm:$0xff]  ;;  %v370_v20 = vld [vmem:[#allocation7 + $0x1d8] sm:$0xff]  ;;  %v3768_v23 = vcombine.low %v362_v12, %v366_v13 }
 0x18e   :  { %806 = vmatprep.subr.bf16.mxu1 %v3765_v25  ;;  %v374_v21 = vld [vmem:[#allocation7 + $0x1f8] sm:$0xff]  ;;  %v4224_v57 = vld [vmem:[#allocation13 + $0xf8] sm:$0xff]  }
 0x18f   :  { %424 = vxpose.xlu0.c.b16.end [8/8] (narrow) %v310_v24, 16  ;;  %v3775_v24 = vcombine.high %v369_v18, %v373_v19  ;;  %v3777_v25 = vcombine.high %v370_v20, %v374_v21  ;;  %v4214_v47 = vld [vmem:[#allocation13 + $0xa0] sm:$0xff]   ;;  %v4225_v58 = vld [vmem:[#allocation13 + $0x38] sm:$0xff]  }
 0x190   :  { %766 = vmatpush1.bf16.msra.mxu0 %v3762_v26  ;;  %v3774_v26 = vcombine.low %v369_v18, %v373_v19 }
 0x191   :  { %807 = vmatpush1.bf16.msra.mxu1 %v3764_v27  ;;  %767 = vmatprep.subr.bf16.mxu0 %v3771_v28  ;;  %v3776_v27 = vcombine.low %v370_v20, %v374_v21  ;;  %v4195_v28 = vld [vmem:[#allocation13 + $0x40] sm:$0xff]  }
 0x192   :  { %808 = vmatprep.subr.bf16.mxu1 %v3773_v29  ;;  %v4196_v29 = vld [vmem:[#allocation13 + $0xc0] sm:$0xff]  }
 0x194   :  { %768 = vmatpush1.bf16.msra.mxu0 %v3770_v30  ;;  %v4197_v30 = vld [vmem:[#allocation13] sm:$0xff]  }
 0x195   :  { %809 = vmatpush1.bf16.msra.mxu1 %v3772_v31  ;;  %835 = vmatprep.subr.bf16.mxu0 %v3719_v32  ;;  %v4198_v31 = vld [vmem:[#allocation13 + $0x80] sm:$0xff]   ;;  %v4199_v32 = vld [vmem:[#allocation13 + $0x48] sm:$0xff]  }
 0x196   :  { %876 = vmatprep.subr.bf16.mxu1 %v3721_v33  ;;  %v4200_v33 = vld [vmem:[#allocation13 + $0xc8] sm:$0xff]  }
 0x1d9   :  { %v5298_v44 = vpop.trf.xlu0 }
 0x1da   :  { %786 = vmatmul.mubr.bf16.vlgmr.msra.gmra.mrb[0].mxu0 %v5298_v44  ;;  %827 = vmatmul.mubr.bf16.vlgmr.msra.gmra.mrb[0].mxu1 %v5298_v44 }
 0x1db   :  { %836 = vmatpush1.bf16.msra.mxu0 %v3718_v56  ;;  %877 = vmatpush1.bf16.msra.mxu1 %v3720_v60  ;;  %v349_v56 = vld [vmem:[#allocation7 + $0x130] sm:$0xff]  ;;  %v3745_v60 = vcombine.high %v338_v49, %v342_v50  ;;  %v4216_v49 = vld [vmem:[#allocation13 + $0xe8] sm:$0xff]  }
 0x1dc   :  { %837 = vmatprep.subr.bf16.mxu0 %v3727_v42  ;;  %878 = vmatprep.subr.bf16.mxu1 %v3729_v43  ;;  %v3751_v3 = vcombine.high %v345_v54, %v349_v56  ;;  %v3750_v6 = vcombine.low %v345_v54, %v349_v56  ;;  %v4209_v42 = vld [vmem:[#allocation13 + $0x18] sm:$0xff]   ;;  %v4217_v50 = vld [vmem:[#allocation13 + $0x28] sm:$0xff]   ;;  %v4222_v54 = vld [vmem:[#allocation13 + $0xb0] sm:$0xff]  }
 0x1dd   :  { %867 = vmatprep.mubr.bf16.mxu0 %v5793_v0  ;;  %908 = vmatprep.mubr.bf16.mxu1 %v5793_v0  ;;  %v4210_v43 = vld [vmem:[#allocation13 + $0x98] sm:$0xff]  }
 0x1de   :  { %v4223_v56 = vld [vmem:[#allocation13 + $0x78] sm:$0xff]  }
 0x1df   :  { %838 = vmatpush1.bf16.msra.mxu0 %v3726_v45  ;;  %879 = vmatpush1.bf16.msra.mxu1 %v3728_v46  ;;  %v4212_v45 = vld [vmem:[#allocation13 + $0xe0] sm:$0xff]  }
 0x1e0   :  { %839 = vmatprep.subr.bf16.mxu0 %v3735_v51  ;;  %880 = vmatprep.subr.bf16.mxu1 %v3737_v55  ;;  %v4213_v46 = vld [vmem:[#allocation13 + $0x20] sm:$0xff]   ;;  %v4218_v51 = vld [vmem:[#allocation13 + $0xa8] sm:$0xff]   ;;  %v4219_v55 = vld [vmem:[#allocation13 + $0x70] sm:$0xff]  }
 0x1e3   :  { %840 = vmatpush1.bf16.msra.mxu0 %v3734_v52  ;;  %881 = vmatpush1.bf16.msra.mxu1 %v3736_v53  ;;  %v4220_v52 = vld [vmem:[#allocation13 + $0xf0] sm:$0xff]  }
 0x1e4   :  { %841 = vmatprep.subr.bf16.mxu0 %v3743_v59  ;;  %882 = vmatprep.subr.bf16.mxu1 %v3745_v60  ;;  %v4221_v53 = vld [vmem:[#allocation13 + $0x30] sm:$0xff]   ;;  %v4226_v59 = vld [vmem:[#allocation13 + $0xb8] sm:$0xff]   ;;  %v4227_v60 = vld [vmem:[#allocation13 + $0x140] sm:$0xff]  }
 0x1e7   :  { %842 = vmatpush1.bf16.msra.mxu0 %v3742_v61  ;;  %883 = vmatpush1.bf16.msra.mxu1 %v3744_v62  ;;  %v4228_v61 = vld [vmem:[#allocation13 + $0x1c0] sm:$0xff]   ;;  %v377_v62 = vlaneseq }
 0x1e8   :  { %843 = vmatprep.subr.bf16.mxu0 %v3751_v3  ;;  %884 = vmatprep.subr.bf16.mxu1 %v3753_v4  ;;  %v5320_v3 = vld [vmem:[#allocation8] sm:$0xff] }
 0x1e9   :  { %v5312_v63 = vshrl.u32 %v377_v62, 7 }
 0x1eb   :  { %844 = vmatpush1.bf16.msra.mxu0 %v3750_v6  ;;  %885 = vmatpush1.bf16.msra.mxu1 %v3752_v7  ;;  %v5315_v1 = vsub.s32 0, %v5312_v63  ;;  %v5318_v2 = vsub.s32 2, %v5312_v63  ;;  %v5323_v4 = vsub.s32 1, %v5312_v63  ;;  %v5326_v5 = vsub.s32 3, %v5312_v63 }
 0x1ec   :  { %845 = vmatprep.subr.bf16.mxu0 %v3759_v8  ;;  %886 = vmatprep.subr.bf16.mxu1 %v3761_v9 }
 0x1ed   :  { %v380_v6 = vrot.slane %v5320_v3, %v5315_v1  ;;  %v388_v7 = vrot.slane %v5320_v3, %v5318_v2  ;;  %v384_v8 = vrot.slane %v5320_v3, %v5323_v4  ;;  %v392_v9 = vrot.slane %v5320_v3, %v5326_v5 }
 0x1ef   :  { %846 = vmatpush1.bf16.msra.mxu0 %v3758_v14  ;;  %887 = vmatpush1.bf16.msra.mxu1 %v3760_v15 }
 0x1f0   :  { %847 = vmatprep.subr.bf16.mxu0 %v3767_v16  ;;  %888 = vmatprep.subr.bf16.mxu1 %v3769_v17 }
 0x1f3   :  { %848 = vmatpush1.bf16.msra.mxu0 %v3766_v22  ;;  %889 = vmatpush1.bf16.msra.mxu1 %v3768_v23 }
 0x1f4   :  { %849 = vmatprep.subr.bf16.mxu0 %v3775_v24  ;;  %890 = vmatprep.subr.bf16.mxu1 %v3777_v25 }
 0x1f7   :  { %850 = vmatpush1.bf16.msra.mxu0 %v3774_v26  ;;  %891 = vmatpush1.bf16.msra.mxu1 %v3776_v27 }
 0x1f8   :  { %3990 = vmatprep.subr.bf16.mxu0 %v4195_v28  ;;  %4012 = vmatprep.subr.bf16.mxu1 %v4196_v29 }
 0x1fa   :  { %868 = vmatmul.mubr.bf16.vlgmr.msra.gmra.mrb[4].mxu0 %v5298_v44  ;;  %909 = vmatmul.mubr.bf16.vlgmr.msra.gmra.mrb[4].mxu1 %v5298_v44  ;;  %v4211_v44 = vld [vmem:[#allocation13 + $0x60] sm:$0xff]  }
 0x1fb   :  { %3991 = vmatpush3.bf16.msra.mxu0 %v4197_v30  ;;  %4013 = vmatpush3.bf16.msra.mxu1 %v4198_v31 }
 0x1fc   :  { %3992 = vmatprep.subr.bf16.mxu0 %v4199_v32  ;;  %4014 = vmatprep.subr.bf16.mxu1 %v4200_v33 }
 0x1ff   :  { %3993 = vmatpush3.bf16.msra.mxu0 %v4201_v34  ;;  %4015 = vmatpush3.bf16.msra.mxu1 %v4202_v35 }
 0x200   :  { %3994 = vmatprep.subr.bf16.mxu0 %v4203_v36  ;;  %4016 = vmatprep.subr.bf16.mxu1 %v4204_v37 }
 0x203   :  { %3995 = vmatpush3.bf16.msra.mxu0 %v4205_v38  ;;  %4017 = vmatpush3.bf16.msra.mxu1 %v4206_v39 }
 0x204   :  { %3996 = vmatprep.subr.bf16.mxu0 %v4207_v40  ;;  %4018 = vmatprep.subr.bf16.mxu1 %v4208_v41 }
 0x207   :  { %3997 = vmatpush3.bf16.msra.mxu0 %v4209_v42  ;;  %4019 = vmatpush3.bf16.msra.mxu1 %v4210_v43 }
 0x208   :  { %3998 = vmatprep.subr.bf16.mxu0 %v4211_v44  ;;  %4020 = vmatprep.subr.bf16.mxu1 %v4212_v45 }
 0x20b   :  { %3999 = vmatpush3.bf16.msra.mxu0 %v4213_v46  ;;  %4021 = vmatpush3.bf16.msra.mxu1 %v4214_v47 }
 0x20c   :  { %4000 = vmatprep.subr.bf16.mxu0 %v4215_v48  ;;  %4022 = vmatprep.subr.bf16.mxu1 %v4216_v49 }
 0x20f   :  { %4001 = vmatpush3.bf16.msra.mxu0 %v4217_v50  ;;  %4023 = vmatpush3.bf16.msra.mxu1 %v4218_v51 }
 0x210   :  { %4002 = vmatprep.subr.bf16.mxu0 %v4219_v55  ;;  %4024 = vmatprep.subr.bf16.mxu1 %v4220_v52 }
 0x213   :  { %4003 = vmatpush3.bf16.msra.mxu0 %v4221_v53  ;;  %4025 = vmatpush3.bf16.msra.mxu1 %v4222_v54 }
 0x214   :  { %4004 = vmatprep.subr.bf16.mxu0 %v4223_v56  ;;  %4026 = vmatprep.subr.bf16.mxu1 %v4224_v57 }
 0x217   :  { %4005 = vmatpush3.bf16.msra.mxu0 %v4225_v58  ;;  %4027 = vmatpush3.bf16.msra.mxu1 %v4226_v59 }
 0x218   :  { %4034 = vmatprep.subr.bf16.mxu0 %v4227_v60  ;;  %4056 = vmatprep.subr.bf16.mxu1 %v4228_v61 }
 0x2ad   :  { %v787_v10 = vpop.f32.mrb[0].mxu0  ;;  %v828_v11 = vpop.f32.mrb[0].mxu1 }
 0x2ae   :  { %v5336_v12 = vadd.f32 %v787_v10, %v380_v6  ;;  %v5338_v13 = vadd.f32 %v828_v11, %v388_v7  ;;  %v789_v14 = vpop.f32.mrb[1].mxu0  ;;  %v830_v15 = vpop.f32.mrb[1].mxu1 }
 0x2af   :  { %v5340_v16 = vadd.f32 %v789_v14, %v384_v8  ;;  %v5342_v17 = vadd.f32 %v830_v15, %v392_v9  ;;  %v791_v18 = vpop.f32.mrb[2].mxu0  ;;  %v832_v19 = vpop.f32.mrb[2].mxu1 }
 0x2b0   :  { %v917_v20 = vrot.slane %v5336_v12, 4  ;;  %v965_v21 = vmul.f32 %v5336_v12, %v5336_v12  ;;  %v929_v22 = vrot.slane %v5338_v13, 4  ;;  %v967_v23 = vmul.f32 %v5338_v13, %v5338_v13  ;;  %v792_v24 = vpop.f32.mrb[3].mxu0  ;;  %v833_v25 = vpop.f32.mrb[3].mxu1 }
 0x2b1   :  { %v923_v26 = vrot.slane %v5340_v16, 4  ;;  %v966_v27 = vmul.f32 %v5340_v16, %v5340_v16  ;;  %v935_v28 = vrot.slane %v5342_v17, 4  ;;  %v968_v29 = vmul.f32 %v5342_v17, %v5342_v17 }
 0x2b2   :  { %v918_v30 = vadd.f32 %v917_v20, %v5336_v12  ;;  %v973_v31 = vrot.slane %v965_v21, 4  ;;  %v930_v32 = vadd.f32 %v929_v22, %v5338_v13  ;;  %v985_v33 = vrot.slane %v967_v23, 4 }
 0x2b3   :  { %v924_v34 = vadd.f32 %v923_v26, %v5340_v16  ;;  %v979_v35 = vrot.slane %v966_v27, 4  ;;  %v936_v36 = vadd.f32 %v935_v28, %v5342_v17  ;;  %v991_v37 = vrot.slane %v968_v29, 4 }
 0x2b4   :  { %v919_v38 = vrot.slane %v918_v30, 2  ;;  %v974_v39 = vadd.f32 %v973_v31, %v965_v21  ;;  %v931_v40 = vrot.slane %v930_v32, 2  ;;  %v986_v41 = vadd.f32 %v985_v33, %v967_v23 }
 0x2b5   :  { %v925_v42 = vrot.slane %v924_v34, 2  ;;  %v980_v43 = vadd.f32 %v979_v35, %v966_v27  ;;  %v937_v44 = vrot.slane %v936_v36, 2  ;;  %v992_v45 = vadd.f32 %v991_v37, %v968_v29 }
 0x2b6   :  { %v920_v46 = vadd.f32 %v919_v38, %v918_v30  ;;  %v975_v47 = vrot.slane %v974_v39, 2  ;;  %v932_v48 = vadd.f32 %v931_v40, %v930_v32  ;;  %v987_v49 = vrot.slane %v986_v41, 2 }
 0x2b7   :  { %v926_v50 = vadd.f32 %v925_v42, %v924_v34  ;;  %v981_v51 = vrot.slane %v980_v43, 2  ;;  %v938_v55 = vadd.f32 %v937_v44, %v936_v36  ;;  %v993_v52 = vrot.slane %v992_v45, 2 }
 0x2b8   :  { %v921_v53 = vrot.slane %v920_v46, 1  ;;  %v976_v54 = vadd.f32 %v975_v47, %v974_v39  ;;  %v933_v56 = vrot.slane %v932_v48, 1  ;;  %v988_v57 = vadd.f32 %v987_v49, %v986_v41 }
 0x2b9   :  { %v927_v58 = vrot.slane %v926_v50, 1  ;;  %v982_v59 = vadd.f32 %v981_v51, %v980_v43  ;;  %v939_v60 = vrot.slane %v938_v55, 1  ;;  %v994_v61 = vadd.f32 %v993_v52, %v992_v45  ;;  %v5388_v43 = vld [vmem:[#allocation10] sm:$0xff]  ;;  %v5390_v45 = vld [vmem:[#allocation11] sm:$0xff] }
 0x2ba   :  { %v922_v62 = vadd.f32 %v921_v53, %v920_v46  ;;  %v977_v6 = vrot.slane %v976_v54, 1  ;;  %v934_v7 = vadd.f32 %v933_v56, %v932_v48  ;;  %v989_v8 = vrot.slane %v988_v57, 1 }
 0x2bb   :  { %v928_v9 = vadd.f32 %v927_v58, %v926_v50  ;;  %v983_v10 = vrot.slane %v982_v59, 1  ;;  %v940_v11 = vadd.f32 %v939_v60, %v938_v55  ;;  %v995_v14 = vrot.slane %v994_v61, 1 }
 0x2bc   :  { %v978_v15 = vadd.f32 %v977_v6, %v976_v54  ;;  %v5360_v18 = vmul.f32 0.125, %v922_v62  ;;  %v990_v19 = vadd.f32 %v989_v8, %v988_v57  ;;  %v5362_v20 = vmul.f32 0.125, %v934_v7 }
 0x2bd   :  { %v984_v21 = vadd.f32 %v983_v10, %v982_v59  ;;  %v5364_v22 = vmul.f32 0.125, %v928_v9  ;;  %v996_v25 = vadd.f32 %v995_v14, %v994_v61  ;;  %v5368_v26 = vmul.f32 0.125, %v940_v11 }
 0x2be   :  { %v1029_v23 = vmul.f32 0.125, %v978_v15  ;;  %v1037_v24 = vmul.f32 %v5360_v18, %v5360_v18  ;;  %v1031_v27 = vmul.f32 0.125, %v990_v19  ;;  %v1039_v28 = vmul.f32 %v5362_v20, %v5362_v20 }
 0x2bf   :  { %v1030_v29 = vmul.f32 0.125, %v984_v21  ;;  %v1038_v30 = vmul.f32 %v5364_v22, %v5364_v22  ;;  %v1032_v32 = vmul.f32 0.125, %v996_v25  ;;  %v1040_v33 = vmul.f32 %v5368_v26, %v5368_v26 }
 0x2c0   :  { %v1045_v31 = vsub.f32 %v1029_v23, %v1037_v24  ;;  %v1047_v34 = vsub.f32 %v1031_v27, %v1039_v28  ;;  %v5377_v38 = vsub.s32 4, %v5312_v63  ;;  %v5380_v39 = vsub.s32 6, %v5312_v63 }
 0x2c1   :  { %v1046_v35 = vsub.f32 %v1030_v29, %v1038_v30  ;;  %v1048_v37 = vsub.f32 %v1032_v32, %v1040_v33  ;;  %v5383_v41 = vsub.s32 5, %v5312_v63  ;;  %v5386_v42 = vsub.s32 7, %v5312_v63 }
 0x2c2   :  { %v1053_v36 = vmax.f32 %v1045_v31, 0.0  ;;  %v1055_v40 = vmax.f32 %v1047_v34, 0.0  ;;  %v396_v48 = vrot.slane %v5320_v3, %v5377_v38  ;;  %v404_v49 = vrot.slane %v5320_v3, %v5380_v39 }
 0x2c3   :  { %v1054_v44 = vmax.f32 %v1046_v35, 0.0  ;;  %v1056_v47 = vmax.f32 %v1048_v37, 0.0  ;;  %v400_v51 = vrot.slane %v5320_v3, %v5383_v41  ;;  %v408_v63 = vrot.slane %v5320_v3, %v5386_v42 }
 0x2c4   :  { %v1069_v46 = vadd.f32 1e-05, %v1053_v36  ;;  %v1071_v50 = vadd.f32 1e-05, %v1055_v40  ;;  %v1102_v55 = vrot.slane %v5388_v43, %v5323_v4  ;;  %v1110_v53 = vrot.slane %v5388_v43, %v5326_v5 }
 0x2c5   :  { %v1098_v54 = vrot.slane %v5388_v43, %v5315_v1  ;;  %v1106_v56 = vrot.slane %v5388_v43, %v5318_v2  ;;  %v1061_v57 = vsub.f32 %v5336_v12, %v5360_v18  ;;  %v1063_v3 = vsub.f32 %v5338_v13, %v5362_v20 }
 0x2c6   :  { %v1070_v58 = vadd.f32 1e-05, %v1054_v44  ;;  %v1148_v61 = vrot.slane %v5390_v45, %v5315_v1  ;;  %4347 = vrsqrt.f32 %v1069_v46  ;;  %v1072_v62 = vadd.f32 1e-05, %v1056_v47 }
 0x2c7   :  { %4349 = vrsqrt.f32 %v1071_v50  ;;  %v1062_v10 = vsub.f32 %v5340_v16, %v5364_v22  ;;  %v1064_v12 = vsub.f32 %v5342_v17, %v5368_v26 }
 0x2c8   :  { %4351 = vrsqrt.f32 %v1070_v58 }
 0x2c9   :  { %4353 = vrsqrt.f32 %v1072_v62 }
 0x2cd   :  { %v869_v59 = vpop.f32.mrb[4].mxu0  ;;  %v910_v60 = vpop.f32.mrb[4].mxu1 }
 0x2ce   :  { %v5416_v6 = vadd.f32 %v869_v59, %v396_v48  ;;  %v5418_v7 = vadd.f32 %v910_v60, %v404_v49  ;;  %v871_v8 = vpop.f32.mrb[5].mxu0  ;;  %v912_v9 = vpop.f32.mrb[5].mxu1 }
 0x2cf   :  { %v5422_v11 = vadd.f32 %v871_v8, %v400_v51  ;;  %v5424_v14 = vadd.f32 %v912_v9, %v408_v63  ;;  %v873_v15 = vpop.f32.mrb[6].mxu0  ;;  %v914_v19 = vpop.f32.mrb[6].mxu1 }
 0x2d0   :  { %v941_v21 = vrot.slane %v5416_v6, 4  ;;  %v969_v23 = vmul.f32 %v5416_v6, %v5416_v6  ;;  %v953_v24 = vrot.slane %v5418_v7, 4  ;;  %v971_v25 = vmul.f32 %v5418_v7, %v5418_v7  ;;  %v874_v27 = vpop.f32.mrb[7].mxu0  ;;  %v915_v28 = vpop.f32.mrb[7].mxu1 }
 0x2d1   :  { %v947_v29 = vrot.slane %v5422_v11, 4  ;;  %v970_v30 = vmul.f32 %v5422_v11, %v5422_v11  ;;  %v959_v31 = vrot.slane %v5424_v14, 4  ;;  %v972_v48 = vmul.f32 %v5424_v14, %v5424_v14 }
 0x2d2   :  { %v942_v32 = vadd.f32 %v941_v21, %v5416_v6  ;;  %v997_v33 = vrot.slane %v969_v23, 4  ;;  %v954_v34 = vadd.f32 %v953_v24, %v5418_v7  ;;  %v1009_v35 = vrot.slane %v971_v25, 4  ;;  %v4348_v21 = vpop.eup %4347 }
 0x2d3   :  { %v948_v36 = vadd.f32 %v947_v29, %v5422_v11  ;;  %v1003_v37 = vrot.slane %v970_v30, 4  ;;  %v960_v40 = vadd.f32 %v959_v31, %v5424_v14  ;;  %v1015_v62 = vrot.slane %v972_v48, 4  ;;  %v4350_v29 = vpop.eup %4349 }
 0x2d4   :  { %v943_v44 = vrot.slane %v942_v32, 2  ;;  %v998_v46 = vadd.f32 %v997_v33, %v969_v23  ;;  %v955_v47 = vrot.slane %v954_v34, 2  ;;  %v1010_v49 = vadd.f32 %v1009_v35, %v971_v25 }
 0x2d5   :  { %v949_v50 = vrot.slane %v948_v36, 2  ;;  %v1004_v51 = vadd.f32 %v1003_v37, %v970_v30  ;;  %v961_v63 = vrot.slane %v960_v40, 2  ;;  %v1016_v28 = vadd.f32 %v1015_v62, %v972_v48 }
 0x2d6   :  { %v944_v58 = vadd.f32 %v943_v44, %v942_v32  ;;  %v999_v59 = vrot.slane %v998_v46, 2  ;;  %v956_v60 = vadd.f32 %v955_v47, %v954_v34  ;;  %v1011_v8 = vrot.slane %v1010_v49, 2  ;;  %v4352_v34 = vpop.eup %4351 }
 0x2d7   :  { %v950_v9 = vadd.f32 %v949_v50, %v948_v36  ;;  %v1005_v15 = vrot.slane %v1004_v51, 2  ;;  %v962_v19 = vadd.f32 %v961_v63, %v960_v40  ;;  %v1017_v44 = vrot.slane %v1016_v28, 2  ;;  %v4354_v40 = vpop.eup %4353 }
 0x2d8   :  { %v945_v24 = vrot.slane %v944_v58, 1  ;;  %v1000_v27 = vadd.f32 %v999_v59, %v998_v46  ;;  %v957_v23 = vrot.slane %v956_v60, 1  ;;  %v1012_v31 = vadd.f32 %v1011_v8, %v1010_v49 }
 0x2d9   :  { %v951_v33 = vrot.slane %v950_v9, 1  ;;  %v1006_v25 = vadd.f32 %v1005_v15, %v1004_v51  ;;  %v963_v35 = vrot.slane %v962_v19, 1  ;;  %v1018_v48 = vadd.f32 %v1017_v44, %v1016_v28 }
 0x2da   :  { %v946_v30 = vadd.f32 %v945_v24, %v944_v58  ;;  %v1001_v37 = vrot.slane %v1000_v27, 1  ;;  %v958_v32 = vadd.f32 %v957_v23, %v956_v60  ;;  %v1013_v47 = vrot.slane %v1012_v31, 1 }
 0x2db   :  { %v952_v0 = vadd.f32 %v951_v33, %v950_v9  ;;  %v1007_v36 = vrot.slane %v1006_v25, 1  ;;  %v964_v50 = vadd.f32 %v963_v35, %v962_v19  ;;  %v1085_v60 = vmul.f32 %v4348_v21, %v1061_v57 }
 0x2dc   :  { %v1002_v63 = vadd.f32 %v1001_v37, %v1000_v27  ;;  %v5442_v52 = vmul.f32 0.125, %v946_v30  ;;  %v5444_v46 = vmul.f32 0.125, %v958_v32  ;;  %v1014_v49 = vadd.f32 %v1013_v47, %v1012_v31 }
 0x2dd   :  { %v1008_v59 = vadd.f32 %v1007_v36, %v1006_v25  ;;  %v5446_v51 = vmul.f32 0.125, %v952_v0  ;;  %v5448_v58 = vmul.f32 0.125, %v964_v50  ;;  %v1087_v15 = vmul.f32 %v4350_v29, %v1063_v3 }
 0x2de   :  { %v1033_v62 = vmul.f32 0.125, %v1002_v63  ;;  %v1041_v8 = vmul.f32 %v5442_v52, %v5442_v52  ;;  %v1043_v9 = vmul.f32 %v5444_v46, %v5444_v46  ;;  %v1035_v19 = vmul.f32 0.125, %v1014_v49  ;;  %v4229_v63 = vld [vmem:[#allocation13 + $0x100] sm:$0xff]  }
 0x2df   :  { %v1034_v0 = vmul.f32 0.125, %v1008_v59  ;;  %v1042_v24 = vmul.f32 %v5446_v51, %v5446_v51  ;;  %v1019_v18 = vrot.slane %v1018_v48, 1  ;;  %v1160_v57 = vrot.slane %v5390_v45, %v5326_v5 }
 0x2e0   :  { %v1156_v21 = vrot.slane %v5390_v45, %v5318_v2  ;;  %v1049_v27 = vsub.f32 %v1033_v62, %v1041_v8  ;;  %v1044_v13 = vmul.f32 %v5448_v58, %v5448_v58  ;;  %v1086_v20 = vmul.f32 %v4352_v34, %v1062_v10  ;;  %v4231_v62 = vld [vmem:[#allocation13 + $0x148] sm:$0xff]  }
 0x2e1   :  { %v1050_v23 = vsub.f32 %v1034_v0, %v1042_v24  ;;  %v1051_v3 = vsub.f32 %v1035_v19, %v1043_v9  ;;  %v1020_v28 = vadd.f32 %v1019_v18, %v1018_v48  ;;  %v1088_v29 = vmul.f32 %v4354_v40, %v1064_v12  ;;  %v4232_v9 = vld [vmem:[#allocation13 + $0x1c8] sm:$0xff]   ;;  %v4235_v0 = vld [vmem:[#allocation13 + $0x150] sm:$0xff]  }
 0x2e2   :  { %v1135_v17 = vmul.f32 %v1098_v54, %v1085_v60  ;;  %v1136_v31 = vmul.f32 %v1102_v55, %v1086_v20  ;;  %v1137_v33 = vmul.f32 %v1106_v56, %v1087_v15  ;;  %v1057_v10 = vmax.f32 %v1049_v27, 0.0  ;;  %v4230_v60 = vld [vmem:[#allocation13 + $0x180] sm:$0xff]   ;;  %v4233_v15 = vld [vmem:[#allocation13 + $0x108] sm:$0xff]   ;;  %v4236_v24 = vld [vmem:[#allocation13 + $0x1d0] sm:$0xff]  }
 0x2e3   :  { %v1058_v26 = vmax.f32 %v1050_v23, 0.0  ;;  %v1036_v25 = vmul.f32 0.125, %v1020_v28  ;;  %v1138_v16 = vmul.f32 %v1110_v53, %v1088_v29  ;;  %v5808_v35 = vrot.slane %v5390_v45, %v5323_v4  ;;  %v4234_v19 = vld [vmem:[#allocation13 + $0x188] sm:$0xff]   ;;  %v4237_v18 = vld [vmem:[#allocation13 + $0x110] sm:$0xff]   ;;  %v4239_v23 = vld [vmem:[#allocation13 + $0x158] sm:$0xff]  }
 0x2e4   :  { %v1185_v22 = vadd.f32 %v1148_v61, %v1135_v17  ;;  %v1187_v55 = vadd.f32 %v1156_v21, %v1137_v33  ;;  %v1059_v37 = vmax.f32 %v1051_v3, 0.0  ;;  %v1073_v50 = vadd.f32 1e-05, %v1057_v10  ;;  %v4238_v27 = vld [vmem:[#allocation13 + $0x190] sm:$0xff]  }
 0x2e5   :  { %v1074_v54 = vadd.f32 1e-05, %v1058_v26  ;;  %v1186_v30 = vadd.f32 %v5808_v35, %v1136_v31  ;;  %v1052_v32 = vsub.f32 %v1036_v25, %v1044_v13  ;;  %v1188_v44 = vadd.f32 %v1160_v57, %v1138_v16  ;;  %v4240_v13 = vld [vmem:[#allocation13 + $0x1d8] sm:$0xff]   ;;  %v4243_v31 = vld [vmem:[#allocation13 + $0x160] sm:$0xff]  }
 0x2e6   :  { %v1193_v56 = vmax.f32 %v1185_v22, 0.0  ;;  %v1195_v47 = vmax.f32 %v1187_v55, 0.0  ;;  %v1075_v61 = vadd.f32 1e-05, %v1059_v37  ;;  %v1066_v12 = vsub.f32 %v5422_v11, %v5446_v51  ;;  %v4241_v11 = vld [vmem:[#allocation13 + $0x118] sm:$0xff]   ;;  %v4244_v25 = vld [vmem:[#allocation13 + $0x1e0] sm:$0xff]  }
 0x2e7   :  { %v1194_v34 = vmax.f32 %v1186_v30, 0.0  ;;  %4355 = vrsqrt.f32 %v1074_v54  ;;  %v1060_v36 = vmax.f32 %v1052_v32, 0.0  ;;  %v1196_v53 = vmax.f32 %v1188_v44, 0.0  ;;  %v4242_v26 = vld [vmem:[#allocation13 + $0x198] sm:$0xff]   ;;  %v4245_v35 = vld [vmem:[#allocation13 + $0x120] sm:$0xff]   ;;  %v4247_v44 = vld [vmem:[#allocation13 + $0x168] sm:$0xff]  }
 0x2e8   :  { %v1201_v59 = vpack.c.bf16 %v1193_v56, %v1193_v56  ;;  %v1203_v8 = vpack.c.bf16 %v1195_v47, %v1195_v47  ;;  %v1118_v57 = vrot.slane %v5388_v43, %v5383_v41  ;;  %v1168_v3 = vrot.slane %v5390_v45, %v5383_v41  ;;  %v4246_v32 = vld [vmem:[#allocation13 + $0x1a0] sm:$0xff]   ;;  %v4248_v47 = vld [vmem:[#allocation13 + $0x1e8] sm:$0xff]  }
 0x2e9   :  { %v1202_v40 = vpack.c.bf16 %v1194_v34, %v1194_v34  ;;  %v1076_v48 = vadd.f32 1e-05, %v1060_v36  ;;  %v1204_v49 = vpack.c.bf16 %v1196_v53, %v1196_v53  ;;  %v1068_v28 = vsub.f32 %v5424_v14, %v5448_v58  ;;  %v4250_v53 = vld [vmem:[#allocation13 + $0x1a8] sm:$0xff]  }
 0x2ea   :  { %v1126_v29 = vrot.slane %v5388_v43, %v5386_v42  ;;  %v1176_v10 = vrot.slane %v5390_v45, %v5386_v42  ;;  %v1065_v58 = vsub.f32 %v5416_v6, %v5442_v52  ;;  %v1067_v54 = vsub.f32 %v5418_v7, %v5444_v46  ;;  %v4249_v7 = vld [vmem:[#allocation13 + $0x128] sm:$0xff]  }
 0x2eb   :  { %1760 = vmatprep.mubr.bf16.mxu0 %v1202_v40  ;;  %4357 = vrsqrt.f32 %v1076_v48  ;;  %1800 = vmatprep.mubr.bf16.mxu1 %v1204_v49  ;;  %v1114_v56 = vrot.slane %v5388_v43, %v5377_v38  ;;  %v1122_v6 = vrot.slane %v5388_v43, %v5380_v39  ;;  %v4253_v43 = vld [vmem:[#allocation13 + $0x130] sm:$0xff]  }
 0x2ec   :  { %1761 = vmatmul.mubr.bf16.vlgmr.msra.gmra.mrb[8].mxu0 %v1201_v59  ;;  %4359 = vrsqrt.f32 %v1073_v50  ;;  %1801 = vmatmul.mubr.bf16.vlgmr.msra.gmra.mrb[8].mxu1 %v1203_v8  ;;  %v4251_v50 = vld [vmem:[#allocation13 + $0x170] sm:$0xff]   ;;  %v1172_v59 = vrot.slane %v5390_v45, %v5380_v39 }
 0x2ed   :  { %4035 = vmatpush3.bf16.msra.mxu0 %v4229_v63  ;;  %4361 = vrsqrt.f32 %v1075_v61  ;;  %4057 = vmatpush3.bf16.msra.mxu1 %v4230_v60  ;;  %v1164_v63 = vrot.slane %v5390_v45, %v5377_v38  ;;  %v4252_v61 = vld [vmem:[#allocation13 + $0x1f0] sm:$0xff]  }
 0x2ee   :  { %4036 = vmatprep.subr.bf16.mxu0 %v4231_v62  ;;  %4058 = vmatprep.subr.bf16.mxu1 %v4232_v9  ;;  %v4254_v60 = vld [vmem:[#allocation13 + $0x1b0] sm:$0xff]   ;;  %v4255_v62 = vld [vmem:[#allocation13 + $0x178] sm:$0xff]  }
 0x2ef   :  { %v4256_v9 = vld [vmem:[#allocation13 + $0x1f8] sm:$0xff]  }
 0x2f1   :  { %4037 = vmatpush3.bf16.msra.mxu0 %v4233_v15  ;;  %v4356_v21 = vpop.eup %4355  ;;  %4059 = vmatpush3.bf16.msra.mxu1 %v4234_v19  ;;  %v4257_v19 = vld [vmem:[#allocation13 + $0x138] sm:$0xff]  }
 0x2f2   :  { %4038 = vmatprep.subr.bf16.mxu0 %v4235_v0  ;;  %4060 = vmatprep.subr.bf16.mxu1 %v4236_v24  ;;  %v1090_v20 = vmul.f32 %v4356_v21, %v1066_v12  ;;  %v4258_v0 = vld [vmem:[#allocation13 + $0x1b8] sm:$0xff]   ;;  %v4261_v21 = vld [vmem:[#allocation19 + $0x4] ss:$8 sps:$4 sm:$0xff]  }
 0x2f4   :  { %v1140_v51 = vmul.f32 %v1118_v57, %v1090_v20  ;;  %v5809_v57 = vmov 0   ;;  %v4267_v20 = vld [vmem:[#allocation19 + $0x24] ss:$8 sps:$4 sm:$0xff]  }
 0x2f5   :  { %4039 = vmatpush3.bf16.msra.mxu0 %v4237_v18  ;;  %v4358_v17 = vpop.eup %4357  ;;  %4061 = vmatpush3.bf16.msra.mxu1 %v4238_v27  ;;  %v4259_v27 = vld [vmem:[#allocation19] ss:$8 sps:$4 sm:$0xff]  }
 0x2f6   :  { %4040 = vmatprep.subr.bf16.mxu0 %v4239_v23  ;;  %v4360_v33 = vpop.eup %4359  ;;  %4062 = vmatprep.subr.bf16.mxu1 %v4240_v13  ;;  %v1190_v16 = vadd.f32 %v1168_v3, %v1140_v51  ;;  %v1092_v22 = vmul.f32 %v4358_v17, %v1068_v28  ;;  %v4264_v23 = vld [vmem:[#allocation19 + $0x14] ss:$8 sps:$4 sm:$0xff]   ;;  %v4262_v13 = vld [vmem:[#allocation19 + $0x10] ss:$8 sps:$4 sm:$0xff]   ;;  %v4265_v3 = vld [vmem:[#allocation19 + $0x20] ss:$8 sps:$4 sm:$0xff]  }
 0x2f7   :  { %v4362_v14 = vpop.eup %4361  ;;  %v1089_v37 = vmul.f32 %v4360_v33, %v1065_v58  ;;  %v4270_v28 = vld [vmem:[#allocation19 + $0x34] ss:$8 sps:$4 sm:$0xff]   ;;  %v4273_v51 = vld [vmem:[#allocation19 + $0x44] ss:$8 sps:$4 sm:$0xff]  }
 0x2f8   :  { %v1198_v30 = vmax.f32 %v1190_v16, 0.0  ;;  %v1142_v55 = vmul.f32 %v1126_v29, %v1092_v22  ;;  %v1091_v34 = vmul.f32 %v4362_v14, %v1067_v54  ;;  %v4271_v29 = vld [vmem:[#allocation19 + $0x40] ss:$8 sps:$4 sm:$0xff]   ;;  %v4276_v17 = vld [vmem:[#allocation19 + $0x54] ss:$8 sps:$4 sm:$0xff]  }
 0x2f9   :  { %4041 = vmatpush3.bf16.msra.mxu0 %v4241_v11  ;;  %4063 = vmatpush3.bf16.msra.mxu1 %v4242_v26  ;;  %v1139_v40 = vmul.f32 %v1114_v56, %v1089_v37  ;;  %v4268_v11 = vld [vmem:[#allocation19 + $0x30] ss:$8 sps:$4 sm:$0xff]   ;;  %v4279_v33 = vld [vmem:[#allocation19 + $0x64] ss:$8 sps:$4 sm:$0xff]  }
 0x2fa   :  { %4042 = vmatprep.subr.bf16.mxu0 %v4243_v31  ;;  %4064 = vmatprep.subr.bf16.mxu1 %v4244_v25  ;;  %v1206_v36 = vpack.c.bf16 %v1198_v30, %v1198_v30  ;;  %v1192_v52 = vadd.f32 %v1176_v10, %v1142_v55  ;;  %v1141_v49 = vmul.f32 %v1122_v6, %v1091_v34  ;;  %v4274_v26 = vld [vmem:[#allocation19 + $0x50] ss:$8 sps:$4 sm:$0xff]   ;;  %v4277_v31 = vld [vmem:[#allocation19 + $0x60] ss:$8 sps:$4 sm:$0xff]   ;;  %v4282_v25 = vld [vmem:[#allocation19 + $0x74] ss:$8 sps:$4 sm:$0xff]  }
 0x2fb   :  { %v1189_v8 = vadd.f32 %v1164_v63, %v1139_v40  ;;  %v4280_v16 = vld [vmem:[#allocation19 + $0x70] ss:$8 sps:$4 sm:$0xff]   ;;  %v2087_v22 = vld [vmem:[#allocation22] sm:$0xff] }
 0x2fc   :  { %1840 = vmatprep.mubr.bf16.mxu0 %v1206_v36  ;;  %v1200_v46 = vmax.f32 %v1192_v52, 0.0  ;;  %v1191_v15 = vadd.f32 %v1172_v59, %v1141_v49  ;;  %v2091_v10 = vld [vmem:[#allocation22 + $0x20] sm:$0xff]  ;;  %v5517_v14 = vld [vmem:[#allocation22 + $0x8] sm:$0xff]  ;;  %v3778_v36 = vld [vmem:[#allocation14] ss:$0 sm:$0xff] }
 0x2fd   :  { %4043 = vmatpush3.bf16.msra.mxu0 %v4245_v35  ;;  %4065 = vmatpush3.bf16.msra.mxu1 %v4246_v32  ;;  %v1197_v24 = vmax.f32 %v1189_v8, 0.0  ;;  %v3861_v58 = vcombine.low %v2087_v22, %v2091_v10  ;;  %v3862_v54 = vcombine.high %v2087_v22, %v2091_v10  ;;  %v5519_v35 = vld [vmem:[#allocation22 + $0x28] sm:$0xff]  ;;  %v2095_v30 = vld [vmem:[#allocation22 + $0x40] sm:$0xff] }
 0x2fe   :  { %4044 = vmatprep.subr.bf16.mxu0 %v4247_v44  ;;  %4066 = vmatprep.subr.bf16.mxu1 %v4248_v47  ;;  %v1208_v48 = vpack.c.bf16 %v1200_v46, %v1200_v46  ;;  %v1199_v12 = vmax.f32 %v1191_v15, 0.0  ;;  %v2099_v55 = vld [vmem:[#allocation22 + $0x60] sm:$0xff]  ;;  %v3863_v37 = vcombine.low %v5517_v14, %v5519_v35  ;;  %v3864_v32 = vcombine.high %v5517_v14, %v5519_v35  ;;  %v2112_v14 = vld [vmem:[#allocation22 + $0xc8] sm:$0xff] }
 0x2ff   :  { %v1205_v45 = vpack.c.bf16 %v1197_v24, %v1197_v24  ;;  %v3870_v44 = vcombine.high %v2095_v30, %v2099_v55  ;;  %v3869_v56 = vcombine.low %v2095_v30, %v2099_v55  ;;  %v3844_v55 = vld [vmem:[#allocation17] ss:$0 sm:$0xff] }
 0x300   :  { %1880 = vmatprep.mubr.bf16.mxu1 %v1208_v48  ;;  %v1207_v18 = vpack.c.bf16 %v1199_v12, %v1199_v12 }
 0x301   :  { %4045 = vmatpush3.bf16.msra.mxu0 %v4249_v7  ;;  %4067 = vmatpush3.bf16.msra.mxu1 %v4250_v53 }
 0x302   :  { %4046 = vmatprep.subr.bf16.mxu0 %v4251_v50  ;;  %4068 = vmatprep.subr.bf16.mxu1 %v4252_v61 }
 0x305   :  { %4047 = vmatpush3.bf16.msra.mxu0 %v4253_v43  ;;  %4069 = vmatpush3.bf16.msra.mxu1 %v4254_v60 }
 0x306   :  { %4048 = vmatprep.subr.bf16.mxu0 %v4255_v62  ;;  %4070 = vmatprep.subr.bf16.mxu1 %v4256_v9 }
 0x309   :  { %4049 = vmatpush3.bf16.msra.mxu0 %v4257_v19  ;;  %4071 = vmatpush3.bf16.msra.mxu1 %v4258_v0 }
 0x30a   :  { %2037 = vmatprep.subr.bf16.mxu0 %v4261_v21  ;;  %2513 = vmatprep.subr.bf16.mxu1 %v3862_v54  ;;  %v3843_v54 = vld [vmem:[#allocation16] ss:$0 sm:$0xff] }
 0x30c   :  { %1841 = vmatmul.mubr.bf16.vlgmr.msra.gmra.mrb[12].mxu0 %v1205_v45  ;;  %1881 = vmatmul.mubr.bf16.vlgmr.msra.gmra.mrb[12].mxu1 %v1207_v18 }
 0x30d   :  { %2069 = vmatprep.mubr.bf16.mxu0 %v5809_v57  ;;  %2545 = vmatprep.mubr.bf16.mxu1 %v5809_v57 }
 0x30e   :  { %2038 = vmatpush1.bf16.msra.mxu0 %v4259_v27  ;;  %2514 = vmatpush1.bf16.msra.mxu1 %v3861_v58 }
 0x30f   :  { %2039 = vmatprep.subr.bf16.mxu0 %v4264_v23  ;;  %2515 = vmatprep.subr.bf16.mxu1 %v3870_v44 }
 0x312   :  { %2040 = vmatpush1.bf16.msra.mxu0 %v4262_v13  ;;  %2516 = vmatpush1.bf16.msra.mxu1 %v3869_v56  ;;  %v2096_v56 = vld [vmem:[#allocation22 + $0x48] sm:$0xff] }
 0x313   :  { %2041 = vmatprep.subr.bf16.mxu0 %v4267_v20 }
 0x316   :  { %2042 = vmatpush1.bf16.msra.mxu0 %v4265_v3 }
 0x317   :  { %2043 = vmatprep.subr.bf16.mxu0 %v4270_v28 }
 0x31a   :  { %2044 = vmatpush1.bf16.msra.mxu0 %v4268_v11 }
 0x31b   :  { %2045 = vmatprep.subr.bf16.mxu0 %v4273_v51 }
 0x31e   :  { %2046 = vmatpush1.bf16.msra.mxu0 %v4271_v29 }
 0x31f   :  { %2047 = vmatprep.subr.bf16.mxu0 %v4276_v17 }
 0x322   :  { %2048 = vmatpush1.bf16.msra.mxu0 %v4274_v26 }
 0x323   :  { %2049 = vmatprep.subr.bf16.mxu0 %v4279_v33 }
 0x326   :  { %2050 = vmatpush1.bf16.msra.mxu0 %v4277_v31 }
 0x327   :  { %2051 = vmatprep.subr.bf16.mxu0 %v4282_v25 }
 0x32a   :  { %2052 = vmatpush1.bf16.msra.mxu0 %v4280_v16 }
 0x32b   :  { %2554 = vmatprep.subr.bf16.mxu0 %v3864_v32 }
 0x3bf   :  { %v4006_v34 = vpop.f32.mrb[8].mxu0  ;;  %v4028_v47 = vpop.f32.mrb[8].mxu1 }
 0x3c0   :  { %v4007_v52 = vpop.f32.mrb[9].mxu0  ;;  %v4029_v7 = vpop.f32.mrb[9].mxu1 }
 0x3c1   :  { %v4008_v6 = vadd.f32 %v4007_v52, %v4006_v34  ;;  %v4009_v46 = vpop.f32.mrb[10].mxu0  ;;  %v4030_v53 = vadd.f32 %v4029_v7, %v4028_v47  ;;  %v4031_v50 = vpop.f32.mrb[10].mxu1  ;;  %v2100_v34 = vld [vmem:[#allocation22 + $0x68] sm:$0xff]  ;;  %v2103_v7 = vld [vmem:[#allocation22 + $0x80] sm:$0xff] }
 0x3c2   :  { %v4010_v40 = vpop.f32.mrb[11].mxu0  ;;  %v4032_v61 = vpop.f32.mrb[11].mxu1  ;;  %v3872_v52 = vcombine.high %v2096_v56, %v2100_v34  ;;  %v2107_v46 = vld [vmem:[#allocation22 + $0xa0] sm:$0xff] }
 0x3c3   :  { %v1763_v63 = vadd.f32 %v4008_v6, %v3778_v36  ;;  %v3871_v6 = vcombine.low %v2096_v56, %v2100_v34  ;;  %v3878_v50 = vcombine.high %v2103_v7, %v2107_v46  ;;  %v2108_v40 = vld [vmem:[#allocation22 + $0xa8] sm:$0xff] }
 0x3c5   :  { %v1803_v48 = vadd.f32 %v4030_v53, %v1763_v63  ;;  %v2104_v53 = vld [vmem:[#allocation22 + $0x88] sm:$0xff]  ;;  %v3877_v63 = vcombine.low %v2103_v7, %v2107_v46  ;;  %2517 = vmatprep.subr.bf16.mxu1 %v3878_v50  ;;  %v1945_v46 = vld [vmem:[#allocation20] sm:$0x3] }
 0x3c6   :  { %v3879_v61 = vcombine.low %v2104_v53, %v2108_v40  ;;  %v1954_v50 = vrot.slane %v1945_v46, %v5323_v4 }
 0x3c7   :  { %2518 = vmatpush1.bf16.msra.mxu1 %v3877_v63 }
 0x3df   :  { %v4050_v49 = vpop.f32.mrb[12].mxu0  ;;  %v4072_v59 = vpop.f32.mrb[12].mxu1 }
 0x3e0   :  { %v4051_v43 = vpop.f32.mrb[13].mxu0  ;;  %v4073_v62 = vpop.f32.mrb[13].mxu1 }
 0x3e1   :  { %v4052_v60 = vadd.f32 %v4051_v43, %v4050_v49  ;;  %v4053_v8 = vpop.f32.mrb[14].mxu0  ;;  %v4074_v9 = vadd.f32 %v4073_v62, %v4072_v59  ;;  %v4075_v15 = vpop.f32.mrb[14].mxu1  ;;  %v2111_v49 = vld [vmem:[#allocation22 + $0xc0] sm:$0xff] }
 0x3e2   :  { %v4054_v19 = vpop.f32.mrb[15].mxu0  ;;  %v4076_v24 = vpop.f32.mrb[15].mxu1  ;;  %v2115_v59 = vld [vmem:[#allocation22 + $0xe0] sm:$0xff]  ;;  %v2120_v15 = vld [vmem:[#allocation22 + $0x108] sm:$0xff] }
 0x3e3   :  { %v1843_v0 = vadd.f32 %v4052_v60, %v1803_v48  ;;  %v3880_v48 = vcombine.high %v2104_v53, %v2108_v40  ;;  %v3886_v35 = vcombine.high %v2111_v49, %v2115_v59  ;;  %v3885_v43 = vcombine.low %v2111_v49, %v2115_v59  ;;  %v2119_v8 = vld [vmem:[#allocation22 + $0x100] sm:$0xff] }
 0x3e4   :  { %v1950_v53 = vrot.slane %v1945_v46, %v5315_v1  ;;  %v2138_v46 = vld [vmem:[#allocation22 + $0x198] sm:$0xff] }
 0x3e5   :  { %v1883_v12 = vadd.f32 %v4074_v9, %v1843_v0  ;;  %2519 = vmatprep.subr.bf16.mxu1 %v3886_v35  ;;  %v2123_v9 = vld [vmem:[#allocation22 + $0x120] sm:$0xff]  ;;  %v2124_v0 = vld [vmem:[#allocation22 + $0x128] sm:$0xff] }
 0x3e6   :  { %2520 = vmatpush1.bf16.msra.mxu1 %v3885_v43  ;;  %v3894_v19 = vcombine.high %v2119_v8, %v2123_v9  ;;  %v3893_v24 = vcombine.low %v2119_v8, %v2123_v9  ;;  %v2101_v8 = vld [vmem:[#allocation22 + $0x70] sm:$0xff]  ;;  %v2098_v9 = vld [vmem:[#allocation22 + $0x58] sm:$0xff] }
 0x3e7   :  { %v1888_v45 = vrot.slane %v1883_v12, 4  ;;  %v1894_v18 = vmul.f32 %v1883_v12, %v1883_v12 }
 0x3e8   :  { %2521 = vmatprep.subr.bf16.mxu1 %v3894_v19 }
 0x3e9   :  { %v1889_v21 = vadd.f32 %v1888_v45, %v1883_v12  ;;  %v1895_v27 = vrot.slane %v1894_v18, 4  ;;  %v3896_v45 = vcombine.high %v2120_v15, %v2124_v0 }
 0x3ea   :  { %2522 = vmatpush1.bf16.msra.mxu1 %v3893_v24 }
 0x3eb   :  { %v1890_v23 = vrot.slane %v1889_v21, 2  ;;  %v1896_v13 = vadd.f32 %v1895_v27, %v1894_v18  ;;  %v2127_v18 = vld [vmem:[#allocation22 + $0x140] sm:$0xff]  ;;  %v2128_v27 = vld [vmem:[#allocation22 + $0x148] sm:$0xff] }
 0x3ed   :  { %v1891_v20 = vadd.f32 %v1890_v23, %v1889_v21  ;;  %v1897_v3 = vrot.slane %v1896_v13, 2  ;;  %v2131_v21 = vld [vmem:[#allocation22 + $0x160] sm:$0xff] }
 0x3ee   :  { %v3902_v23 = vcombine.high %v2127_v18, %v2131_v21 }
 0x3ef   :  { %v1892_v28 = vrot.slane %v1891_v20, 1  ;;  %v1898_v11 = vadd.f32 %v1897_v3, %v1896_v13  ;;  %v2132_v13 = vld [vmem:[#allocation22 + $0x168] sm:$0xff]  ;;  %v2139_v3 = vld [vmem:[#allocation22 + $0x1a0] sm:$0xff] }
 0x3f0   :  { %2523 = vmatprep.subr.bf16.mxu1 %v3902_v23 }
 0x3f1   :  { %v1893_v51 = vadd.f32 %v1892_v28, %v1891_v20  ;;  %v1899_v29 = vrot.slane %v1898_v11, 1  ;;  %v2135_v20 = vld [vmem:[#allocation22 + $0x180] sm:$0xff]  ;;  %v3901_v28 = vcombine.low %v2127_v18, %v2131_v21  ;;  %v2109_v18 = vld [vmem:[#allocation22 + $0xb0] sm:$0xff]  ;;  %v2106_v21 = vld [vmem:[#allocation22 + $0x98] sm:$0xff] }
 0x3f3   :  { %v1900_v17 = vadd.f32 %v1899_v29, %v1898_v11  ;;  %v1901_v26 = vmul.f32 0.125, %v1893_v51  ;;  %v3904_v11 = vcombine.high %v2128_v27, %v2132_v13  ;;  %v2136_v51 = vld [vmem:[#allocation22 + $0x188] sm:$0xff]  ;;  %2524 = vmatpush1.bf16.msra.mxu1 %v3901_v28  ;;  %v2113_v28 = vld [vmem:[#allocation22 + $0xd0] sm:$0xff] }
 0x3f4   :  { %v2140_v29 = vld [vmem:[#allocation22 + $0x1a8] sm:$0xff] }
 0x3f5   :  { %v1902_v31 = vmul.f32 0.125, %v1900_v17  ;;  %v1903_v33 = vmul.f32 %v1901_v26, %v1901_v26  ;;  %v1906_v10 = vsub.f32 %v1883_v12, %v1901_v26  ;;  %v3895_v12 = vcombine.low %v2120_v15, %v2124_v0  ;;  %v2102_v15 = vld [vmem:[#allocation22 + $0x78] sm:$0xff] }
 0x3f6   :  { %v3903_v17 = vcombine.low %v2128_v27, %v2132_v13  ;;  %v3910_v26 = vcombine.high %v2135_v20, %v2139_v3  ;;  %v3911_v56 = vcombine.low %v2136_v51, %v2140_v29  ;;  %v2110_v27 = vld [vmem:[#allocation22 + $0xb8] sm:$0xff]  ;;  %v3875_v13 = vcombine.low %v2098_v9, %v2102_v15 }
 0x3f7   :  { %v1904_v25 = vsub.f32 %v1902_v31, %v1903_v33  ;;  %v2143_v31 = vld [vmem:[#allocation22 + $0x1c0] sm:$0xff] }
 0x3f8   :  { %v2147_v33 = vld [vmem:[#allocation22 + $0x1e0] sm:$0xff]  ;;  %2525 = vmatprep.subr.bf16.mxu1 %v3910_v26  ;;  %v3883_v26 = vcombine.low %v2106_v21, %v2110_v27 }
 0x3f9   :  { %v1905_v16 = vmax.f32 %v1904_v25, 0.0  ;;  %v3912_v25 = vcombine.high %v2136_v51, %v2140_v29  ;;  %v3918_v34 = vcombine.high %v2143_v31, %v2147_v33  ;;  %v2114_v51 = vld [vmem:[#allocation22 + $0xd8] sm:$0xff] }
 0x3fa   :  { %v2118_v29 = vld [vmem:[#allocation22 + $0xf8] sm:$0xff] }
 0x3fb   :  { %v1907_v22 = vadd.f32 1e-05, %v1905_v16  ;;  %v2089_v16 = vld [vmem:[#allocation22 + $0x10] sm:$0xff] }
 0x3fd   :  { %4363 = vrsqrt.f32 %v1907_v22  ;;  %v2093_v22 = vld [vmem:[#allocation22 + $0x30] sm:$0xff] }
 0x407   :  { %v4364_v58 = vpop.eup %4363 }
 0x408   :  { %v1909_v30 = vmul.f32 %v4364_v58, %v1906_v10  ;;  %v2090_v10 = vld [vmem:[#allocation22 + $0x18] sm:$0xff]  ;;  %v2144_v58 = vld [vmem:[#allocation22 + $0x1c8] sm:$0xff] }
 0x40a   :  { %v1917_v32 = vmul.f32 %v3843_v54, %v1909_v30  ;;  %v2148_v54 = vld [vmem:[#allocation22 + $0x1e8] sm:$0xff]  ;;  %v3865_v30 = vcombine.low %v2089_v16, %v2093_v22 }
 0x40c   :  { %v1925_v44 = vadd.f32 %v3844_v55, %v1917_v32  ;;  %v2094_v55 = vld [vmem:[#allocation22 + $0x38] sm:$0xff]  ;;  %v3909_v32 = vcombine.low %v2135_v20, %v2139_v3  ;;  %v3884_v3 = vcombine.high %v2106_v21, %v2110_v27  ;;  %v4290_v21 = vld [vmem:[#allocation28 + $0x88] sm:$0xff]   ;;  %v4291_v27 = vld [vmem:[#allocation28 + $0x50] sm:$0xff]  }
 0x40d   :  { %v3868_v7 = vcombine.high %v2090_v10, %v2094_v55 }
 0x40e   :  { %v1926_v47 = vmax.f32 %v1925_v44, 0.0  ;;  %v3867_v44 = vcombine.low %v2090_v10, %v2094_v55  ;;  %2526 = vmatpush1.bf16.msra.mxu1 %v3909_v32  ;;  %v2126_v10 = vld [vmem:[#allocation22 + $0x138] sm:$0xff]  ;;  %v2129_v55 = vld [vmem:[#allocation22 + $0x150] sm:$0xff] }
 0x40f   :  { %2527 = vmatprep.subr.bf16.mxu1 %v3918_v34  ;;  %v2133_v32 = vld [vmem:[#allocation22 + $0x170] sm:$0xff] }
 0x410   :  { %v1928_v36 = vpack.c.bf16 %v1926_v47, %v1926_v47  ;;  %1927 = vst [vmem:[#allocation31] sm:$0xff] %v1926_v47  ;;  %v3920_v47 = vcombine.high %v2144_v58, %v2148_v54 }
 0x412   :  { %2070 = vmatmul.mubr.bf16.vlgmr.msra.gmra.mrb[16].mxu0 %v1928_v36  ;;  %v3917_v36 = vcombine.low %v2143_v31, %v2147_v33  ;;  %v3892_v33 = vcombine.high %v2114_v51, %v2118_v29 }
 0x413   :  { %2555 = vmatpush1.bf16.msra.mxu0 %v3863_v37  ;;  %2586 = vmatprep.mubr.bf16.mxu0 %v5809_v57  ;;  %v2116_v37 = vld [vmem:[#allocation22 + $0xe8] sm:$0xff] }
 0x414   :  { %2556 = vmatprep.subr.bf16.mxu0 %v3872_v52  ;;  %v3887_v60 = vcombine.low %v2112_v14, %v2116_v37  ;;  %v3888_v62 = vcombine.high %v2112_v14, %v2116_v37  ;;  %v3919_v52 = vcombine.low %v2144_v58, %v2148_v54  ;;  %2528 = vmatpush1.bf16.msra.mxu1 %v3917_v36  ;;  %v2080_v37 = vld [vmem:[#allocation5] sm:$0xff] }
 0x415   :  { %v3891_v54 = vcombine.low %v2114_v51, %v2118_v29  ;;  %v3906_v36 = vcombine.high %v2129_v55, %v2133_v32  ;;  %v4299_v51 = vld [vmem:[#allocation28 + $0x60] sm:$0xff]  }
 0x416   :  { %v4300_v29 = vld [vmem:[#allocation28 + $0xe0] sm:$0xff]  }
 0x417   :  { %2557 = vmatpush1.bf16.msra.mxu0 %v3871_v6  ;;  %v3866_v6 = vcombine.high %v2089_v16, %v2093_v22  ;;  %v2125_v16 = vld [vmem:[#allocation22 + $0x130] sm:$0xff]  ;;  %v2122_v22 = vld [vmem:[#allocation22 + $0x118] sm:$0xff] }
 0x418   :  { %2558 = vmatprep.subr.bf16.mxu0 %v3880_v48 }
 0x419   :  { %2595 = vmatprep.subr.bf16.mxu1 %v3866_v6  ;;  %v2137_v6 = vld [vmem:[#allocation22 + $0x190] sm:$0xff] }
 0x41b   :  { %2559 = vmatpush1.bf16.msra.mxu0 %v3879_v61 }
 0x41c   :  { %2560 = vmatprep.subr.bf16.mxu0 %v3888_v62  ;;  %v2097_v62 = vld [vmem:[#allocation22 + $0x50] sm:$0xff] }
 0x41d   :  { %v3874_v24 = vcombine.high %v2097_v62, %v2101_v8  ;;  %v3873_v23 = vcombine.low %v2097_v62, %v2101_v8 }
 0x41f   :  { %2561 = vmatpush1.bf16.msra.mxu0 %v3887_v60 }
 0x420   :  { %2562 = vmatprep.subr.bf16.mxu0 %v3896_v45  ;;  %v2105_v45 = vld [vmem:[#allocation22 + $0x90] sm:$0xff] }
 0x421   :  { %v3882_v20 = vcombine.high %v2105_v45, %v2109_v18 }
 0x423   :  { %2563 = vmatpush1.bf16.msra.mxu0 %v3895_v12  ;;  %v3876_v12 = vcombine.high %v2098_v9, %v2102_v15  ;;  %v4283_v9 = vld [vmem:[#allocation28 + $0x40] sm:$0xff]  }
 0x424   :  { %2564 = vmatprep.subr.bf16.mxu0 %v3904_v11  ;;  %v2117_v11 = vld [vmem:[#allocation22 + $0xf0] sm:$0xff]  ;;  %v4284_v15 = vld [vmem:[#allocation28 + $0xc0] sm:$0xff]  }
 0x425   :  { %v3890_v31 = vcombine.high %v2113_v28, %v2117_v11  ;;  %v3889_v58 = vcombine.low %v2113_v28, %v2117_v11  ;;  %v4297_v28 = vld [vmem:[#allocation28 + $0x18] sm:$0xff]  }
 0x426   :  { %v4298_v11 = vld [vmem:[#allocation28 + $0x98] sm:$0xff]  }
 0x427   :  { %2565 = vmatpush1.bf16.msra.mxu0 %v3903_v17  ;;  %v3881_v17 = vcombine.low %v2105_v45, %v2109_v18  ;;  %v4288_v45 = vld [vmem:[#allocation28 + $0xc8] sm:$0xff]  }
 0x428   :  { %2566 = vmatprep.subr.bf16.mxu0 %v3912_v25  ;;  %v2121_v25 = vld [vmem:[#allocation22 + $0x110] sm:$0xff]  ;;  %v4289_v18 = vld [vmem:[#allocation28 + $0x8] sm:$0xff]  }
 0x429   :  { %v3897_v34 = vcombine.low %v2121_v25, %v2125_v16 }
 0x42b   :  { %2567 = vmatpush1.bf16.msra.mxu0 %v3911_v56  ;;  %v2134_v56 = vld [vmem:[#allocation22 + $0x178] sm:$0xff] }
 0x42c   :  { %2568 = vmatprep.subr.bf16.mxu0 %v3920_v47  ;;  %v3899_v47 = vcombine.low %v2122_v22, %v2126_v10 }
 0x42f   :  { %2569 = vmatpush1.bf16.msra.mxu0 %v3919_v52 }
 0x430   :  { %2636 = vmatprep.subr.bf16.mxu0 %v3868_v7  ;;  %v2141_v7 = vld [vmem:[#allocation22 + $0x1b0] sm:$0xff] }
 0x4e5   :  { %v2071_v40 = vpop.f32.mrb[16].mxu0 }
 0x4e6   :  { %v2072_v63 = vadd.f32 %v2071_v40, %v1950_v53  ;;  %v2073_v61 = vpop.f32.mrb[17].mxu0  ;;  %v2142_v53 = vld [vmem:[#allocation22 + $0x1b8] sm:$0xff] }
 0x4e7   :  { %v2074_v48 = vadd.f32 %v2073_v61, %v1954_v50  ;;  %v2075_v49 = vpop.f32.mrb[18].mxu0  ;;  %v3905_v50 = vcombine.low %v2129_v55, %v2133_v32  ;;  %v3916_v61 = vcombine.high %v2138_v46, %v2142_v53  ;;  %v4313_v55 = vld [vmem:[#allocation28 + $0x38] sm:$0xff]  }
 0x4e8   :  { %2078 = vst [vmem:[#allocation32] sm:$0xff] %v2072_v63  ;;  %v2076_v59 = vpop.f32.mrb[19].mxu0  ;;  %v2149_v49 = vld [vmem:[#allocation22 + $0x1f0] sm:$0xff] }
 0x4e9   :  { %2079 = vst [vmem:[#allocation34] sm:$0xff] %v2074_v48  ;;  %v2081_v14 = vmul.f32 0.5, %v2074_v48  ;;  %v2145_v48 = vld [vmem:[#allocation22 + $0x1d0] sm:$0xff]  ;;  %v2146_v59 = vld [vmem:[#allocation22 + $0x1d8] sm:$0xff] }
 0x4ea   :  { %v3921_v62 = vcombine.low %v2145_v48, %v2149_v49  ;;  %v4314_v32 = vld [vmem:[#allocation28 + $0xb8] sm:$0xff]  }
 0x4eb   :  { %v2082_v35 = vmul.f32 1.442695, %v2081_v14  ;;  %v2150_v14 = vld [vmem:[#allocation22 + $0x1f8] sm:$0xff] }
 0x4ec   :  { %v3923_v8 = vcombine.low %v2146_v59, %v2150_v14 }
 0x4ed   :  { %4365 = vpow2.f32 %v2082_v35  ;;  %v3913_v35 = vcombine.low %v2137_v6, %v2141_v7 }
 0x4f7   :  { %v4366_v43 = vpop.eup %4365 }
 0x4f8   :  { %v2084_v60 = vmul.f32 %v4366_v43, %v2080_v37  ;;  %v3915_v37 = vcombine.low %v2138_v46, %v2142_v53  ;;  %v3922_v43 = vcombine.high %v2145_v48, %v2149_v49 }
 0x4fa   :  { %v2085_v19 = vadd.f32 %v2084_v60, %v2072_v63  ;;  %v3914_v63 = vcombine.high %v2137_v6, %v2141_v7  ;;  %v3924_v60 = vcombine.high %v2146_v59, %v2150_v14 }
 0x4fc   :  { %v5531_v0 = vpack.c.bf16 %v2085_v19, %v2085_v19  ;;  %v4285_v19 = vld [vmem:[#allocation28] sm:$0xff]  }
 0x4fe   :  { %2546 = vmatmul.mubr.bf16.vlgmr.msra.gmra.mrb[16].mxu1 %v5531_v0  ;;  %2587 = vmatmul.mubr.bf16.vlgmr.msra.gmra.mrb[20].mxu0 %v5531_v0 }
 0x4ff   :  { %2596 = vmatpush1.bf16.msra.mxu1 %v3865_v30  ;;  %2637 = vmatpush1.bf16.msra.mxu0 %v3867_v44  ;;  %v3898_v30 = vcombine.high %v2121_v25, %v2125_v16  ;;  %v2130_v44 = vld [vmem:[#allocation22 + $0x158] sm:$0xff]  ;;  %v4305_v25 = vld [vmem:[#allocation28 + $0x28] sm:$0xff]  }
 0x500   :  { %2597 = vmatprep.subr.bf16.mxu1 %v3874_v24  ;;  %2638 = vmatprep.subr.bf16.mxu0 %v3876_v12  ;;  %v3908_v52 = vcombine.high %v2130_v44, %v2134_v56  ;;  %v3907_v40 = vcombine.low %v2130_v44, %v2134_v56  ;;  %v4286_v24 = vld [vmem:[#allocation28 + $0x80] sm:$0xff]   ;;  %v4287_v12 = vld [vmem:[#allocation28 + $0x48] sm:$0xff]  }
 0x501   :  { %2627 = vmatprep.mubr.bf16.mxu1 %v5809_v57  ;;  %2668 = vmatprep.mubr.bf16.mxu0 %v5809_v57  ;;  %v3900_v57 = vcombine.high %v2122_v22, %v2126_v10  ;;  %v4306_v16 = vld [vmem:[#allocation28 + $0xa8] sm:$0xff]   ;;  %v4307_v22 = vld [vmem:[#allocation28 + $0x70] sm:$0xff]   ;;  %v4315_v44 = vld [vmem:[#allocation28 + $0x140] sm:$0xff]  }
 0x502   :  { %v4308_v10 = vld [vmem:[#allocation28 + $0xf0] sm:$0xff]   ;;  %v4316_v56 = vld [vmem:[#allocation28 + $0x1c0] sm:$0xff]  }
 0x503   :  { %2598 = vmatpush1.bf16.msra.mxu1 %v3873_v23  ;;  %2639 = vmatpush1.bf16.msra.mxu0 %v3875_v13  ;;  %v4292_v23 = vld [vmem:[#allocation28 + $0xd0] sm:$0xff]  }
 0x504   :  { %2599 = vmatprep.subr.bf16.mxu1 %v3882_v20  ;;  %2640 = vmatprep.subr.bf16.mxu0 %v3884_v3  ;;  %v4293_v13 = vld [vmem:[#allocation28 + $0x10] sm:$0xff]   ;;  %v4295_v20 = vld [vmem:[#allocation28 + $0x58] sm:$0xff]  }
 0x505   :  { %v4296_v3 = vld [vmem:[#allocation28 + $0xd8] sm:$0xff]  }
 0x507   :  { %2600 = vmatpush1.bf16.msra.mxu1 %v3881_v17  ;;  %2641 = vmatpush1.bf16.msra.mxu0 %v3883_v26  ;;  %v4301_v17 = vld [vmem:[#allocation28 + $0x20] sm:$0xff]  }
 0x508   :  { %2601 = vmatprep.subr.bf16.mxu1 %v3890_v31  ;;  %2642 = vmatprep.subr.bf16.mxu0 %v3892_v33  ;;  %v4302_v26 = vld [vmem:[#allocation28 + $0xa0] sm:$0xff]   ;;  %v4303_v31 = vld [vmem:[#allocation28 + $0x68] sm:$0xff]  }
 0x509   :  { %v4304_v33 = vld [vmem:[#allocation28 + $0xe8] sm:$0xff]  }
 0x50b   :  { %2602 = vmatpush1.bf16.msra.mxu1 %v3889_v58  ;;  %2643 = vmatpush1.bf16.msra.mxu0 %v3891_v54  ;;  %v4309_v58 = vld [vmem:[#allocation28 + $0x30] sm:$0xff]  }
 0x50c   :  { %2603 = vmatprep.subr.bf16.mxu1 %v3898_v30  ;;  %2644 = vmatprep.subr.bf16.mxu0 %v3900_v57  ;;  %v4310_v54 = vld [vmem:[#allocation28 + $0xb0] sm:$0xff]   ;;  %v4311_v30 = vld [vmem:[#allocation28 + $0x78] sm:$0xff]  }
 0x50d   :  { %v4312_v57 = vld [vmem:[#allocation28 + $0xf8] sm:$0xff]  }
 0x50f   :  { %2604 = vmatpush1.bf16.msra.mxu1 %v3897_v34  ;;  %2645 = vmatpush1.bf16.msra.mxu0 %v3899_v47  ;;  %v5539_v34 = vld [vmem:[#allocation23] sm:$0xff] }
 0x510   :  { %2605 = vmatprep.subr.bf16.mxu1 %v3906_v36  ;;  %2646 = vmatprep.subr.bf16.mxu0 %v3908_v52  ;;  %v2156_v47 = vrot.slane %v5539_v34, %v5315_v1  ;;  %v2164_v36 = vrot.slane %v5539_v34, %v5318_v2  ;;  %v2160_v52 = vrot.slane %v5539_v34, %v5323_v4 }
 0x511   :  { %v2168_v6 = vrot.slane %v5539_v34, %v5326_v5 }
 0x513   :  { %2606 = vmatpush1.bf16.msra.mxu1 %v3905_v50  ;;  %2647 = vmatpush1.bf16.msra.mxu0 %v3907_v40 }
 0x514   :  { %2607 = vmatprep.subr.bf16.mxu1 %v3914_v63  ;;  %2648 = vmatprep.subr.bf16.mxu0 %v3916_v61 }
 0x517   :  { %2608 = vmatpush1.bf16.msra.mxu1 %v3913_v35  ;;  %2649 = vmatpush1.bf16.msra.mxu0 %v3915_v37 }
 0x518   :  { %2609 = vmatprep.subr.bf16.mxu1 %v3922_v43  ;;  %2650 = vmatprep.subr.bf16.mxu0 %v3924_v60 }
 0x51b   :  { %2610 = vmatpush1.bf16.msra.mxu1 %v3921_v62  ;;  %2651 = vmatpush1.bf16.msra.mxu0 %v3923_v8 }
 0x51c   :  { %4078 = vmatprep.subr.bf16.mxu1 %v4283_v9  ;;  %4100 = vmatprep.subr.bf16.mxu0 %v4284_v15 }
 0x51e   :  { %2628 = vmatmul.mubr.bf16.vlgmr.msra.gmra.mrb[20].mxu1 %v5531_v0  ;;  %2669 = vmatmul.mubr.bf16.vlgmr.msra.gmra.mrb[24].mxu0 %v5531_v0  ;;  %v4294_v0 = vld [vmem:[#allocation28 + $0x90] sm:$0xff]  }
 0x51f   :  { %4079 = vmatpush3.bf16.msra.mxu1 %v4285_v19  ;;  %4101 = vmatpush3.bf16.msra.mxu0 %v4286_v24 }
 0x520   :  { %4080 = vmatprep.subr.bf16.mxu1 %v4287_v12  ;;  %4102 = vmatprep.subr.bf16.mxu0 %v4288_v45 }
 0x523   :  { %4081 = vmatpush3.bf16.msra.mxu1 %v4289_v18  ;;  %4103 = vmatpush3.bf16.msra.mxu0 %v4290_v21 }
 0x524   :  { %4082 = vmatprep.subr.bf16.mxu1 %v4291_v27  ;;  %4104 = vmatprep.subr.bf16.mxu0 %v4292_v23 }
 0x527   :  { %4083 = vmatpush3.bf16.msra.mxu1 %v4293_v13  ;;  %4105 = vmatpush3.bf16.msra.mxu0 %v4294_v0 }
 0x528   :  { %4084 = vmatprep.subr.bf16.mxu1 %v4295_v20  ;;  %4106 = vmatprep.subr.bf16.mxu0 %v4296_v3 }
 0x52b   :  { %4085 = vmatpush3.bf16.msra.mxu1 %v4297_v28  ;;  %4107 = vmatpush3.bf16.msra.mxu0 %v4298_v11 }
 0x52c   :  { %4086 = vmatprep.subr.bf16.mxu1 %v4299_v51  ;;  %4108 = vmatprep.subr.bf16.mxu0 %v4300_v29 }
 0x52f   :  { %4087 = vmatpush3.bf16.msra.mxu1 %v4301_v17  ;;  %4109 = vmatpush3.bf16.msra.mxu0 %v4302_v26 }
 0x530   :  { %4088 = vmatprep.subr.bf16.mxu1 %v4303_v31  ;;  %4110 = vmatprep.subr.bf16.mxu0 %v4304_v33 }
 0x533   :  { %4089 = vmatpush3.bf16.msra.mxu1 %v4305_v25  ;;  %4111 = vmatpush3.bf16.msra.mxu0 %v4306_v16 }
 0x534   :  { %4090 = vmatprep.subr.bf16.mxu1 %v4307_v22  ;;  %4112 = vmatprep.subr.bf16.mxu0 %v4308_v10 }
 0x537   :  { %4091 = vmatpush3.bf16.msra.mxu1 %v4309_v58  ;;  %4113 = vmatpush3.bf16.msra.mxu0 %v4310_v54 }
 0x538   :  { %4092 = vmatprep.subr.bf16.mxu1 %v4311_v30  ;;  %4114 = vmatprep.subr.bf16.mxu0 %v4312_v57 }
 0x53b   :  { %4093 = vmatpush3.bf16.msra.mxu1 %v4313_v55  ;;  %4115 = vmatpush3.bf16.msra.mxu0 %v4314_v32 }
 0x53c   :  { %4122 = vmatprep.subr.bf16.mxu1 %v4315_v44  ;;  %4144 = vmatprep.subr.bf16.mxu0 %v4316_v56 }
 0x5d1   :  { %v2547_v7 = vpop.f32.mrb[16].mxu1  ;;  %v2588_v46 = vpop.f32.mrb[20].mxu0 }
 0x5d2   :  { %v5549_v53 = vadd.f32 %v2547_v7, %v2156_v47  ;;  %v5551_v50 = vadd.f32 %v2588_v46, %v2164_v36  ;;  %v2549_v40 = vpop.f32.mrb[17].mxu1  ;;  %v2590_v63 = vpop.f32.mrb[21].mxu0 }
 0x5d3   :  { %v5553_v61 = vadd.f32 %v2549_v40, %v2160_v52  ;;  %v5555_v48 = vadd.f32 %v2590_v63, %v2168_v6  ;;  %v2551_v49 = vpop.f32.mrb[18].mxu1  ;;  %v2592_v59 = vpop.f32.mrb[22].mxu0 }
 0x5d4   :  { %v2677_v14 = vrot.slane %v5549_v53, 4  ;;  %v2725_v35 = vmul.f32 %v5549_v53, %v5549_v53  ;;  %v2689_v37 = vrot.slane %v5551_v50, 4  ;;  %v2727_v43 = vmul.f32 %v5551_v50, %v5551_v50  ;;  %v2552_v60 = vpop.f32.mrb[19].mxu1  ;;  %v2593_v62 = vpop.f32.mrb[23].mxu0 }
 0x5d5   :  { %v2683_v8 = vrot.slane %v5553_v61, 4  ;;  %v2726_v9 = vmul.f32 %v5553_v61, %v5553_v61  ;;  %v2695_v15 = vrot.slane %v5555_v48, 4  ;;  %v2728_v19 = vmul.f32 %v5555_v48, %v5555_v48 }
 0x5d6   :  { %v2678_v24 = vadd.f32 %v2677_v14, %v5549_v53  ;;  %v2733_v12 = vrot.slane %v2725_v35, 4  ;;  %v2690_v45 = vadd.f32 %v2689_v37, %v5551_v50  ;;  %v2745_v18 = vrot.slane %v2727_v43, 4 }
 0x5d7   :  { %v2684_v21 = vadd.f32 %v2683_v8, %v5553_v61  ;;  %v2739_v27 = vrot.slane %v2726_v9, 4  ;;  %v2696_v23 = vadd.f32 %v2695_v15, %v5555_v48  ;;  %v2751_v13 = vrot.slane %v2728_v19, 4 }
 0x5d8   :  { %v2679_v0 = vrot.slane %v2678_v24, 2  ;;  %v2734_v20 = vadd.f32 %v2733_v12, %v2725_v35  ;;  %v2691_v3 = vrot.slane %v2690_v45, 2  ;;  %v2746_v28 = vadd.f32 %v2745_v18, %v2727_v43 }
 0x5d9   :  { %v2685_v11 = vrot.slane %v2684_v21, 2  ;;  %v2740_v51 = vadd.f32 %v2739_v27, %v2726_v9  ;;  %v2697_v29 = vrot.slane %v2696_v23, 2  ;;  %v2752_v17 = vadd.f32 %v2751_v13, %v2728_v19 }
 0x5da   :  { %v2680_v26 = vadd.f32 %v2679_v0, %v2678_v24  ;;  %v2735_v31 = vrot.slane %v2734_v20, 2  ;;  %v2692_v33 = vadd.f32 %v2691_v3, %v2690_v45  ;;  %v2747_v25 = vrot.slane %v2746_v28, 2 }
 0x5db   :  { %v2686_v16 = vadd.f32 %v2685_v11, %v2684_v21  ;;  %v2741_v22 = vrot.slane %v2740_v51, 2  ;;  %v2698_v10 = vadd.f32 %v2697_v29, %v2696_v23  ;;  %v2753_v58 = vrot.slane %v2752_v17, 2 }
 0x5dc   :  { %v2681_v54 = vrot.slane %v2680_v26, 1  ;;  %v2736_v30 = vadd.f32 %v2735_v31, %v2734_v20  ;;  %v2693_v57 = vrot.slane %v2692_v33, 1  ;;  %v2748_v55 = vadd.f32 %v2747_v25, %v2746_v28  ;;  %v5589_v28 = vld [vmem:[#allocation25] sm:$0xff] }
 0x5dd   :  { %v2687_v32 = vrot.slane %v2686_v16, 1  ;;  %v2742_v44 = vadd.f32 %v2741_v22, %v2740_v51  ;;  %v2699_v56 = vrot.slane %v2698_v10, 1  ;;  %v2754_v47 = vadd.f32 %v2753_v58, %v2752_v17  ;;  %v5591_v51 = vld [vmem:[#allocation26] sm:$0xff] }
 0x5de   :  { %v2682_v36 = vadd.f32 %v2681_v54, %v2680_v26  ;;  %v2737_v52 = vrot.slane %v2736_v30, 1  ;;  %v2694_v6 = vadd.f32 %v2693_v57, %v2692_v33  ;;  %v2749_v7 = vrot.slane %v2748_v55, 1 }
 0x5df   :  { %v2688_v46 = vadd.f32 %v2687_v32, %v2686_v16  ;;  %v2743_v40 = vrot.slane %v2742_v44, 1  ;;  %v2700_v63 = vadd.f32 %v2699_v56, %v2698_v10  ;;  %v2755_v49 = vrot.slane %v2754_v47, 1 }
 0x5e0   :  { %v2738_v59 = vadd.f32 %v2737_v52, %v2736_v30  ;;  %v5573_v14 = vmul.f32 0.125, %v2682_v36  ;;  %v2750_v35 = vadd.f32 %v2749_v7, %v2748_v55  ;;  %v5575_v37 = vmul.f32 0.125, %v2694_v6 }
 0x5e1   :  { %v2744_v43 = vadd.f32 %v2743_v40, %v2742_v44  ;;  %v5577_v60 = vmul.f32 0.125, %v2688_v46  ;;  %v2756_v9 = vadd.f32 %v2755_v49, %v2754_v47  ;;  %v5581_v15 = vmul.f32 0.125, %v2700_v63 }
 0x5e2   :  { %v2789_v62 = vmul.f32 0.125, %v2738_v59  ;;  %v2797_v8 = vmul.f32 %v5573_v14, %v5573_v14  ;;  %v2791_v19 = vmul.f32 0.125, %v2750_v35  ;;  %v2799_v24 = vmul.f32 %v5575_v37, %v5575_v37 }
 0x5e3   :  { %v2790_v12 = vmul.f32 0.125, %v2744_v43  ;;  %v2798_v45 = vmul.f32 %v5577_v60, %v5577_v60  ;;  %v2792_v21 = vmul.f32 0.125, %v2756_v9  ;;  %v2800_v27 = vmul.f32 %v5581_v15, %v5581_v15 }
 0x5e4   :  { %v2805_v18 = vsub.f32 %v2789_v62, %v2797_v8  ;;  %v2807_v23 = vsub.f32 %v2791_v19, %v2799_v24  ;;  %v2172_v26 = vrot.slane %v5539_v34, %v5377_v38  ;;  %v2180_v31 = vrot.slane %v5539_v34, %v5380_v39 }
 0x5e5   :  { %v2806_v13 = vsub.f32 %v2790_v12, %v2798_v45  ;;  %v2808_v20 = vsub.f32 %v2792_v21, %v2800_v27  ;;  %v2176_v25 = vrot.slane %v5539_v34, %v5383_v41  ;;  %v2184_v16 = vrot.slane %v5539_v34, %v5386_v42 }
 0x5e6   :  { %v2813_v0 = vmax.f32 %v2805_v18, 0.0  ;;  %v2815_v3 = vmax.f32 %v2807_v23, 0.0  ;;  %v2862_v22 = vrot.slane %v5589_v28, %v5323_v4  ;;  %v2870_v58 = vrot.slane %v5589_v28, %v5326_v5 }
 0x5e7   :  { %v2814_v11 = vmax.f32 %v2806_v13, 0.0  ;;  %v2816_v17 = vmax.f32 %v2808_v20, 0.0  ;;  %v2858_v54 = vrot.slane %v5589_v28, %v5315_v1  ;;  %v2866_v30 = vrot.slane %v5589_v28, %v5318_v2 }
 0x5e8   :  { %v2829_v29 = vadd.f32 1e-05, %v2813_v0  ;;  %v2831_v33 = vadd.f32 1e-05, %v2815_v3  ;;  %v2821_v57 = vsub.f32 %v5549_v53, %v5573_v14  ;;  %v2823_v34 = vsub.f32 %v5551_v50, %v5575_v37 }
 0x5e9   :  { %v2830_v55 = vadd.f32 1e-05, %v2814_v11  ;;  %v2908_v56 = vrot.slane %v5591_v51, %v5315_v1  ;;  %v2832_v47 = vadd.f32 1e-05, %v2816_v17  ;;  %v2822_v46 = vsub.f32 %v5553_v61, %v5577_v60  ;;  %v4317_v1 = vld [vmem:[#allocation28 + $0x100] sm:$0xff]  }
 0x5ea   :  { %4367 = vrsqrt.f32 %v2829_v29  ;;  %v2824_v53 = vsub.f32 %v5555_v48, %v5581_v15 }
 0x5eb   :  { %4369 = vrsqrt.f32 %v2831_v33 }
 0x5ec   :  { %4371 = vrsqrt.f32 %v2830_v55 }
 0x5ed   :  { %4373 = vrsqrt.f32 %v2832_v47 }
 0x5f1   :  { %v2629_v32 = vpop.f32.mrb[20].mxu1  ;;  %v2670_v44 = vpop.f32.mrb[24].mxu0 }
 0x5f2   :  { %v5617_v36 = vadd.f32 %v2629_v32, %v2172_v26  ;;  %v5619_v52 = vadd.f32 %v2670_v44, %v2180_v31  ;;  %v2631_v6 = vpop.f32.mrb[21].mxu1  ;;  %v2672_v7 = vpop.f32.mrb[25].mxu0 }
 0x5f3   :  { %v5623_v40 = vadd.f32 %v2631_v6, %v2176_v25  ;;  %v5625_v63 = vadd.f32 %v2672_v7, %v2184_v16  ;;  %v2633_v49 = vpop.f32.mrb[22].mxu1  ;;  %v2674_v59 = vpop.f32.mrb[26].mxu0 }
 0x5f4   :  { %v2701_v35 = vrot.slane %v5617_v36, 4  ;;  %v2729_v43 = vmul.f32 %v5617_v36, %v5617_v36  ;;  %v2713_v62 = vrot.slane %v5619_v52, 4  ;;  %v2731_v8 = vmul.f32 %v5619_v52, %v5619_v52  ;;  %v2634_v9 = vpop.f32.mrb[23].mxu1  ;;  %v2675_v19 = vpop.f32.mrb[27].mxu0 }
 0x5f5   :  { %v2707_v24 = vrot.slane %v5623_v40, 4  ;;  %v2730_v12 = vmul.f32 %v5623_v40, %v5623_v40  ;;  %v2719_v45 = vrot.slane %v5625_v63, 4  ;;  %v2732_v17 = vmul.f32 %v5625_v63, %v5625_v63  ;;  %v4368_v59 = vpop.eup %4367 }
 0x5f6   :  { %v2702_v18 = vadd.f32 %v2701_v35, %v5617_v36  ;;  %v2757_v21 = vrot.slane %v2729_v43, 4  ;;  %v2714_v27 = vadd.f32 %v2713_v62, %v5619_v52  ;;  %v2769_v23 = vrot.slane %v2731_v8, 4  ;;  %v4370_v19 = vpop.eup %4369 }
 0x5f7   :  { %v2708_v13 = vadd.f32 %v2707_v24, %v5623_v40  ;;  %v2763_v0 = vrot.slane %v2730_v12, 4  ;;  %v2720_v20 = vadd.f32 %v2719_v45, %v5625_v63  ;;  %v2775_v44 = vrot.slane %v2732_v17, 4 }
 0x5f8   :  { %v2703_v3 = vrot.slane %v2702_v18, 2  ;;  %v2758_v11 = vadd.f32 %v2757_v21, %v2729_v43  ;;  %v2715_v29 = vrot.slane %v2714_v27, 2  ;;  %v2770_v26 = vadd.f32 %v2769_v23, %v2731_v8 }
 0x5f9   :  { %v2709_v31 = vrot.slane %v2708_v13, 2  ;;  %v2764_v33 = vadd.f32 %v2763_v0, %v2730_v12  ;;  %v2721_v25 = vrot.slane %v2720_v20, 2  ;;  %v2776_v9 = vadd.f32 %v2775_v44, %v2732_v17 }
 0x5fa   :  { %v2704_v16 = vadd.f32 %v2703_v3, %v2702_v18  ;;  %v2759_v55 = vrot.slane %v2758_v11, 2  ;;  %v2716_v32 = vadd.f32 %v2715_v29, %v2714_v27  ;;  %v2771_v47 = vrot.slane %v2770_v26, 2  ;;  %v4372_v27 = vpop.eup %4371 }
 0x5fb   :  { %v2710_v6 = vadd.f32 %v2709_v31, %v2708_v13  ;;  %v2765_v7 = vrot.slane %v2764_v33, 2  ;;  %v2722_v49 = vadd.f32 %v2721_v25, %v2720_v20  ;;  %v2777_v0 = vrot.slane %v2776_v9, 2  ;;  %v4374_v20 = vpop.eup %4373 }
 0x5fc   :  { %v2705_v35 = vrot.slane %v2704_v16, 1  ;;  %v2760_v62 = vadd.f32 %v2759_v55, %v2758_v11  ;;  %v2717_v43 = vrot.slane %v2716_v32, 1  ;;  %v2772_v24 = vadd.f32 %v2771_v47, %v2770_v26 }
 0x5fd   :  { %v2711_v45 = vrot.slane %v2710_v6, 1  ;;  %v2766_v8 = vadd.f32 %v2765_v7, %v2764_v33  ;;  %v2723_v21 = vrot.slane %v2722_v49, 1  ;;  %v2778_v17 = vadd.f32 %v2777_v0, %v2776_v9 }
 0x5fe   :  { %v2706_v12 = vadd.f32 %v2705_v35, %v2704_v16  ;;  %v2761_v23 = vrot.slane %v2760_v62, 1  ;;  %v2718_v18 = vadd.f32 %v2717_v43, %v2716_v32  ;;  %v2773_v3 = vrot.slane %v2772_v24, 1 }
 0x5ff   :  { %v2712_v29 = vadd.f32 %v2711_v45, %v2710_v6  ;;  %v2767_v13 = vrot.slane %v2766_v8, 1  ;;  %v2724_v31 = vadd.f32 %v2723_v21, %v2722_v49  ;;  %v2845_v32 = vmul.f32 %v4368_v59, %v2821_v57 }
 0x600   :  { %v2762_v25 = vadd.f32 %v2761_v23, %v2760_v62  ;;  %v5643_v10 = vmul.f32 0.125, %v2706_v12  ;;  %v5645_v11 = vmul.f32 0.125, %v2718_v18  ;;  %v2774_v26 = vadd.f32 %v2773_v3, %v2772_v24 }
 0x601   :  { %v2768_v55 = vadd.f32 %v2767_v13, %v2766_v8  ;;  %v5647_v33 = vmul.f32 0.125, %v2712_v29  ;;  %v5649_v16 = vmul.f32 0.125, %v2724_v31  ;;  %v2847_v7 = vmul.f32 %v4370_v19, %v2823_v34 }
 0x602   :  { %v2793_v44 = vmul.f32 0.125, %v2762_v25  ;;  %v2801_v47 = vmul.f32 %v5643_v10, %v5643_v10  ;;  %v2803_v6 = vmul.f32 %v5645_v11, %v5645_v11  ;;  %v2795_v49 = vmul.f32 0.125, %v2774_v26 }
 0x603   :  { %v2794_v35 = vmul.f32 0.125, %v2768_v55  ;;  %v2802_v62 = vmul.f32 %v5647_v33, %v5647_v33  ;;  %v2779_v14 = vrot.slane %v2778_v17, 1  ;;  %v2920_v57 = vrot.slane %v5591_v51, %v5326_v5  ;;  %v4320_v55 = vld [vmem:[#allocation28 + $0x1c8] sm:$0xff]  }
 0x604   :  { %v2916_v59 = vrot.slane %v5591_v51, %v5318_v2  ;;  %v2809_v43 = vsub.f32 %v2793_v44, %v2801_v47  ;;  %v2804_v50 = vmul.f32 %v5649_v16, %v5649_v16  ;;  %v2846_v37 = vmul.f32 %v4372_v27, %v2822_v46  ;;  %v4322_v44 = vld [vmem:[#allocation28 + $0x188] sm:$0xff]   ;;  %v4323_v47 = vld [vmem:[#allocation28 + $0x150] sm:$0xff]  }
 0x605   :  { %v2810_v9 = vsub.f32 %v2794_v35, %v2802_v62  ;;  %v2811_v34 = vsub.f32 %v2795_v49, %v2803_v6  ;;  %v2780_v19 = vadd.f32 %v2779_v14, %v2778_v17  ;;  %v2848_v24 = vmul.f32 %v4374_v20, %v2824_v53  ;;  %v4318_v17 = vld [vmem:[#allocation28 + $0x180] sm:$0xff]   ;;  %v4324_v6 = vld [vmem:[#allocation28 + $0x1d0] sm:$0xff]   ;;  %v4327_v14 = vld [vmem:[#allocation28 + $0x158] sm:$0xff]  }
 0x606   :  { %v2895_v48 = vmul.f32 %v2858_v54, %v2845_v32  ;;  %v2896_v45 = vmul.f32 %v2862_v22, %v2846_v37  ;;  %v2897_v8 = vmul.f32 %v2866_v30, %v2847_v7  ;;  %v2817_v46 = vmax.f32 %v2809_v43, 0.0  ;;  %v4321_v32 = vld [vmem:[#allocation28 + $0x108] sm:$0xff]   ;;  %v4325_v49 = vld [vmem:[#allocation28 + $0x110] sm:$0xff]  }
 0x607   :  { %v2818_v15 = vmax.f32 %v2810_v9, 0.0  ;;  %v2796_v21 = vmul.f32 0.125, %v2780_v19  ;;  %v2898_v61 = vmul.f32 %v2870_v58, %v2848_v24  ;;  %v5810_v12 = vrot.slane %v5591_v51, %v5323_v4  ;;  %v4319_v4 = vld [vmem:[#allocation28 + $0x148] sm:$0xff]   ;;  %v4326_v53 = vld [vmem:[#allocation28 + $0x190] sm:$0xff]   ;;  %v4331_v19 = vld [vmem:[#allocation28 + $0x160] sm:$0xff]  }
 0x608   :  { %v2945_v60 = vadd.f32 %v2908_v56, %v2895_v48  ;;  %v2947_v22 = vadd.f32 %v2916_v59, %v2897_v8  ;;  %v2819_v18 = vmax.f32 %v2811_v34, 0.0  ;;  %v2833_v29 = vadd.f32 1e-05, %v2817_v46  ;;  %v4330_v34 = vld [vmem:[#allocation28 + $0x198] sm:$0xff]   ;;  %v4332_v48 = vld [vmem:[#allocation28 + $0x1e0] sm:$0xff]  }
 0x609   :  { %v2834_v54 = vadd.f32 1e-05, %v2818_v15  ;;  %v2946_v23 = vadd.f32 %v5810_v12, %v2896_v45  ;;  %v2812_v0 = vsub.f32 %v2796_v21, %v2804_v50  ;;  %v2948_v2 = vadd.f32 %v2920_v57, %v2898_v61  ;;  %v4328_v57 = vld [vmem:[#allocation28 + $0x1d8] sm:$0xff]   ;;  %v4333_v21 = vld [vmem:[#allocation28 + $0x120] sm:$0xff]   ;;  %v4335_v12 = vld [vmem:[#allocation28 + $0x168] sm:$0xff]  }
 0x60a   :  { %v2953_v30 = vmax.f32 %v2945_v60, 0.0  ;;  %v2955_v3 = vmax.f32 %v2947_v22, 0.0  ;;  %v2835_v56 = vadd.f32 1e-05, %v2819_v18  ;;  %v2826_v7 = vsub.f32 %v5623_v40, %v5647_v33  ;;  %v4329_v40 = vld [vmem:[#allocation28 + $0x118] sm:$0xff]   ;;  %v4336_v22 = vld [vmem:[#allocation28 + $0x1e8] sm:$0xff]  }
 0x60b   :  { %v2954_v27 = vmax.f32 %v2946_v23, 0.0  ;;  %4375 = vrsqrt.f32 %v2834_v54  ;;  %v2820_v5 = vmax.f32 %v2812_v0, 0.0  ;;  %v2956_v58 = vmax.f32 %v2948_v2, 0.0  ;;  %v4334_v54 = vld [vmem:[#allocation28 + $0x1a0] sm:$0xff]   ;;  %v4338_v0 = vld [vmem:[#allocation28 + $0x1a8] sm:$0xff]   ;;  %v4339_v2 = vld [vmem:[#allocation28 + $0x170] sm:$0xff]  }
 0x60c   :  { %v2961_v25 = vpack.c.bf16 %v2953_v30, %v2953_v30  ;;  %v2963_v26 = vpack.c.bf16 %v2955_v3, %v2955_v3  ;;  %v2878_v35 = vrot.slane %v5589_v28, %v5383_v41  ;;  %v2928_v43 = vrot.slane %v5591_v51, %v5383_v41  ;;  %v4340_v3 = vld [vmem:[#allocation28 + $0x1f0] sm:$0xff]  }
 0x60d   :  { %v2962_v13 = vpack.c.bf16 %v2954_v27, %v2954_v27  ;;  %v2836_v31 = vadd.f32 1e-05, %v2820_v5  ;;  %v2964_v20 = vpack.c.bf16 %v2956_v58, %v2956_v58  ;;  %v2828_v9 = vsub.f32 %v5625_v63, %v5649_v16 }
 0x60e   :  { %v2886_v50 = vrot.slane %v5589_v28, %v5386_v42  ;;  %v2936_v41 = vrot.slane %v5591_v51, %v5386_v42  ;;  %v2825_v16 = vsub.f32 %v5617_v36, %v5643_v10  ;;  %v2827_v8 = vsub.f32 %v5619_v52, %v5645_v11  ;;  %v4337_v52 = vld [vmem:[#allocation28 + $0x128] sm:$0xff]  }
 0x60f   :  { %3520 = vmatprep.mubr.bf16.mxu1 %v2962_v13  ;;  %4377 = vrsqrt.f32 %v2836_v31  ;;  %3560 = vmatprep.mubr.bf16.mxu0 %v2964_v20  ;;  %v2874_v23 = vrot.slane %v5589_v28, %v5377_v38  ;;  %v2882_v36 = vrot.slane %v5589_v28, %v5380_v39  ;;  %v2924_v27 = vrot.slane %v5591_v51, %v5377_v38  ;;  %v4341_v28 = vld [vmem:[#allocation28 + $0x130] sm:$0xff]   ;;  %v4344_v31 = vld [vmem:[#allocation28 + $0x1f8] sm:$0xff]  }
 0x610   :  { %3521 = vmatmul.mubr.bf16.vlgmr.msra.gmra.mrb[24].mxu1 %v2961_v25  ;;  %4379 = vrsqrt.f32 %v2833_v29  ;;  %3561 = vmatmul.mubr.bf16.vlgmr.msra.gmra.mrb[28].mxu0 %v2963_v26  ;;  %v2932_v29 = vrot.slane %v5591_v51, %v5380_v39  ;;  %v4342_v13 = vld [vmem:[#allocation28 + $0x1b0] sm:$0xff]   ;;  %v4345_v38 = vld [vmem:[#allocation28 + $0x138] sm:$0xff]  }
 0x611   :  { %4123 = vmatpush3.bf16.msra.mxu1 %v4317_v1  ;;  %4381 = vrsqrt.f32 %v2835_v56  ;;  %4145 = vmatpush3.bf16.msra.mxu0 %v4318_v17  ;;  %v4343_v1 = vld [vmem:[#allocation28 + $0x178] sm:$0xff]  }
 0x612   :  { %4124 = vmatprep.subr.bf16.mxu1 %v4319_v4  ;;  %4146 = vmatprep.subr.bf16.mxu0 %v4320_v55  ;;  %v4346_v25 = vld [vmem:[#allocation28 + $0x1b8] sm:$0xff]  }
 0x615   :  { %4125 = vmatpush3.bf16.msra.mxu1 %v4321_v32  ;;  %v4376_v62 = vpop.eup %4375  ;;  %4147 = vmatpush3.bf16.msra.mxu0 %v4322_v44 }
 0x616   :  { %4126 = vmatprep.subr.bf16.mxu1 %v4323_v47  ;;  %4148 = vmatprep.subr.bf16.mxu0 %v4324_v6  ;;  %v2850_v59 = vmul.f32 %v4376_v62, %v2826_v7 }
 0x618   :  { %v2900_v33 = vmul.f32 %v2878_v35, %v2850_v59 }
 0x619   :  { %4127 = vmatpush3.bf16.msra.mxu1 %v4325_v49  ;;  %v4378_v37 = vpop.eup %4377  ;;  %4149 = vmatpush3.bf16.msra.mxu0 %v4326_v53 }
 0x61a   :  { %4128 = vmatprep.subr.bf16.mxu1 %v4327_v14  ;;  %v4380_v24 = vpop.eup %4379  ;;  %4150 = vmatprep.subr.bf16.mxu0 %v4328_v57  ;;  %v2950_v15 = vadd.f32 %v2928_v43, %v2900_v33  ;;  %v2852_v45 = vmul.f32 %v4378_v37, %v2828_v9 }
 0x61b   :  { %v4382_v63 = vpop.eup %4381  ;;  %v2849_v46 = vmul.f32 %v4380_v24, %v2825_v16 }
 0x61c   :  { %v2958_v61 = vmax.f32 %v2950_v15, 0.0  ;;  %v2902_v60 = vmul.f32 %v2886_v50, %v2852_v45  ;;  %v2851_v42 = vmul.f32 %v4382_v63, %v2827_v8 }
 0x61d   :  { %4129 = vmatpush3.bf16.msra.mxu1 %v4329_v40  ;;  %4151 = vmatpush3.bf16.msra.mxu0 %v4330_v34  ;;  %v2899_v30 = vmul.f32 %v2874_v23, %v2849_v46 }
 0x61e   :  { %4130 = vmatprep.subr.bf16.mxu1 %v4331_v19  ;;  %4152 = vmatprep.subr.bf16.mxu0 %v4332_v48  ;;  %v2966_v18 = vpack.c.bf16 %v2958_v61, %v2958_v61  ;;  %v2952_v10 = vadd.f32 %v2936_v41, %v2902_v60  ;;  %v2901_v58 = vmul.f32 %v2882_v36, %v2851_v42 }
 0x61f   :  { %v2949_v56 = vadd.f32 %v2924_v27, %v2899_v30 }
 0x620   :  { %3600 = vmatprep.mubr.bf16.mxu1 %v2966_v18  ;;  %v2960_v11 = vmax.f32 %v2952_v10, 0.0  ;;  %v2951_v20 = vadd.f32 %v2932_v29, %v2901_v58 }
 0x621   :  { %4131 = vmatpush3.bf16.msra.mxu1 %v4333_v21  ;;  %4153 = vmatpush3.bf16.msra.mxu0 %v4334_v54  ;;  %v2957_v17 = vmax.f32 %v2949_v56, 0.0 }
 0x622   :  { %4132 = vmatprep.subr.bf16.mxu1 %v4335_v12  ;;  %4154 = vmatprep.subr.bf16.mxu0 %v4336_v22  ;;  %v2968_v5 = vpack.c.bf16 %v2960_v11, %v2960_v11  ;;  %v2959_v4 = vmax.f32 %v2951_v20, 0.0 }
 0x623   :  { %v2965_v39 = vpack.c.bf16 %v2957_v17, %v2957_v17 }
 0x624   :  { %3640 = vmatprep.mubr.bf16.mxu0 %v2968_v5  ;;  %v2967_v51 = vpack.c.bf16 %v2959_v4, %v2959_v4 }
 0x625   :  { %4133 = vmatpush3.bf16.msra.mxu1 %v4337_v52  ;;  %4155 = vmatpush3.bf16.msra.mxu0 %v4338_v0 }
 0x626   :  { %4134 = vmatprep.subr.bf16.mxu1 %v4339_v2  ;;  %4156 = vmatprep.subr.bf16.mxu0 %v4340_v3 }
 0x629   :  { %4135 = vmatpush3.bf16.msra.mxu1 %v4341_v28  ;;  %4157 = vmatpush3.bf16.msra.mxu0 %v4342_v13 }
 0x62a   :  { %4136 = vmatprep.subr.bf16.mxu1 %v4343_v1  ;;  %4158 = vmatprep.subr.bf16.mxu0 %v4344_v31 }
 0x62d   :  { %4137 = vmatpush3.bf16.msra.mxu1 %v4345_v38  ;;  %4159 = vmatpush3.bf16.msra.mxu0 %v4346_v25 }
 0x630   :  { %3601 = vmatmul.mubr.bf16.vlgmr.msra.gmra.mrb[28].mxu1 %v2965_v39  ;;  %3641 = vmatmul.mubr.bf16.vlgmr.msra.gmra.mrb[32].mxu0 %v2967_v51 }
 0x631   :  { %4790 = shalt.err (!%p4787_p8)
}
 0x632   :  { %s4791_s4 = scalar_lea.hbm %s5783_s19, 128 }
 0x633   :  { %p4792_p9 = scmp.ne.s32.totalorder %s5783_s19, %s4791_s4  ;;  %p4795_p10 = scmp.lt.u32.totalorder %s4791_s4, %s5783_s19 }
 0x635   :  { %p4797_p11 = pnand %p4795_p10, %p4792_p9 }
 0x637   :  { %4800 = shalt.err (!%p4797_p11)
}
 0x638   :  { %3668 = dma.vmem_to_hbm [thread:$0]  %s3666_s2, 128, %s5783_s19, [#allocation33]  }
 0x639   :  { %s4801_s14 = scalar_lea.vmem %s3656_s22, 128  ;;  %p4806_p13 = scmp.lt.s32.totalorder %s3656_s22, %s3656_s22 }
 0x63a   :  { %p4802_p12 = scmp.ne.s32.totalorder %s3656_s22, %s4801_s14  ;;  %p4807_p0 = scmp.lt.s32.totalorder %s4801_s14, %s4801_s14 }
 0x63c   :  { %p4808_p1 = por %p4807_p0, %p4806_p13 }
 0x63e   :  { %p4809_p2 = pnand %p4808_p1, %p4802_p12 }
 0x640   :  { %4812 = shalt.err (!%p4809_p2)
}
 0x641   :  { %s4813_s11 = scalar_lea.hbm %s5782_s18, 128 }
 0x642   :  { %p4814_p3 = scmp.ne.s32.totalorder %s5782_s18, %s4813_s11  ;;  %p4817_p4 = scmp.lt.u32.totalorder %s4813_s11, %s5782_s18 }
 0x644   :  { %p4819_p5 = pnand %p4817_p4, %p4814_p3 }
 0x646   :  { %4822 = shalt.err (!%p4819_p5)
}
 0x647   :  { %3658 = dma.vmem_to_hbm [thread:$0]  %s3656_s22, 128, %s5782_s18, [#allocation4]  }
 0x648   :  { %s4920_s30 = smov [#allocation34]  }
 0x649   :  { %s3675_s6 = sshll.u32 %s4920_s30, 4  ;;  %s3676_s6 = int_to_ptr.vmem [resolvable:$true] %s3675_s6 }
 0x64a   :  { %s4823_s12 = scalar_lea.vmem %s3676_s6, 128  ;;  %p4828_p7 = scmp.lt.s32.totalorder %s3676_s6, %s3676_s6 }
 0x64b   :  { %p4824_p6 = scmp.ne.s32.totalorder %s3676_s6, %s4823_s12  ;;  %p4829_p8 = scmp.lt.s32.totalorder %s4823_s12, %s4823_s12 }
 0x64d   :  { %p4830_p9 = por %p4829_p8, %p4828_p7 }
 0x64f   :  { %p4831_p10 = pnand %p4830_p9, %p4824_p6 }
 0x651   :  { %4834 = shalt.err (!%p4831_p10)
}
 0x652   :  { %s4835_s17 = scalar_lea.hbm %s5784_s20, 128 }
 0x653   :  { %p4836_p11 = scmp.ne.s32.totalorder %s5784_s20, %s4835_s17  ;;  %p4839_p12 = scmp.lt.u32.totalorder %s4835_s17, %s5784_s20 }
 0x655   :  { %p4841_p13 = pnand %p4839_p12, %p4836_p11 }
 0x657   :  { %4844 = shalt.err (!%p4841_p13)
}
 0x658   :  { %3678 = dma.vmem_to_hbm [thread:$0]  %s3676_s6, 128, %s5784_s20, [#allocation33]   ;;  %v3925_v32 = vld [vmem:[#allocation29] ss:$0 sm:$0xff] }
 0x659   :  { %s4921_s20 = smov [#allocation35]  }
 0x65a   :  { %s3685_s1 = sshll.u32 %s4921_s20, 4  ;;  %s3686_s1 = int_to_ptr.vmem [resolvable:$true] %s3685_s1 }
 0x65b   :  { %s4845_s4 = scalar_lea.vmem %s3686_s1, 128  ;;  %p4850_p1 = scmp.lt.s32.totalorder %s3686_s1, %s3686_s1 }
 0x65c   :  { %p4846_p0 = scmp.ne.s32.totalorder %s3686_s1, %s4845_s4  ;;  %p4851_p2 = scmp.lt.s32.totalorder %s4845_s4, %s4845_s4 }
 0x65e   :  { %p4852_p3 = por %p4851_p2, %p4850_p1 }
 0x660   :  { %p4853_p4 = pnand %p4852_p3, %p4846_p0 }
 0x6e3   :  { %v4094_v26 = vpop.f32.mrb[24].mxu1  ;;  %v4116_v55 = vpop.f32.mrb[28].mxu0 }
 0x6e4   :  { %v4095_v44 = vpop.f32.mrb[25].mxu1  ;;  %v4117_v6 = vpop.f32.mrb[29].mxu0 }
 0x6e5   :  { %v4096_v47 = vadd.f32 %v4095_v44, %v4094_v26  ;;  %v4097_v7 = vpop.f32.mrb[26].mxu1  ;;  %v4118_v49 = vadd.f32 %v4117_v6, %v4116_v55  ;;  %v4119_v35 = vpop.f32.mrb[30].mxu0 }
 0x6e6   :  { %v4098_v62 = vpop.f32.mrb[27].mxu1  ;;  %v4120_v14 = vpop.f32.mrb[31].mxu0 }
 0x6e7   :  { %v3523_v53 = vadd.f32 %v4096_v47, %v3925_v32 }
 0x6e9   :  { %v3563_v57 = vadd.f32 %v4118_v49, %v3523_v53 }
 0x703   :  { %v4138_v59 = vpop.f32.mrb[28].mxu1  ;;  %v4160_v43 = vpop.f32.mrb[32].mxu0 }
 0x704   :  { %v4139_v9 = vpop.f32.mrb[29].mxu1  ;;  %v4161_v33 = vpop.f32.mrb[33].mxu0 }
 0x705   :  { %v4140_v40 = vadd.f32 %v4139_v9, %v4138_v59  ;;  %v4141_v50 = vpop.f32.mrb[30].mxu1  ;;  %v4162_v37 = vadd.f32 %v4161_v33, %v4160_v43  ;;  %v4163_v34 = vpop.f32.mrb[34].mxu0 }
 0x706   :  { %v4142_v19 = vpop.f32.mrb[31].mxu1  ;;  %v4164_v48 = vpop.f32.mrb[35].mxu0 }
 0x707   :  { %v3603_v24 = vadd.f32 %v4140_v40, %v3563_v57 }
 0x709   :  { %v3643_v15 = vadd.f32 %v4162_v37, %v3603_v24 }
 0x70b   :  { %3648 = vst [vmem:[#allocation35] sm:$0xff] %v3643_v15 }
 0x70c   :  { %4856 = shalt.err (!%p4853_p4)
}
 0x70d   :  { %s5811_s25 = sld [smem:[#allocation56_spill]] }
 0x713   :  { %s4857_s29 = scalar_lea.hbm %s5811_s25, 128 }
 0x714   :  { %p4858_p5 = scmp.ne.s32.totalorder %s5811_s25, %s4857_s29  ;;  %p4861_p6 = scmp.lt.u32.totalorder %s4857_s29, %s5811_s25 }
 0x716   :  { %p4863_p7 = pnand %p4861_p6, %p4858_p5 }
 0x718   :  { %4866 = shalt.err (!%p4863_p7)
}
 0x719   :  { %3688 = dma.vmem_to_hbm [thread:$0]  %s3686_s1, 128, %s5811_s25, [#allocation36]  }
 0x71a   :  { %4887 = dma.done.wait [#allocation4], 128  }
 0x71b   :  { %4888 = vsyncadd [#allocation4], 4294967168 }
 0x71c   :  { %4889 = dma.done.wait [#allocation33], 256  }
 0x71d   :  { %4890 = vsyncadd [#allocation33], 4294967040 }
 0x71e   :  { %4891 = dma.done.wait [#allocation36], 128  }
 0x71f   :  { %4892 = vsyncadd [#allocation36], 4294967168 }
 0x720   :  { %3701 = vsyncpa [#allocation3], 1 }
 0x721   :  { %3702 = vsyncpa [#allocation6], 1 }
 0x722   :  { %3703 = vsyncpa [#allocation9], 1 }
 0x723   :  { %3704 = vsyncpa [#allocation12], 1 }
 0x724   :  { %3705 = vsyncpa [#allocation15], 1 }
 0x725   :  { %3706 = vsyncpa [#allocation18], 1 }
 0x726   :  { %3707 = vsyncpa [#allocation21], 1 }
 0x727   :  { %3708 = vsyncpa [#allocation24], 1 }
 0x728   :  { %3709 = vsyncpa [#allocation27], 1 }
 0x729   :  { %3710 = vsyncpa [#allocation30], 1 }
 0x72a   :  { %3711 = vsyncpa [#allocation4], 1 }
 0x72b   :  { %3712 = vsyncpa [#allocation33], 1 }
 0x72c   :  { %3713 = vsyncpa [#allocation36], 1 }

</bundles_post_ra>
